<compile_context>
chip_gen: v7x
topology: tpu7x:2x2x1
jax: 0.10.0
libtpu: 0.0.40
codegen_flags: <defaults>
</compile_context>

<pallas_src>
import functools
import math

import jax
import jax.numpy as jnp
import numpy as np
from jax import lax
from jax.experimental import pallas as pl
from jax.experimental.pallas import tpu as pltpu


def _round_up(x, m):
    return (x + m - 1) // m * m


def _erf_approx(x):
    # Abramowitz & Stegun 7.1.26 (|err| < 1.5e-7), VPU/EUP ops only.
    a1, a2, a3, a4, a5 = (0.254829592, -0.284496736, 1.421413741,
                          -1.453152027, 1.061405429)
    p = 0.3275911
    sgn = jnp.where(x >= 0.0, 1.0, -1.0)
    ax = jnp.abs(x)
    z = 1.0 + p * ax
    t = pl.reciprocal(z, approx=True)      # divide on the EUP slot
    t = t * (2.0 - z * t)                  # one Newton step -> ~f32-exact 1/z (cheap VPU)
    poly = ((((a5 * t + a4) * t + a3) * t + a2) * t + a1) * t
    return sgn * (1.0 - poly * jnp.exp(-ax * ax))


def _gelu_exact(x):
    # torch.nn.GELU default (erf form).
    return 0.5 * x * (1.0 + _erf_approx(x * 0.7071067811865476))


def _mlp_fused_kernel(x_ref, w1_ref, b1_ref, wdw_ref, bdw_ref, w2_ref, b2_ref,
                      o_ref, h_scr, *, S, W, compute_dtype):
    # x_ref : (1, S+2, Wr, Cr) row strip of the spatially zero-padded NHWC input
    # h_scr : (S+2, Wr, Hp) f32 VMEM scratch holding the fc1 hidden activation + halo.
    f32 = jnp.float32
    Sp2 = S + 2
    Cr = x_ref.shape[-1]
    Wr = x_ref.shape[-2]
    Hp = w1_ref.shape[-1]
    s = pl.program_id(1)

    # ---- fc1 (1x1 conv) on the strip rows + their 1-pixel halo ----
    x3 = x_ref[0]                                         # (Sp2, Wr, Cr)
    if Cr <= 16:
        # Tiny K: Cr broadcast-MACs on the VPU beat a K<<128 MXU matmul.
        hm = x3[:, :, 0:1].astype(f32) * w1_ref[0:1, :].astype(f32)
        for c in range(1, Cr):
            hm = hm + x3[:, :, c:c + 1].astype(f32) * w1_ref[c:c + 1, :].astype(f32)
    else:
        hm = jnp.dot(x3.reshape(Sp2 * Wr, Cr), w1_ref[...],
                     preferred_element_type=f32).reshape(Sp2, Wr, Hp)
    h_scr[...] = hm + b1_ref[...]

    # The reference zero-pads the *hidden* activation before the 3x3 depthwise conv.
    # x's halo is zero-padded on the host, so fc1's matmul part is already zero there;
    # just clear the bias we added at out-of-image positions.
    zcol = jnp.zeros((Sp2, 1, Hp), f32)
    h_scr[:, 0:1, :] = zcol                               # left image border
    h_scr[:, W + 1:W + 2, :] = zcol                       # right image border
    zrow = jnp.zeros((1, Wr, Hp), f32)

    @pl.when(s == 0)
    def _():                                              # top image border
        h_scr[0:1, :, :] = zrow

    @pl.when(s == pl.num_programs(1) - 1)
    def _():                                              # bottom image border
        h_scr[Sp2 - 1:Sp2, :, :] = zrow

    # ---- depthwise 3x3 conv (VPU), accumulator seeded with the first tap ----
    acc = h_scr[0:S, 0:W, :] * wdw_ref[0:1, :]
    for t in range(1, 9):
        ky, kx = divmod(t, 3)
        acc = acc + h_scr[ky:ky + S, kx:kx + W, :] * wdw_ref[t:t + 1, :]
    acc = acc + bdw_ref[...]

    # ---- exact (erf-form) GELU in f32 ----
    g = _gelu_exact(acc)

    # ---- fc2 (1x1 conv): (S*W, Hp) @ (Hp, Op) on the MXU, lane-dense f32 store ----
    g2 = g.reshape(S * W, Hp).astype(compute_dtype)
    o_ref[0] = jnp.dot(g2, w2_ref[...], preferred_element_type=f32) + b2_ref[...]


def _pick_strip_rows(H, W, want):
    # Largest divisor of H that is <= want and keeps the output block 8-sublane aligned.
    want = max(1, min(want, H))
    for s in range(want, 0, -1):
        if H % s == 0 and ((s * W) % 8 == 0 or s == H):
            return s
    return H


def mlp_forward(x, w1, b1, w_dw, b_dw, w2, b2, *,
                compute_dtype=jnp.bfloat16, rows_per_strip=8,
                channels_last_output=False,
                vmem_limit_bytes=32 * 1024 * 1024):
    """VAN Mlp forward.  x: (N, C, H, W) NCHW f32.  Returns NCHW (or NHWC) f32."""
    N, C, H, W = x.shape
    Hd = w1.shape[0]          # hidden_features
    Co = w2.shape[0]          # out_features
    assert w1.shape == (Hd, C, 1, 1)
    assert w_dw.shape == (Hd, 1, 3, 3)
    assert w2.shape == (Co, Hd, 1, 1)

    f32 = jnp.float32
    Cr = _round_up(C, 8)       # K dim: sublane granule only (no 128-lane read inflation)
    Hp = _round_up(Hd, 128)    # hidden channels: lane-dense
    Op = _round_up(Co, 128)    # output channels: lane-dense stores
    Wr = _round_up(W + 2, 8)   # padded width incl. 1-col halo, sublane-aligned

    S = _pick_strip_rows(H, W, rows_per_strip)
    num_strips = H // S

    # ---- host-side layout prep (cheap: only the small input / weights move) ----
    # NCHW -> NHWC, zero spatial halo, channel pad, then overlapping row strips so each
    # grid step gets its strip + 1-row halo as a plain rectangular block.
    x_nhwc = jnp.transpose(x, (0, 2, 3, 1)).astype(f32)
    xp = jnp.pad(x_nhwc, ((0, 0), (1, 1), (1, Wr - (W + 1)), (0, Cr - C)))
    xp = xp.astype(compute_dtype)
    x_strips = jnp.stack([xp[:, s * S:s * S + S + 2] for s in range(num_strips)],
                         axis=1)
    x_strips = x_strips.reshape(N * num_strips, S + 2, Wr, Cr)

    # fc1 weight (Hd, C, 1, 1) -> (Cr, Hp); dw weight (Hd, 1, 3, 3) -> (9, Hp);
    # fc2 weight (Co, Hd, 1, 1) -> (Hp, Op).  Padded channels are exactly zero so they
    # contribute nothing anywhere downstream.
    w1m = jnp.zeros((Cr, Hp), f32).at[:C, :Hd].set(
        w1.reshape(Hd, C).T.astype(f32)).astype(compute_dtype)
    b1m = jnp.zeros((1, Hp), f32).at[0, :Hd].set(b1.astype(f32))
    wdw = jnp.zeros((9, Hp), f32).at[:, :Hd].set(w_dw.reshape(Hd, 9).T.astype(f32))
    bdw = jnp.zeros((1, Hp), f32).at[0, :Hd].set(b_dw.astype(f32))
    w2m = jnp.zeros((Hp, Op), f32).at[:Hd, :Co].set(
        w2.reshape(Co, Hd).T.astype(f32)).astype(compute_dtype)
    b2m = jnp.zeros((1, Op), f32).at[0, :Co].set(b2.astype(f32))

    kernel = functools.partial(_mlp_fused_kernel, S=S, W=W,
                               compute_dtype=compute_dtype)

    y = pl.pallas_call(
        kernel,
        out_shape=jax.ShapeDtypeStruct((N, H * W, Op), f32),
        grid=(N, num_strips),
        in_specs=[
            pl.BlockSpec((1, S + 2, Wr, Cr),
                         lambda n, s: (n * num_strips + s, 0, 0, 0)),
            pl.BlockSpec((Cr, Hp), lambda n, s: (0, 0)),
            pl.BlockSpec((1, Hp), lambda n, s: (0, 0)),
            pl.BlockSpec((9, Hp), lambda n, s: (0, 0)),
            pl.BlockSpec((1, Hp), lambda n, s: (0, 0)),
            pl.BlockSpec((Hp, Op), lambda n, s: (0, 0)),
            pl.BlockSpec((1, Op), lambda n, s: (0, 0)),
        ],
        out_specs=pl.BlockSpec((1, S * W, Op), lambda n, s: (n, s, 0)),
        scratch_shapes=[pltpu.VMEM((S + 2, Wr, Hp), f32)],
        compiler_params=pltpu.CompilerParams(
            dimension_semantics=("parallel", "parallel"),
            vmem_limit_bytes=vmem_limit_bytes),
    )(x_strips, w1m, b1m, wdw, bdw, w2m, b2m)

    y = y.reshape(N, H, W, Op)[..., :Co]
    if channels_last_output:
        return y               # NHWC fast path: no extra HBM pass for the transpose
    return jnp.transpose(y, (0, 3, 1, 2))


if __name__ == "__main__":
    key = jax.random.PRNGKey(0)
    N, C, H, W = 2, 4, 16, 16        # batch=2, in_features=4, spatial=16x16
    HID = 32                         # hidden_features
    OUT = C                          # out_features defaults to in_features

    ks = jax.random.split(key, 7)
    x = jax.random.normal(ks[0], (N, C, H, W), jnp.float32)

    # Conv weights ~ N(0, sqrt(2/fan_out)) as in _init_weights; biases small-nonzero
    # to exercise the bias paths (forward semantics are init-free).
    w1 = jax.random.normal(ks[1], (HID, C, 1, 1), jnp.float32) * math.sqrt(2.0 / HID)
    b1 = jax.random.normal(ks[2], (HID,), jnp.float32) * 0.1
    w_dw = jax.random.normal(ks[3], (HID, 1, 3, 3), jnp.float32) * math.sqrt(2.0 / 9.0)
    b_dw = jax.random.normal(ks[4], (HID,), jnp.float32) * 0.1
    w2 = jax.random.normal(ks[5], (OUT, HID, 1, 1), jnp.float32) * math.sqrt(2.0 / OUT)
    b2 = jax.random.normal(ks[6], (OUT,), jnp.float32) * 0.1

    # pure-JAX reference: fc1 -> depthwise 3x3 -> exact GELU -> fc2 (dropout p=0 = identity)
    def ref_fwd(xin):
        prec = lax.Precision.HIGHEST
        y = lax.conv_general_dilated(xin, w1, (1, 1), "VALID",
                                     dimension_numbers=("NCHW", "OIHW", "NCHW"),
                                     precision=prec)
        y = y + b1[None, :, None, None]
        y = lax.conv_general_dilated(y, w_dw, (1, 1), ((1, 1), (1, 1)),
                                     dimension_numbers=("NCHW", "OIHW", "NCHW"),
                                     feature_group_count=HID, precision=prec)
        y = y + b_dw[None, :, None, None]
        y = jax.nn.gelu(y, approximate=False)
        y = lax.conv_general_dilated(y, w2, (1, 1), "VALID",
                                     dimension_numbers=("NCHW", "OIHW", "NCHW"),
                                     precision=prec)
        y = y + b2[None, :, None, None]
        return y

    ref = ref_fwd(x)

    # f32 path: tight check of the forward semantics.
    out_f32 = jax.block_until_ready(
        mlp_forward(x, w1, b1, w_dw, b_dw, w2, b2, compute_dtype=jnp.float32))
    assert out_f32.shape == (N, OUT, H, W)
    np.testing.assert_allclose(np.asarray(out_f32), np.asarray(ref),
                               rtol=1e-4, atol=1e-4)

    # bf16 MXU/VPU inputs with f32 accumulation: the fast path on v5e/v6e/v7x.
    out_bf16 = jax.block_until_ready(
        mlp_forward(x, w1, b1, w_dw, b_dw, w2, b2, compute_dtype=jnp.bfloat16))
    np.testing.assert_allclose(np.asarray(out_bf16), np.asarray(ref),
                               rtol=5e-2, atol=5e-2)

    print("KERNEL_OK")
</pallas_src>

<mosaic_0001>
module attributes {stable_mosaic.version = 11 : i64} {
  func.func @_mlp_fused_kernel(%arg0: i32, %arg1: i32, %arg2: memref<1x10x24x8xf32, #tpu.memory_space<vmem>>, %arg3: memref<8x128xf32, #tpu.memory_space<vmem>>, %arg4: memref<1x128xf32, #tpu.memory_space<vmem>>, %arg5: memref<9x128xf32, #tpu.memory_space<vmem>>, %arg6: memref<1x128xf32, #tpu.memory_space<vmem>>, %arg7: memref<128x128xf32, #tpu.memory_space<vmem>>, %arg8: memref<1x128xf32, #tpu.memory_space<vmem>>, %arg9: memref<1x128x128xf32, #tpu.memory_space<vmem>>, %arg10: memref<10x24x128xf32, #tpu.memory_space<vmem>>) attributes {dimension_semantics = [#tpu.dimension_semantics<parallel>, #tpu.dimension_semantics<parallel>], iteration_bounds = array<i64: 2, 2>, scalar_prefetch = 0 : i64, scratch_operands = 1 : i64, tpu.core_type = #tpu.core_type<tc>, window_params = [{transform_indices = @transform_0, window_bounds = array<i64: 1, 10, 24, 8>}, {pipeline_mode = #tpu.pipeline_mode<synchronous>, transform_indices = @transform_1, window_bounds = array<i64: 8, 128>}, {pipeline_mode = #tpu.pipeline_mode<synchronous>, transform_indices = @transform_2, window_bounds = array<i64: 1, 128>}, {pipeline_mode = #tpu.pipeline_mode<synchronous>, transform_indices = @transform_3, window_bounds = array<i64: 9, 128>}, {pipeline_mode = #tpu.pipeline_mode<synchronous>, transform_indices = @transform_4, window_bounds = array<i64: 1, 128>}, {pipeline_mode = #tpu.pipeline_mode<synchronous>, transform_indices = @transform_5, window_bounds = array<i64: 128, 128>}, {pipeline_mode = #tpu.pipeline_mode<synchronous>, transform_indices = @transform_6, window_bounds = array<i64: 1, 128>}, {transform_indices = @transform_7, window_bounds = array<i64: 1, 128, 128>}]} {
    %c0 = arith.constant 0 : index
    %c0_0 = arith.constant 0 : index
    %c0_1 = arith.constant 0 : index
    %c0_2 = arith.constant 0 : index
    %0 = vector.load %arg2[%c0, %c0_0, %c0_1, %c0_2] : memref<1x10x24x8xf32, #tpu.memory_space<vmem>>, vector<1x10x24x8xf32>
    %1 = vector.shape_cast %0 : vector<1x10x24x8xf32> to vector<10x24x8xf32>
    %2 = vector.extract_strided_slice %1 {offsets = [0, 0, 0], sizes = [10, 24, 1], strides = [1, 1, 1]} : vector<10x24x8xf32> to vector<10x24x1xf32>
    %c0_3 = arith.constant 0 : index
    %c0_4 = arith.constant 0 : index
    %3 = vector.load %arg3[%c0_3, %c0_4] : memref<8x128xf32, #tpu.memory_space<vmem>>, vector<1x128xf32>
    %4 = vector.shape_cast %3 : vector<1x128xf32> to vector<1x1x128xf32>
    %5 = vector.broadcast %2 : vector<10x24x1xf32> to vector<10x24x128xf32>
    %6 = vector.broadcast %4 : vector<1x1x128xf32> to vector<10x24x128xf32>
    %7 = arith.mulf %5, %6 : vector<10x24x128xf32>
    %8 = vector.extract_strided_slice %1 {offsets = [0, 0, 1], sizes = [10, 24, 1], strides = [1, 1, 1]} : vector<10x24x8xf32> to vector<10x24x1xf32>
    %c1 = arith.constant 1 : index
    %c0_5 = arith.constant 0 : index
    %9 = vector.load %arg3[%c1, %c0_5] : memref<8x128xf32, #tpu.memory_space<vmem>>, vector<1x128xf32>
    %10 = vector.shape_cast %9 : vector<1x128xf32> to vector<1x1x128xf32>
    %11 = vector.broadcast %8 : vector<10x24x1xf32> to vector<10x24x128xf32>
    %12 = vector.broadcast %10 : vector<1x1x128xf32> to vector<10x24x128xf32>
    %13 = arith.mulf %11, %12 : vector<10x24x128xf32>
    %14 = arith.addf %7, %13 : vector<10x24x128xf32>
    %15 = vector.extract_strided_slice %1 {offsets = [0, 0, 2], sizes = [10, 24, 1], strides = [1, 1, 1]} : vector<10x24x8xf32> to vector<10x24x1xf32>
    %c2 = arith.constant 2 : index
    %c0_6 = arith.constant 0 : index
    %16 = vector.load %arg3[%c2, %c0_6] : memref<8x128xf32, #tpu.memory_space<vmem>>, vector<1x128xf32>
    %17 = vector.shape_cast %16 : vector<1x128xf32> to vector<1x1x128xf32>
    %18 = vector.broadcast %15 : vector<10x24x1xf32> to vector<10x24x128xf32>
    %19 = vector.broadcast %17 : vector<1x1x128xf32> to vector<10x24x128xf32>
    %20 = arith.mulf %18, %19 : vector<10x24x128xf32>
    %21 = arith.addf %14, %20 : vector<10x24x128xf32>
    %22 = vector.extract_strided_slice %1 {offsets = [0, 0, 3], sizes = [10, 24, 1], strides = [1, 1, 1]} : vector<10x24x8xf32> to vector<10x24x1xf32>
    %c3 = arith.constant 3 : index
    %c0_7 = arith.constant 0 : index
    %23 = vector.load %arg3[%c3, %c0_7] : memref<8x128xf32, #tpu.memory_space<vmem>>, vector<1x128xf32>
    %24 = vector.shape_cast %23 : vector<1x128xf32> to vector<1x1x128xf32>
    %25 = vector.broadcast %22 : vector<10x24x1xf32> to vector<10x24x128xf32>
    %26 = vector.broadcast %24 : vector<1x1x128xf32> to vector<10x24x128xf32>
    %27 = arith.mulf %25, %26 : vector<10x24x128xf32>
    %28 = arith.addf %21, %27 : vector<10x24x128xf32>
    %29 = vector.extract_strided_slice %1 {offsets = [0, 0, 4], sizes = [10, 24, 1], strides = [1, 1, 1]} : vector<10x24x8xf32> to vector<10x24x1xf32>
    %c4 = arith.constant 4 : index
    %c0_8 = arith.constant 0 : index
    %30 = vector.load %arg3[%c4, %c0_8] : memref<8x128xf32, #tpu.memory_space<vmem>>, vector<1x128xf32>
    %31 = vector.shape_cast %30 : vector<1x128xf32> to vector<1x1x128xf32>
    %32 = vector.broadcast %29 : vector<10x24x1xf32> to vector<10x24x128xf32>
    %33 = vector.broadcast %31 : vector<1x1x128xf32> to vector<10x24x128xf32>
    %34 = arith.mulf %32, %33 : vector<10x24x128xf32>
    %35 = arith.addf %28, %34 : vector<10x24x128xf32>
    %36 = vector.extract_strided_slice %1 {offsets = [0, 0, 5], sizes = [10, 24, 1], strides = [1, 1, 1]} : vector<10x24x8xf32> to vector<10x24x1xf32>
    %c5 = arith.constant 5 : index
    %c0_9 = arith.constant 0 : index
    %37 = vector.load %arg3[%c5, %c0_9] : memref<8x128xf32, #tpu.memory_space<vmem>>, vector<1x128xf32>
    %38 = vector.shape_cast %37 : vector<1x128xf32> to vector<1x1x128xf32>
    %39 = vector.broadcast %36 : vector<10x24x1xf32> to vector<10x24x128xf32>
    %40 = vector.broadcast %38 : vector<1x1x128xf32> to vector<10x24x128xf32>
    %41 = arith.mulf %39, %40 : vector<10x24x128xf32>
    %42 = arith.addf %35, %41 : vector<10x24x128xf32>
    %43 = vector.extract_strided_slice %1 {offsets = [0, 0, 6], sizes = [10, 24, 1], strides = [1, 1, 1]} : vector<10x24x8xf32> to vector<10x24x1xf32>
    %c6 = arith.constant 6 : index
    %c0_10 = arith.constant 0 : index
    %44 = vector.load %arg3[%c6, %c0_10] : memref<8x128xf32, #tpu.memory_space<vmem>>, vector<1x128xf32>
    %45 = vector.shape_cast %44 : vector<1x128xf32> to vector<1x1x128xf32>
    %46 = vector.broadcast %43 : vector<10x24x1xf32> to vector<10x24x128xf32>
    %47 = vector.broadcast %45 : vector<1x1x128xf32> to vector<10x24x128xf32>
    %48 = arith.mulf %46, %47 : vector<10x24x128xf32>
    %49 = arith.addf %42, %48 : vector<10x24x128xf32>
    %50 = vector.extract_strided_slice %1 {offsets = [0, 0, 7], sizes = [10, 24, 1], strides = [1, 1, 1]} : vector<10x24x8xf32> to vector<10x24x1xf32>
    %c7 = arith.constant 7 : index
    %c0_11 = arith.constant 0 : index
    %51 = vector.load %arg3[%c7, %c0_11] : memref<8x128xf32, #tpu.memory_space<vmem>>, vector<1x128xf32>
    %52 = vector.shape_cast %51 : vector<1x128xf32> to vector<1x1x128xf32>
    %53 = vector.broadcast %50 : vector<10x24x1xf32> to vector<10x24x128xf32>
    %54 = vector.broadcast %52 : vector<1x1x128xf32> to vector<10x24x128xf32>
    %55 = arith.mulf %53, %54 : vector<10x24x128xf32>
    %56 = arith.addf %49, %55 : vector<10x24x128xf32>
    %c0_12 = arith.constant 0 : index
    %c0_13 = arith.constant 0 : index
    %57 = vector.load %arg4[%c0_12, %c0_13] : memref<1x128xf32, #tpu.memory_space<vmem>>, vector<1x128xf32>
    %58 = vector.shape_cast %57 : vector<1x128xf32> to vector<1x1x128xf32>
    %59 = vector.broadcast %58 : vector<1x1x128xf32> to vector<10x24x128xf32>
    %60 = arith.addf %56, %59 : vector<10x24x128xf32>
    %c0_14 = arith.constant 0 : index
    %c0_15 = arith.constant 0 : index
    %c0_16 = arith.constant 0 : index
    %61 = vector.load %arg10[%c0_14, %c0_15, %c0_16] : memref<10x24x128xf32, #tpu.memory_space<vmem>>, vector<10x24x128xf32>
    tpu.vector_store %arg10[%c0_14, %c0_15, %c0_16], %60 {strides = array<i32>} : memref<10x24x128xf32, #tpu.memory_space<vmem>>, vector<10x24x128xf32>,
    %cst = arith.constant 0.000000e+00 : f32
    %62 = vector.broadcast %cst : f32 to vector<10x1x128xf32>
    %c0_17 = arith.constant 0 : index
    %c0_18 = arith.constant 0 : index
    %c0_19 = arith.constant 0 : index
    %63 = vector.load %arg10[%c0_17, %c0_18, %c0_19] : memref<10x24x128xf32, #tpu.memory_space<vmem>>, vector<10x1x128xf32>
    tpu.vector_store %arg10[%c0_17, %c0_18, %c0_19], %62 {strides = array<i32>} : memref<10x24x128xf32, #tpu.memory_space<vmem>>, vector<10x1x128xf32>,
    %c0_20 = arith.constant 0 : index
    %c17 = arith.constant 17 : index
    %c0_21 = arith.constant 0 : index
    %64 = vector.load %arg10[%c0_20, %c17, %c0_21] : memref<10x24x128xf32, #tpu.memory_space<vmem>>, vector<10x1x128xf32>
    tpu.vector_store %arg10[%c0_20, %c17, %c0_21], %62 {strides = array<i32>} : memref<10x24x128xf32, #tpu.memory_space<vmem>>, vector<10x1x128xf32>,
    %cst_22 = arith.constant 0.000000e+00 : f32
    %65 = vector.broadcast %cst_22 : f32 to vector<1x24x128xf32>
    %c0_i32 = arith.constant 0 : i32
    %66 = arith.cmpi eq, %arg1, %c0_i32 : i32
    %67 = arith.extui %66 : i1 to i32
    %c0_i32_23 = arith.constant 0 : i32
    %68 = arith.cmpi ne, %67, %c0_i32_23 : i32
    scf.if %68 {
      %c0_95 = arith.constant 0 : index
      %c0_96 = arith.constant 0 : index
      %c0_97 = arith.constant 0 : index
      %182 = vector.load %arg10[%c0_95, %c0_96, %c0_97] : memref<10x24x128xf32, #tpu.memory_space<vmem>>, vector<1x24x128xf32>
      tpu.vector_store %arg10[%c0_95, %c0_96, %c0_97], %65 {strides = array<i32>} : memref<10x24x128xf32, #tpu.memory_space<vmem>>, vector<1x24x128xf32>,
    } else {
    }
    %c1_i32 = arith.constant 1 : i32
    %69 = arith.cmpi eq, %arg1, %c1_i32 : i32
    %70 = arith.extui %69 : i1 to i32
    %c0_i32_24 = arith.constant 0 : i32
    %71 = arith.cmpi ne, %70, %c0_i32_24 : i32
    scf.if %71 {
      %c9 = arith.constant 9 : index
      %c0_95 = arith.constant 0 : index
      %c0_96 = arith.constant 0 : index
      %182 = vector.load %arg10[%c9, %c0_95, %c0_96] : memref<10x24x128xf32, #tpu.memory_space<vmem>>, vector<1x24x128xf32>
      tpu.vector_store %arg10[%c9, %c0_95, %c0_96], %65 {strides = array<i32>} : memref<10x24x128xf32, #tpu.memory_space<vmem>>, vector<1x24x128xf32>,
    } else {
    }
    %c0_25 = arith.constant 0 : index
    %c0_26 = arith.constant 0 : index
    %c0_27 = arith.constant 0 : index
    %72 = vector.load %arg10[%c0_25, %c0_26, %c0_27] : memref<10x24x128xf32, #tpu.memory_space<vmem>>, vector<8x16x128xf32>
    %c0_28 = arith.constant 0 : index
    %c0_29 = arith.constant 0 : index
    %73 = vector.load %arg5[%c0_28, %c0_29] : memref<9x128xf32, #tpu.memory_space<vmem>>, vector<1x128xf32>
    %74 = vector.shape_cast %73 : vector<1x128xf32> to vector<1x1x128xf32>
    %75 = vector.broadcast %74 : vector<1x1x128xf32> to vector<8x16x128xf32>
    %76 = arith.mulf %72, %75 : vector<8x16x128xf32>
    %c0_30 = arith.constant 0 : index
    %c1_31 = arith.constant 1 : index
    %c0_32 = arith.constant 0 : index
    %77 = vector.load %arg10[%c0_30, %c1_31, %c0_32] : memref<10x24x128xf32, #tpu.memory_space<vmem>>, vector<8x16x128xf32>
    %c1_33 = arith.constant 1 : index
    %c0_34 = arith.constant 0 : index
    %78 = vector.load %arg5[%c1_33, %c0_34] : memref<9x128xf32, #tpu.memory_space<vmem>>, vector<1x128xf32>
    %79 = vector.shape_cast %78 : vector<1x128xf32> to vector<1x1x128xf32>
    %80 = vector.broadcast %79 : vector<1x1x128xf32> to vector<8x16x128xf32>
    %81 = arith.mulf %77, %80 : vector<8x16x128xf32>
    %82 = arith.addf %76, %81 : vector<8x16x128xf32>
    %c0_35 = arith.constant 0 : index
    %c2_36 = arith.constant 2 : index
    %c0_37 = arith.constant 0 : index
    %83 = vector.load %arg10[%c0_35, %c2_36, %c0_37] : memref<10x24x128xf32, #tpu.memory_space<vmem>>, vector<8x16x128xf32>
    %c2_38 = arith.constant 2 : index
    %c0_39 = arith.constant 0 : index
    %84 = vector.load %arg5[%c2_38, %c0_39] : memref<9x128xf32, #tpu.memory_space<vmem>>, vector<1x128xf32>
    %85 = vector.shape_cast %84 : vector<1x128xf32> to vector<1x1x128xf32>
    %86 = vector.broadcast %85 : vector<1x1x128xf32> to vector<8x16x128xf32>
    %87 = arith.mulf %83, %86 : vector<8x16x128xf32>
    %88 = arith.addf %82, %87 : vector<8x16x128xf32>
    %c1_40 = arith.constant 1 : index
    %c0_41 = arith.constant 0 : index
    %c0_42 = arith.constant 0 : index
    %89 = vector.load %arg10[%c1_40, %c0_41, %c0_42] : memref<10x24x128xf32, #tpu.memory_space<vmem>>, vector<8x16x128xf32>
    %c3_43 = arith.constant 3 : index
    %c0_44 = arith.constant 0 : index
    %90 = vector.load %arg5[%c3_43, %c0_44] : memref<9x128xf32, #tpu.memory_space<vmem>>, vector<1x128xf32>
    %91 = vector.shape_cast %90 : vector<1x128xf32> to vector<1x1x128xf32>
    %92 = vector.broadcast %91 : vector<1x1x128xf32> to vector<8x16x128xf32>
    %93 = arith.mulf %89, %92 : vector<8x16x128xf32>
    %94 = arith.addf %88, %93 : vector<8x16x128xf32>
    %c1_45 = arith.constant 1 : index
    %c1_46 = arith.constant 1 : index
    %c0_47 = arith.constant 0 : index
    %95 = vector.load %arg10[%c1_45, %c1_46, %c0_47] : memref<10x24x128xf32, #tpu.memory_space<vmem>>, vector<8x16x128xf32>
    %c4_48 = arith.constant 4 : index
    %c0_49 = arith.constant 0 : index
    %96 = vector.load %arg5[%c4_48, %c0_49] : memref<9x128xf32, #tpu.memory_space<vmem>>, vector<1x128xf32>
    %97 = vector.shape_cast %96 : vector<1x128xf32> to vector<1x1x128xf32>
    %98 = vector.broadcast %97 : vector<1x1x128xf32> to vector<8x16x128xf32>
    %99 = arith.mulf %95, %98 : vector<8x16x128xf32>
    %100 = arith.addf %94, %99 : vector<8x16x128xf32>
    %c1_50 = arith.constant 1 : index
    %c2_51 = arith.constant 2 : index
    %c0_52 = arith.constant 0 : index
    %101 = vector.load %arg10[%c1_50, %c2_51, %c0_52] : memref<10x24x128xf32, #tpu.memory_space<vmem>>, vector<8x16x128xf32>
    %c5_53 = arith.constant 5 : index
    %c0_54 = arith.constant 0 : index
    %102 = vector.load %arg5[%c5_53, %c0_54] : memref<9x128xf32, #tpu.memory_space<vmem>>, vector<1x128xf32>
    %103 = vector.shape_cast %102 : vector<1x128xf32> to vector<1x1x128xf32>
    %104 = vector.broadcast %103 : vector<1x1x128xf32> to vector<8x16x128xf32>
    %105 = arith.mulf %101, %104 : vector<8x16x128xf32>
    %106 = arith.addf %100, %105 : vector<8x16x128xf32>
    %c2_55 = arith.constant 2 : index
    %c0_56 = arith.constant 0 : index
    %c0_57 = arith.constant 0 : index
    %107 = vector.load %arg10[%c2_55, %c0_56, %c0_57] : memref<10x24x128xf32, #tpu.memory_space<vmem>>, vector<8x16x128xf32>
    %c6_58 = arith.constant 6 : index
    %c0_59 = arith.constant 0 : index
    %108 = vector.load %arg5[%c6_58, %c0_59] : memref<9x128xf32, #tpu.memory_space<vmem>>, vector<1x128xf32>
    %109 = vector.shape_cast %108 : vector<1x128xf32> to vector<1x1x128xf32>
    %110 = vector.broadcast %109 : vector<1x1x128xf32> to vector<8x16x128xf32>
    %111 = arith.mulf %107, %110 : vector<8x16x128xf32>
    %112 = arith.addf %106, %111 : vector<8x16x128xf32>
    %c2_60 = arith.constant 2 : index
    %c1_61 = arith.constant 1 : index
    %c0_62 = arith.constant 0 : index
    %113 = vector.load %arg10[%c2_60, %c1_61, %c0_62] : memref<10x24x128xf32, #tpu.memory_space<vmem>>, vector<8x16x128xf32>
    %c7_63 = arith.constant 7 : index
    %c0_64 = arith.constant 0 : index
    %114 = vector.load %arg5[%c7_63, %c0_64] : memref<9x128xf32, #tpu.memory_space<vmem>>, vector<1x128xf32>
    %115 = vector.shape_cast %114 : vector<1x128xf32> to vector<1x1x128xf32>
    %116 = vector.broadcast %115 : vector<1x1x128xf32> to vector<8x16x128xf32>
    %117 = arith.mulf %113, %116 : vector<8x16x128xf32>
    %118 = arith.addf %112, %117 : vector<8x16x128xf32>
    %c2_65 = arith.constant 2 : index
    %c2_66 = arith.constant 2 : index
    %c0_67 = arith.constant 0 : index
    %119 = vector.load %arg10[%c2_65, %c2_66, %c0_67] : memref<10x24x128xf32, #tpu.memory_space<vmem>>, vector<8x16x128xf32>
    %c8 = arith.constant 8 : index
    %c0_68 = arith.constant 0 : index
    %120 = vector.load %arg5[%c8, %c0_68] : memref<9x128xf32, #tpu.memory_space<vmem>>, vector<1x128xf32>
    %121 = vector.shape_cast %120 : vector<1x128xf32> to vector<1x1x128xf32>
    %122 = vector.broadcast %121 : vector<1x1x128xf32> to vector<8x16x128xf32>
    %123 = arith.mulf %119, %122 : vector<8x16x128xf32>
    %124 = arith.addf %118, %123 : vector<8x16x128xf32>
    %c0_69 = arith.constant 0 : index
    %c0_70 = arith.constant 0 : index
    %125 = vector.load %arg6[%c0_69, %c0_70] : memref<1x128xf32, #tpu.memory_space<vmem>>, vector<1x128xf32>
    %126 = vector.shape_cast %125 : vector<1x128xf32> to vector<1x1x128xf32>
    %127 = vector.broadcast %126 : vector<1x1x128xf32> to vector<8x16x128xf32>
    %128 = arith.addf %124, %127 : vector<8x16x128xf32>
    %cst_71 = arith.constant 5.000000e-01 : f32
    %129 = vector.broadcast %cst_71 : f32 to vector<8x16x128xf32>
    %130 = arith.mulf %129, %128 : vector<8x16x128xf32>
    %cst_72 = arith.constant 0.707106769 : f32
    %131 = vector.broadcast %cst_72 : f32 to vector<8x16x128xf32>
    %132 = arith.mulf %128, %131 : vector<8x16x128xf32>
    %cst_73 = arith.constant 0.000000e+00 : f32
    %133 = vector.broadcast %cst_73 : f32 to vector<8x16x128xf32>
    %134 = arith.cmpf oge, %132, %133 : vector<8x16x128xf32>
    %cst_74 = arith.constant 1.000000e+00 : f32
    %cst_75 = arith.constant -1.000000e+00 : f32
    %135 = vector.broadcast %cst_74 : f32 to vector<8x16x128xf32>
    %136 = vector.broadcast %cst_75 : f32 to vector<8x16x128xf32>
    %137 = arith.select %134, %135, %136 : vector<8x16x128xi1>, vector<8x16x128xf32>
    %138 = math.absf %132 : vector<8x16x128xf32>
    %cst_76 = arith.constant 0.327591091 : f32
    %139 = vector.broadcast %cst_76 : f32 to vector<8x16x128xf32>
    %140 = arith.mulf %139, %138 : vector<8x16x128xf32>
    %cst_77 = arith.constant 1.000000e+00 : f32
    %141 = vector.broadcast %cst_77 : f32 to vector<8x16x128xf32>
    %142 = arith.addf %141, %140 : vector<8x16x128xf32>
    %143 = tpu.reciprocal %142 {approx = true} : vector<8x16x128xf32> -> vector<8x16x128xf32>
    %144 = arith.mulf %142, %143 : vector<8x16x128xf32>
    %cst_78 = arith.constant 2.000000e+00 : f32
    %145 = vector.broadcast %cst_78 : f32 to vector<8x16x128xf32>
    %146 = arith.subf %145, %144 : vector<8x16x128xf32>
    %147 = arith.mulf %143, %146 : vector<8x16x128xf32>
    %cst_79 = arith.constant 1.06140542 : f32
    %148 = vector.broadcast %cst_79 : f32 to vector<8x16x128xf32>
    %149 = arith.mulf %148, %147 : vector<8x16x128xf32>
    %cst_80 = arith.constant -1.45315206 : f32
    %150 = vector.broadcast %cst_80 : f32 to vector<8x16x128xf32>
    %151 = arith.addf %149, %150 : vector<8x16x128xf32>
    %152 = arith.mulf %151, %147 : vector<8x16x128xf32>
    %cst_81 = arith.constant 1.42141378 : f32
    %153 = vector.broadcast %cst_81 : f32 to vector<8x16x128xf32>
    %154 = arith.addf %152, %153 : vector<8x16x128xf32>
    %155 = arith.mulf %154, %147 : vector<8x16x128xf32>
    %cst_82 = arith.constant -0.284496725 : f32
    %156 = vector.broadcast %cst_82 : f32 to vector<8x16x128xf32>
    %157 = arith.addf %155, %156 : vector<8x16x128xf32>
    %158 = arith.mulf %157, %147 : vector<8x16x128xf32>
    %cst_83 = arith.constant 0.254829586 : f32
    %159 = vector.broadcast %cst_83 : f32 to vector<8x16x128xf32>
    %160 = arith.addf %158, %159 : vector<8x16x128xf32>
    %161 = arith.mulf %160, %147 : vector<8x16x128xf32>
    %cst_84 = arith.constant 0.000000e+00 : f32
    %162 = vector.broadcast %cst_84 : f32 to vector<8x16x128xf32>
    %163 = arith.subf %162, %138 : vector<8x16x128xf32>
    %164 = arith.mulf %163, %138 : vector<8x16x128xf32>
    %165 = math.exp %164 : vector<8x16x128xf32>
    %166 = arith.mulf %161, %165 : vector<8x16x128xf32>
    %cst_85 = arith.constant 1.000000e+00 : f32
    %167 = vector.broadcast %cst_85 : f32 to vector<8x16x128xf32>
    %168 = arith.subf %167, %166 : vector<8x16x128xf32>
    %169 = arith.mulf %137, %168 : vector<8x16x128xf32>
    %cst_86 = arith.constant 1.000000e+00 : f32
    %170 = vector.broadcast %cst_86 : f32 to vector<8x16x128xf32>
    %171 = arith.addf %170, %169 : vector<8x16x128xf32>
    %172 = arith.mulf %130, %171 : vector<8x16x128xf32>
    %173 = vector.shape_cast %172 : vector<8x16x128xf32> to vector<128x128xf32>
    %c0_87 = arith.constant 0 : index
    %c0_88 = arith.constant 0 : index
    %174 = vector.load %arg7[%c0_87, %c0_88] : memref<128x128xf32, #tpu.memory_space<vmem>>, vector<128x128xf32>
    %cst_89 = arith.constant dense<0.000000e+00> : vector<128x128xf32>
    %175 = tpu.matmul %173, %174, %cst_89 {dimension_numbers = #tpu.dot_dimension_numbers<[1], [0], [0], [1], [0, 0, 1, 1], [], []>} : vector<128x128xf32>, vector<128x128xf32>, vector<128x128xf32> -> vector<128x128xf32>
    %c0_90 = arith.constant 0 : index
    %c0_91 = arith.constant 0 : index
    %176 = vector.load %arg8[%c0_90, %c0_91] : memref<1x128xf32, #tpu.memory_space<vmem>>, vector<1x128xf32>
    %177 = vector.broadcast %176 : vector<1x128xf32> to vector<128x128xf32>
    %178 = arith.addf %175, %177 : vector<128x128xf32>
    %c0_92 = arith.constant 0 : index
    %c0_93 = arith.constant 0 : index
    %c0_94 = arith.constant 0 : index
    %179 = vector.load %arg9[%c0_92, %c0_93, %c0_94] : memref<1x128x128xf32, #tpu.memory_space<vmem>>, vector<1x128x128xf32>
    %180 = vector.shape_cast %179 : vector<1x128x128xf32> to vector<128x128xf32>
    %181 = vector.shape_cast %178 : vector<128x128xf32> to vector<1x128x128xf32>
    tpu.vector_store %arg9[%c0_92, %c0_93, %c0_94], %181 {strides = array<i32>} : memref<1x128x128xf32, #tpu.memory_space<vmem>>, vector<1x128x128xf32>,
    return
  }
  func.func @transform_0(%arg0: i32, %arg1: i32) -> (i32, i32, i32, i32) {
    %c2_i32 = arith.constant 2 : i32
    %0 = arith.muli %arg0, %c2_i32 : i32
    %1 = arith.addi %0, %arg1 : i32
    %c0_i32 = arith.constant 0 : i32
    %c0_i32_0 = arith.constant 0 : i32
    %c0_i32_1 = arith.constant 0 : i32
    %c0_i32_2 = arith.constant 0 : i32
    return %1, %c0_i32, %c0_i32_0, %c0_i32_1 : i32, i32, i32, i32
  }
  func.func @transform_1(%arg0: i32, %arg1: i32) -> (i32, i32) {
    %c0_i32 = arith.constant 0 : i32
    %c0_i32_0 = arith.constant 0 : i32
    %c0_i32_1 = arith.constant 0 : i32
    return %c0_i32, %c0_i32_0 : i32, i32
  }
  func.func @transform_2(%arg0: i32, %arg1: i32) -> (i32, i32) {
    %c0_i32 = arith.constant 0 : i32
    %c0_i32_0 = arith.constant 0 : i32
    %c0_i32_1 = arith.constant 0 : i32
    return %c0_i32, %c0_i32_0 : i32, i32
  }
  func.func @transform_3(%arg0: i32, %arg1: i32) -> (i32, i32) {
    %c0_i32 = arith.constant 0 : i32
    %c0_i32_0 = arith.constant 0 : i32
    %c0_i32_1 = arith.constant 0 : i32
    return %c0_i32, %c0_i32_0 : i32, i32
  }
  func.func @transform_4(%arg0: i32, %arg1: i32) -> (i32, i32) {
    %c0_i32 = arith.constant 0 : i32
    %c0_i32_0 = arith.constant 0 : i32
    %c0_i32_1 = arith.constant 0 : i32
    return %c0_i32, %c0_i32_0 : i32, i32
  }
  func.func @transform_5(%arg0: i32, %arg1: i32) -> (i32, i32) {
    %c0_i32 = arith.constant 0 : i32
    %c0_i32_0 = arith.constant 0 : i32
    %c0_i32_1 = arith.constant 0 : i32
    return %c0_i32, %c0_i32_0 : i32, i32
  }
  func.func @transform_6(%arg0: i32, %arg1: i32) -> (i32, i32) {
    %c0_i32 = arith.constant 0 : i32
    %c0_i32_0 = arith.constant 0 : i32
    %c0_i32_1 = arith.constant 0 : i32
    return %c0_i32, %c0_i32_0 : i32, i32
  }
  func.func @transform_7(%arg0: i32, %arg1: i32) -> (i32, i32, i32) {
    %c0_i32 = arith.constant 0 : i32
    %c0_i32_0 = arith.constant 0 : i32
    return %arg0, %arg1, %c0_i32 : i32, i32, i32
  }
}

</mosaic_0001>

<bundles_post_ra>
// kernel: tpu_custom_call.1
= control target key start
LH: loop header
LB: loop body
LE: loop exit
PB: predicated region body
PF: predicated region fallthrough
CT: control target
= control target key end

     0   :  { %s6032_s0 = inlined_call_operand.vmem [shape: f32[4,10,24,8], index: 0, kind: input, shape index: {}]   ;;  %s6033_s1 = inlined_call_operand.vmem [shape: f32[8,128], index: 1, kind: input, shape index: {}]   ;;  %s6034_s2 = inlined_call_operand.vmem [shape: f32[1,128], index: 2, kind: input, shape index: {}]   ;;  %s6035_s3 = inlined_call_operand.vmem [shape: f32[9,128], index: 3, kind: input, shape index: {}]   ;;  %s6036_s4 = inlined_call_operand.vmem [shape: f32[1,128], index: 4, kind: input, shape index: {}]   ;;  %s6037_s5 = inlined_call_operand.vmem [shape: f32[128,128], index: 5, kind: input, shape index: {}]   ;;  %s6038_s6 = inlined_call_operand.vmem [shape: f32[1,128], index: 6, kind: input, shape index: {}]   ;;  %s6039_s7 = inlined_call_operand.hbm [shape: f32[2,256,128], index: 7, kind: output, shape index: {}]  }
   0x1   :  { %6076 = sst [smem:[#allocation115_spill]] %s6032_s0 }
   0x2   :  { %12 = vsyncpa [#allocation4], 0 }
   0x3   :  { %14 = vsyncpa [#allocation4 + $0x1], 0  ;;  %s3656_s24 = smov 0   ;;  %s3658_s25 = smov 0  }
   0x4   :  { %s3660_s26 = smov 0   ;;  %s3662_s27 = smov 0  }
   0x5   :  { %s3664_s28 = smov 0   ;;  %s3666_s29 = smov 0  }
   0x6   :  { %s3668_s30 = smov 0   ;;  %s3670_s8 = smov 0  }
   0x7 LB: > { %s3144_s9 = sadd.s32 4294967295, %s3599_s8   ;;  %s3145_s10 = sadd.s32 4294967294, %s3599_s8   ;;  %s3599_s8 = sphi %s3670_s8, %s20_s8   ;;  %s3595_s30 = sphi %s3668_s30, %s6378_s30   ;;  %s3591_s29 = sphi %s3666_s29, %s6377_s29   ;;  %s3587_s28 = sphi %s3664_s28, %s6376_s28   ;;  %s3583_s27 = sphi %s3662_s27, %s6375_s27   ;;  %s3579_s26 = sphi %s3660_s26, %s6374_s26   ;;  %s3575_s25 = sphi %s3658_s25, %s6373_s25   ;;  %s3571_s24 = sphi %s3656_s24, %s6372_s24  }
   0x8   : > { %s29_s11 = sadd.s32 1, %s3591_s29  ;;  %s32_s12 = sadd.s32 1, %s3595_s30 }
   0x9   : > { %p30_p0 = scmp.ge.s32.totalorder %s29_s11, 2  ;;  %p207_p1 = scmp.ne.s32.totalorder %s3579_s26, %s3575_s25 }
   0xa   : > { %p208_p2 = scmp.eq.s32.totalorder %s3144_s9, 3  ;;  %p213_p5 = scmp.ne.s32.totalorder %s3575_s25, %s3571_s24 }
   0xb   : > { %s6380_s11 = smov (%p30_p0, %s29_s11), 0  ;;  %s6382_s12 = smov (!%p30_p0, %s32_s12), %s3595_s30 }
   0xc   : > { %s193_s13 = ssub.s32 %s3591_s29, %s6380_s11  ;;  %p3707_p3 = por %p208_p2, %p207_p1 }
   0xd   : > { %p34_p4 = scmp.ge.s32.totalorder %s6382_s12, 2  ;;  %p214_p6 = scmp.eq.s32.totalorder %s3145_s10, 3 }
   0xe   : > { %p3150_p7 = scmp.ge.s32.totalorder %s3599_s8, 1  ;;  %p262_p9 = scmp.lt.s32.totalorder %s3599_s8, 5 }
   0xf   : > { %s6384_s12 = smov (%p34_p4, %s6382_s12), 0  ;;  %p3716_p8 = por %p214_p6, %p213_p5 }
  0x10   : > { %s192_s16 = ssub.s32 %s3595_s30, %s6384_s12  ;;  %s197_s17 = sadd.s32 1, %s3579_s26 }
  0x11   : > { %s194_s18 = sor.u32 %s193_s13, %s192_s16  ;;  %p263_p10 = pnand %p3150_p7, %p262_p9 }
  0x12   : > { %p195_p11 = scmp.eq.s32.totalorder %s194_s18, 0 }
  0x13   : > { %266 = sbr.rel (%p263_p10) target bundleno = 1140 (0x474), region = 48 }
  0x14   : > { %s3725_s19 = scalar_select %p195_p11, %s3579_s26, %s197_s17  }
  0x1a   : > { %s3152_s20 = sshll.u32 %s3587_s28, 1  ;;  %v3601_v0 = vmov 0   ;;  %s6079_s0 = sld [smem:[#allocation115_spill]]  ;;  %v3602_v31 = vmov 1   ;;  %v3603_v32 = vmov 2   ;;  %v3604_v59 = vmov 3  }
  0x1b   : > { %3405 = vset.pattern.permute.xlu1 %v3601_v0  ;;  %3404 = vset.pattern.permute.xlu0 %v3601_v0  ;;  %s297_s21 = sadd.s32 %s3583_s27, %s3152_s20  ;;  %p3163_p13 = scmp.ne.s32.totalorder %s3583_s27, 0 }
  0x1c   : > { %p298_p12 = scmp.lt.s32.totalorder %s297_s21, 3 }
  0x1e   : > { %s6386_s21 = smov (!%p298_p12, %s297_s21), 3 }
  0x1f   : > { %s3318_s22 = smul.u32 240, %s6386_s21 }
  0x21   : > { %s3732_s10 = scalar_lea.vmem %s6079_s0, %s3318_s22 }
  0x22   : > { %v3735_v1 = vld [vmem:[%s3732_s10 + $0x10] sm:$0xff]  ;;  %v3738_v2 = vld [vmem:[%s3732_s10] sm:$0xff]  ;;  %v3743_v3 = vld [vmem:[%s3732_s10 + $0x18] sm:$0xff] }
  0x23   : > { %349 = vperm.xlu1 %3405, %v3735_v1   ;;  %339 = vperm.xlu0 %3404, %v3738_v2   ;;  %v3746_v4 = vld [vmem:[%s3732_s10 + $0x8] sm:$0xff]  ;;  %v3754_v6 = vld [vmem:[%s3732_s10 + $0x20] sm:$0xff]  ;;  %v3759_v7 = vld [vmem:[%s3732_s10 + $0x38] sm:$0xff] }
  0x24   : > { %v3751_v5 = vld [vmem:[%s3732_s10 + $0x28] sm:$0xff]  ;;  %v3762_v8 = vld [vmem:[%s3732_s10 + $0x30] sm:$0xff]  ;;  %v3770_v10 = vld [vmem:[%s3732_s10 + $0x40] sm:$0xff] }
  0x25   : > { %v3767_v9 = vld [vmem:[%s3732_s10 + $0x48] sm:$0xff]  ;;  %v3775_v11 = vld [vmem:[%s3732_s10 + $0x58] sm:$0xff]  ;;  %v3778_v12 = vld [vmem:[%s3732_s10 + $0x50] sm:$0xff] }
  0x26   : > { %v3783_v13 = vld [vmem:[%s3732_s10 + $0x68] sm:$0xff]  ;;  %v3786_v14 = vld [vmem:[%s3732_s10 + $0x60] sm:$0xff]  ;;  %v3791_v15 = vld [vmem:[%s3732_s10 + $0x78] sm:$0xff] }
  0x27   : > { %354 = vperm.xlu1 %3405, %v3743_v3   ;;  %344 = vperm.xlu0 %3404, %v3746_v4   ;;  %v3794_v16 = vld [vmem:[%s3732_s10 + $0x70] sm:$0xff]  ;;  %v3799_v17 = vld [vmem:[%s3732_s10 + $0x88] sm:$0xff]  ;;  %v3802_v18 = vld [vmem:[%s3732_s10 + $0x80] sm:$0xff] }
  0x28   : > { %v3807_v19 = vld [vmem:[%s3732_s10 + $0x98] sm:$0xff]  ;;  %v3810_v20 = vld [vmem:[%s3732_s10 + $0x90] sm:$0xff]  ;;  %v3815_v21 = vld [vmem:[%s3732_s10 + $0xa8] sm:$0xff] }
  0x29   : > { %v3818_v22 = vld [vmem:[%s3732_s10 + $0xa0] sm:$0xff]  ;;  %v3823_v23 = vld [vmem:[%s3732_s10 + $0xb8] sm:$0xff]  ;;  %v3826_v24 = vld [vmem:[%s3732_s10 + $0xb0] sm:$0xff] }
  0x2a   : > { %v3831_v25 = vld [vmem:[%s3732_s10 + $0xc8] sm:$0xff]  ;;  %v3834_v26 = vld [vmem:[%s3732_s10 + $0xc0] sm:$0xff]  ;;  %v3839_v27 = vld [vmem:[%s3732_s10 + $0xd8] sm:$0xff] }
  0x2b   : > { %364 = vperm.xlu1 %3405, %v3751_v5   ;;  %359 = vperm.xlu0 %3404, %v3754_v6   ;;  %v3842_v28 = vld [vmem:[%s3732_s10 + $0xd0] sm:$0xff]  ;;  %v3847_v29 = vld [vmem:[%s3732_s10 + $0xe8] sm:$0xff]  ;;  %v3850_v30 = vld [vmem:[%s3732_s10 + $0xe0] sm:$0xff] }
  0x2f   : > { %374 = vperm.xlu1 %3405, %v3759_v7   ;;  %369 = vperm.xlu0 %3404, %v3762_v8  }
  0x33   : > { %384 = vperm.xlu1 %3405, %v3767_v9   ;;  %379 = vperm.xlu0 %3404, %v3770_v10  }
  0x37   : > { %394 = vperm.xlu1 %3405, %v3775_v11   ;;  %389 = vperm.xlu0 %3404, %v3778_v12  }
  0x3b   : > { %404 = vperm.xlu1 %3405, %v3783_v13   ;;  %399 = vperm.xlu0 %3404, %v3786_v14  }
  0x3f   : > { %414 = vperm.xlu1 %3405, %v3791_v15   ;;  %409 = vperm.xlu0 %3404, %v3794_v16  }
  0x43   : > { %424 = vperm.xlu1 %3405, %v3799_v17   ;;  %419 = vperm.xlu0 %3404, %v3802_v18  }
  0x47   : > { %434 = vperm.xlu1 %3405, %v3807_v19   ;;  %429 = vperm.xlu0 %3404, %v3810_v20  }
  0x4b   : > { %444 = vperm.xlu1 %3405, %v3815_v21   ;;  %439 = vperm.xlu0 %3404, %v3818_v22  }
  0x4f   : > { %454 = vperm.xlu1 %3405, %v3823_v23   ;;  %449 = vperm.xlu0 %3404, %v3826_v24  }
  0x53   : > { %464 = vperm.xlu1 %3405, %v3831_v25   ;;  %459 = vperm.xlu0 %3404, %v3834_v26  }
  0x57   : > { %474 = vperm.xlu1 %3405, %v3839_v27   ;;  %469 = vperm.xlu0 %3404, %v3842_v28  }
  0x5b   : > { %484 = vperm.xlu1 %3405, %v3847_v29   ;;  %479 = vperm.xlu0 %3404, %v3850_v30  }
  0x5f   : > { %3407 = vset.pattern.permute.xlu1 %v3602_v31  ;;  %3406 = vset.pattern.permute.xlu0 %v3602_v31 }
  0x60   : > { %527 = vperm.xlu1 %3407, %v3746_v4   ;;  %523 = vperm.xlu0 %3406, %v3738_v2  }
  0x64   : > { %531 = vperm.xlu1 %3407, %v3735_v1   ;;  %535 = vperm.xlu0 %3406, %v3743_v3  }
  0x68   : > { %539 = vperm.xlu1 %3407, %v3754_v6   ;;  %543 = vperm.xlu0 %3406, %v3751_v5  }
  0x6c   : > { %547 = vperm.xlu1 %3407, %v3762_v8   ;;  %551 = vperm.xlu0 %3406, %v3759_v7  }
  0x70   : > { %555 = vperm.xlu1 %3407, %v3770_v10   ;;  %559 = vperm.xlu0 %3406, %v3767_v9  }
  0x74   : > { %563 = vperm.xlu1 %3407, %v3778_v12   ;;  %567 = vperm.xlu0 %3406, %v3775_v11  }
  0x78   : > { %571 = vperm.xlu1 %3407, %v3786_v14   ;;  %575 = vperm.xlu0 %3406, %v3783_v13  }
  0x7c   : > { %579 = vperm.xlu1 %3407, %v3794_v16   ;;  %583 = vperm.xlu0 %3406, %v3791_v15  }
  0x80   : > { %587 = vperm.xlu1 %3407, %v3802_v18   ;;  %591 = vperm.xlu0 %3406, %v3799_v17  }
  0x84   : > { %595 = vperm.xlu1 %3407, %v3810_v20   ;;  %599 = vperm.xlu0 %3406, %v3807_v19  }
  0x88   : > { %603 = vperm.xlu1 %3407, %v3818_v22   ;;  %607 = vperm.xlu0 %3406, %v3815_v21  }
  0x8c   : > { %611 = vperm.xlu1 %3407, %v3826_v24   ;;  %615 = vperm.xlu0 %3406, %v3823_v23  }
  0x90   : > { %619 = vperm.xlu1 %3407, %v3834_v26   ;;  %623 = vperm.xlu0 %3406, %v3831_v25  }
  0x94   : > { %627 = vperm.xlu1 %3407, %v3842_v28   ;;  %631 = vperm.xlu0 %3406, %v3839_v27  }
  0x98   : > { %635 = vperm.xlu1 %3407, %v3850_v30   ;;  %639 = vperm.xlu0 %3406, %v3847_v29  }
  0x9c   : > { %3408 = vset.pattern.permute.xlu1 %v3603_v32  ;;  %3409 = vset.pattern.permute.xlu0 %v3603_v32 }
  0x9d   : > { %708 = vperm.xlu1 %3408, %v3738_v2   ;;  %712 = vperm.xlu0 %3409, %v3746_v4  }
  0xa1   : > { %716 = vperm.xlu1 %3408, %v3735_v1   ;;  %724 = vperm.xlu0 %3409, %v3754_v6  }
  0xa2   : > { %v3888_v33 = vpop.permute.xlu1 %349  ;;  %v3890_v34 = vpop.permute.xlu0 %339 }
  0xa3   : > { %6080 = vst [vmem:[#allocation6_spill] sm:$0xff] %v3888_v33  ;;  %6081 = vst [vmem:[#allocation7_spill] sm:$0xff] %v3890_v34 }
  0xa5   : > { %720 = vperm.xlu1 %3408, %v3743_v3   ;;  %732 = vperm.xlu0 %3409, %v3762_v8  }
  0xa6   : > { %v3894_v35 = vpop.permute.xlu1 %354  ;;  %v3896_v36 = vpop.permute.xlu0 %344 }
  0xa7   : > { %6082 = vst [vmem:[#allocation8_spill] sm:$0xff] %v3894_v35 }
  0xa9   : > { %728 = vperm.xlu1 %3408, %v3751_v5   ;;  %740 = vperm.xlu0 %3409, %v3770_v10  }
  0xaa   : > { %v3900_v37 = vpop.permute.xlu1 %364  ;;  %v3902_v38 = vpop.permute.xlu0 %359 }
  0xab   : > { %6083 = vst [vmem:[#allocation9_spill] sm:$0xff] %v3900_v37 }
  0xad   : > { %736 = vperm.xlu1 %3408, %v3759_v7   ;;  %748 = vperm.xlu0 %3409, %v3778_v12  }
  0xae   : > { %v3906_v39 = vpop.permute.xlu1 %374  ;;  %v3908_v40 = vpop.permute.xlu0 %369 }
  0xaf   : > { %6084 = vst [vmem:[#allocation10_spill] sm:$0xff] %v3906_v39 }
  0xb1   : > { %744 = vperm.xlu1 %3408, %v3767_v9   ;;  %756 = vperm.xlu0 %3409, %v3786_v14  }
  0xb2   : > { %v3912_v41 = vpop.permute.xlu1 %384  ;;  %v3914_v42 = vpop.permute.xlu0 %379 }
  0xb3   : > { %6085 = vst [vmem:[#allocation11_spill] sm:$0xff] %v3912_v41 }
  0xb5   : > { %752 = vperm.xlu1 %3408, %v3775_v11   ;;  %764 = vperm.xlu0 %3409, %v3794_v16  }
  0xb6   : > { %v3918_v43 = vpop.permute.xlu1 %394  ;;  %v3920_v44 = vpop.permute.xlu0 %389 }
  0xb7   : > { %6086 = vst [vmem:[#allocation12_spill] sm:$0xff] %v3918_v43 }
  0xb9   : > { %760 = vperm.xlu1 %3408, %v3783_v13   ;;  %772 = vperm.xlu0 %3409, %v3802_v18  }
  0xba   : > { %v3924_v45 = vpop.permute.xlu1 %404  ;;  %v3926_v46 = vpop.permute.xlu0 %399 }
  0xbb   : > { %6087 = vst [vmem:[#allocation13_spill] sm:$0xff] %v3926_v46 }
  0xbd   : > { %768 = vperm.xlu1 %3408, %v3791_v15   ;;  %780 = vperm.xlu0 %3409, %v3810_v20  }
  0xbe   : > { %v3930_v47 = vpop.permute.xlu1 %414  ;;  %v3932_v48 = vpop.permute.xlu0 %409 }
  0xbf   : > { %6088 = vst [vmem:[#allocation14_spill] sm:$0xff] %v3930_v47  ;;  %6089 = vst [vmem:[#allocation15_spill] sm:$0xff] %v3932_v48 }
  0xc1   : > { %776 = vperm.xlu1 %3408, %v3799_v17   ;;  %788 = vperm.xlu0 %3409, %v3818_v22  }
  0xc2   : > { %v3936_v49 = vpop.permute.xlu1 %424  ;;  %v3938_v50 = vpop.permute.xlu0 %419 }
  0xc3   : > { %6090 = vst [vmem:[#allocation16_spill] sm:$0xff] %v3936_v49  ;;  %6091 = vst [vmem:[#allocation17_spill] sm:$0xff] %v3938_v50 }
  0xc5   : > { %784 = vperm.xlu1 %3408, %v3807_v19   ;;  %796 = vperm.xlu0 %3409, %v3826_v24  }
  0xc6   : > { %v3942_v51 = vpop.permute.xlu1 %434  ;;  %v3944_v52 = vpop.permute.xlu0 %429 }
  0xc7   : > { %6092 = vst [vmem:[#allocation18_spill] sm:$0xff] %v3944_v52 }
  0xc9   : > { %792 = vperm.xlu1 %3408, %v3815_v21   ;;  %804 = vperm.xlu0 %3409, %v3834_v26  }
  0xca   : > { %v3948_v53 = vpop.permute.xlu1 %444  ;;  %v3950_v54 = vpop.permute.xlu0 %439 }
  0xcb   : > { %6093 = vst [vmem:[#allocation19_spill] sm:$0xff] %v3948_v53 }
  0xcd   : > { %800 = vperm.xlu1 %3408, %v3823_v23   ;;  %812 = vperm.xlu0 %3409, %v3842_v28  }
  0xce   : > { %v3954_v55 = vpop.permute.xlu1 %454  ;;  %v3956_v56 = vpop.permute.xlu0 %449 }
  0xcf   : > { %6094 = vst [vmem:[#allocation20_spill] sm:$0xff] %v3954_v55 }
  0xd1   : > { %808 = vperm.xlu1 %3408, %v3831_v25   ;;  %820 = vperm.xlu0 %3409, %v3850_v30  }
  0xd2   : > { %v3960_v57 = vpop.permute.xlu1 %464  ;;  %v3962_v58 = vpop.permute.xlu0 %459 }
  0xd5   : > { %816 = vperm.xlu1 %3408, %v3839_v27   ;;  %3410 = vset.pattern.permute.xlu0 %v3604_v59 }
  0xd6   : > { %v3965_v60 = vpop.permute.xlu1 %474  ;;  %893 = vperm.xlu0 %3410, %v3738_v2   ;;  %v3968_v61 = vpop.permute.xlu0 %469 }
  0xd9   : > { %824 = vperm.xlu1 %3408, %v3847_v29  }
  0xda   : > { %v3971_v62 = vpop.permute.xlu1 %484  ;;  %905 = vperm.xlu0 %3410, %v3743_v3   ;;  %v3974_v63 = vpop.permute.xlu0 %479 }
  0xdd   : > { %3411 = vset.pattern.permute.xlu1 %v3604_v59 }
  0xde   : > { %897 = vperm.xlu1 %3411, %v3746_v4   ;;  %913 = vperm.xlu0 %3410, %v3751_v5  }
  0xdf   : > { %v3978_v0 = vpop.permute.xlu1 %527  ;;  %v3980_v31 = vpop.permute.xlu0 %523 }
  0xe0   : > { %6095 = vst [vmem:[#allocation21_spill] sm:$0xff] %v3980_v31 }
  0xe2   : > { %901 = vperm.xlu1 %3411, %v3735_v1   ;;  %921 = vperm.xlu0 %3410, %v3759_v7  }
  0xe3   : > { %v3984_v32 = vpop.permute.xlu1 %531  ;;  %v3986_v53 = vpop.permute.xlu0 %535 }
  0xe4   : > { %6096 = vst [vmem:[#allocation22_spill] sm:$0xff] %v3984_v32  ;;  %6097 = vst [vmem:[#allocation23_spill] sm:$0xff] %v3986_v53 }
  0xe6   : > { %909 = vperm.xlu1 %3411, %v3754_v6   ;;  %929 = vperm.xlu0 %3410, %v3767_v9  }
  0xe7   : > { %v3990_v59 = vpop.permute.xlu1 %539  ;;  %v3992_v47 = vpop.permute.xlu0 %543 }
  0xe8   : > { %6098 = vst [vmem:[#allocation24_spill] sm:$0xff] %v3992_v47 }
  0xea   : > { %917 = vperm.xlu1 %3411, %v3762_v8   ;;  %937 = vperm.xlu0 %3410, %v3775_v11  }
  0xeb   : > { %v3996_v55 = vpop.permute.xlu1 %547  ;;  %v3998_v49 = vpop.permute.xlu0 %551 }
  0xec   : > { %6099 = vst [vmem:[#allocation25_spill] sm:$0xff] %v3998_v49  ;;  %v4017_v49 = vld [vmem:[%s6033_s1] ss:$0 sm:$0xff] }
  0xee   : > { %925 = vperm.xlu1 %3411, %v3770_v10   ;;  %945 = vperm.xlu0 %3410, %v3783_v13  }
  0xef   : > { %v4002_v48 = vpop.permute.xlu1 %555  ;;  %v4004_v32 = vpop.permute.xlu0 %559 }
  0xf0   : > { %6100 = vst [vmem:[#allocation26_spill] sm:$0xff] %v4004_v32  ;;  %v4022_v32 = vld [vmem:[%s6033_s1 + $0x1] ss:$0 sm:$0xff] }
  0xf2   : > { %933 = vperm.xlu1 %3411, %v3778_v12   ;;  %953 = vperm.xlu0 %3410, %v3791_v15  }
  0xf3   : > { %v4008_v47 = vpop.permute.xlu1 %563  ;;  %v4010_v43 = vpop.permute.xlu0 %567 }
  0xf4   : > { %6101 = vst [vmem:[#allocation27_spill] sm:$0xff] %v4010_v43  ;;  %v504_v43 = vmul.f32 %v4017_v49, %v3924_v45 }
  0xf6   : > { %941 = vperm.xlu1 %3411, %v3786_v14   ;;  %961 = vperm.xlu0 %3410, %v3799_v17  }
  0xf7   : > { %v4024_v41 = vpop.permute.xlu1 %571  ;;  %v576_v39 = vpop.permute.xlu0 %575 }
  0xf8   : > { %6102 = vst [vmem:[#allocation28_spill] sm:$0xff] %v4024_v41  ;;  %v659_v37 = vmul.f32 %v4022_v32, %v576_v39 }
  0xfa   : > { %v4029_v35 = vadd.f32 %v659_v37, %v504_v43  ;;  %949 = vperm.xlu1 %3411, %v3794_v16   ;;  %969 = vperm.xlu0 %3410, %v3807_v19   ;;  %v510_v43 = vmul.f32 %v4017_v49, %v3942_v51 }
  0xfb   : > { %v4033_v33 = vpop.permute.xlu1 %579  ;;  %v4035_v53 = vpop.permute.xlu0 %583 }
  0xfc   : > { %6103 = vst [vmem:[#allocation29_spill] sm:$0xff] %v4033_v33  ;;  %6104 = vst [vmem:[#allocation30_spill] sm:$0xff] %v4035_v53 }
  0xfe   : > { %957 = vperm.xlu1 %3411, %v3802_v18   ;;  %977 = vperm.xlu0 %3410, %v3815_v21  }
  0xff   : > { %v4039_v34 = vpop.permute.xlu1 %587  ;;  %v4041_v31 = vpop.permute.xlu0 %591 }
 0x100   : > { %6105 = vst [vmem:[#allocation31_spill] sm:$0xff] %v4039_v34  ;;  %6106 = vst [vmem:[#allocation32_spill] sm:$0xff] %v4041_v31 }
 0x102   : > { %965 = vperm.xlu1 %3411, %v3810_v20   ;;  %985 = vperm.xlu0 %3410, %v3823_v23  }
 0x103   : > { %v4045_v37 = vpop.permute.xlu1 %595  ;;  %v600_v39 = vpop.permute.xlu0 %599 }
 0x104   : > { %6107 = vst [vmem:[#allocation33_spill] sm:$0xff] %v4045_v37  ;;  %v665_v45 = vmul.f32 %v4022_v32, %v600_v39 }
 0x106   : > { %v4050_v53 = vadd.f32 %v665_v45, %v510_v43  ;;  %973 = vperm.xlu1 %3411, %v3818_v22   ;;  %993 = vperm.xlu0 %3410, %v3831_v25   ;;  %v516_v43 = vmul.f32 %v4017_v49, %v3960_v57  ;;  %v515_v45 = vmul.f32 %v4017_v49, %v3962_v58 }
 0x107   : > { %v4054_v33 = vpop.permute.xlu1 %603  ;;  %v4056_v31 = vpop.permute.xlu0 %607  ;;  %v518_v58 = vmul.f32 %v4017_v49, %v3965_v60 }
 0x108   : > { %6108 = vst [vmem:[#allocation34_spill] sm:$0xff] %v4056_v31 }
 0x10a   : > { %981 = vperm.xlu1 %3411, %v3826_v24   ;;  %1001 = vperm.xlu0 %3410, %v3839_v27  }
 0x10b   : > { %v4060_v52 = vpop.permute.xlu1 %611  ;;  %v4062_v37 = vpop.permute.xlu0 %615 }
 0x10c   : > { %6109 = vst [vmem:[#allocation35_spill] sm:$0xff] %v4060_v52  ;;  %6110 = vst [vmem:[#allocation36_spill] sm:$0xff] %v4062_v37  ;;  %v3605_v37 = vmov 4  }
 0x10e   : > { %989 = vperm.xlu1 %3411, %v3834_v26   ;;  %1009 = vperm.xlu0 %3410, %v3847_v29  }
 0x10f   : > { %v620_v51 = vpop.permute.xlu1 %619  ;;  %v624_v39 = vpop.permute.xlu0 %623 }
 0x110   : > { %v670_v31 = vmul.f32 %v4022_v32, %v620_v51  ;;  %v671_v50 = vmul.f32 %v4022_v32, %v624_v39 }
 0x112   : > { %v4072_v34 = vadd.f32 %v670_v31, %v515_v45  ;;  %v4074_v46 = vadd.f32 %v671_v50, %v516_v43  ;;  %997 = vperm.xlu1 %3411, %v3842_v28   ;;  %3413 = vset.pattern.permute.xlu0 %v3605_v37 }
 0x113   : > { %v4077_v41 = vpop.permute.xlu1 %627  ;;  %1082 = vperm.xlu0 %3413, %v3746_v4   ;;  %v632_v57 = vpop.permute.xlu0 %631 }
 0x114   : > { %6111 = vst [vmem:[#allocation37_spill] sm:$0xff] %v4077_v41  ;;  %v673_v51 = vmul.f32 %v4022_v32, %v632_v57 }
 0x116   : > { %v4083_v52 = vadd.f32 %v673_v51, %v518_v58  ;;  %1005 = vperm.xlu1 %3411, %v3850_v30  }
 0x117   : > { %v4086_v50 = vpop.permute.xlu1 %635  ;;  %1094 = vperm.xlu0 %3413, %v3754_v6   ;;  %v4089_v31 = vpop.permute.xlu0 %639 }
 0x118   : > { %6112 = vst [vmem:[#allocation38_spill] sm:$0xff] %v4086_v50  ;;  %6113 = vst [vmem:[#allocation39_spill] sm:$0xff] %v4089_v31 }
 0x11a   : > { %3412 = vset.pattern.permute.xlu1 %v3605_v37 }
 0x11b   : > { %1078 = vperm.xlu1 %3412, %v3738_v2   ;;  %1102 = vperm.xlu0 %3413, %v3762_v8  }
 0x11c   : > { %v4093_v39 = vpop.permute.xlu1 %708  ;;  %v4095_v60 = vpop.permute.xlu0 %712 }
 0x11d   : > { %6114 = vst [vmem:[#allocation40_spill] sm:$0xff] %v4093_v39  ;;  %6115 = vst [vmem:[#allocation41_spill] sm:$0xff] %v4095_v60 }
 0x11f   : > { %1086 = vperm.xlu1 %3412, %v3735_v1   ;;  %1110 = vperm.xlu0 %3413, %v3770_v10  }
 0x120   : > { %v4099_v43 = vpop.permute.xlu1 %716  ;;  %v4101_v45 = vpop.permute.xlu0 %724 }
 0x121   : > { %6116 = vst [vmem:[#allocation42_spill] sm:$0xff] %v4099_v43  ;;  %6117 = vst [vmem:[#allocation43_spill] sm:$0xff] %v4101_v45 }
 0x123   : > { %1090 = vperm.xlu1 %3412, %v3743_v3   ;;  %1118 = vperm.xlu0 %3413, %v3778_v12  }
 0x124   : > { %v4105_v37 = vpop.permute.xlu1 %720  ;;  %v4107_v57 = vpop.permute.xlu0 %732 }
 0x125   : > { %6118 = vst [vmem:[#allocation44_spill] sm:$0xff] %v4105_v37  ;;  %6119 = vst [vmem:[#allocation45_spill] sm:$0xff] %v4107_v57 }
 0x127   : > { %1098 = vperm.xlu1 %3412, %v3751_v5   ;;  %1126 = vperm.xlu0 %3413, %v3786_v14  }
 0x128   : > { %v4111_v58 = vpop.permute.xlu1 %728  ;;  %v4113_v51 = vpop.permute.xlu0 %740 }
 0x129   : > { %6120 = vst [vmem:[#allocation46_spill] sm:$0xff] %v4111_v58  ;;  %6121 = vst [vmem:[#allocation47_spill] sm:$0xff] %v4113_v51 }
 0x12b   : > { %1106 = vperm.xlu1 %3412, %v3759_v7   ;;  %1134 = vperm.xlu0 %3413, %v3794_v16  }
 0x12c   : > { %v4117_v43 = vpop.permute.xlu1 %736  ;;  %v4119_v39 = vpop.permute.xlu0 %748 }
 0x12d   : > { %6122 = vst [vmem:[#allocation48_spill] sm:$0xff] %v4117_v43  ;;  %6123 = vst [vmem:[#allocation49_spill] sm:$0xff] %v4119_v39  ;;  %v4138_v43 = vld [vmem:[%s6033_s1 + $0x2] ss:$0 sm:$0xff] }
 0x12f   : > { %1114 = vperm.xlu1 %3412, %v3767_v9   ;;  %1142 = vperm.xlu0 %3413, %v3802_v18  }
 0x130   : > { %v4123_v37 = vpop.permute.xlu1 %744  ;;  %v4125_v57 = vpop.permute.xlu0 %756 }
 0x131   : > { %6124 = vst [vmem:[#allocation50_spill] sm:$0xff] %v4123_v37  ;;  %6125 = vst [vmem:[#allocation51_spill] sm:$0xff] %v4125_v57 }
 0x133   : > { %1122 = vperm.xlu1 %3412, %v3775_v11   ;;  %1150 = vperm.xlu0 %3413, %v3810_v20  }
 0x134   : > { %v4129_v58 = vpop.permute.xlu1 %752  ;;  %v4131_v51 = vpop.permute.xlu0 %764 }
 0x135   : > { %6126 = vst [vmem:[#allocation52_spill] sm:$0xff] %v4129_v58  ;;  %6127 = vst [vmem:[#allocation53_spill] sm:$0xff] %v4131_v51 }
 0x137   : > { %1130 = vperm.xlu1 %3412, %v3783_v13   ;;  %1158 = vperm.xlu0 %3413, %v3818_v22  }
 0x138   : > { %v761_v37 = vpop.permute.xlu1 %760  ;;  %v4140_v39 = vpop.permute.xlu0 %772 }
 0x139   : > { %6128 = vst [vmem:[#allocation54_spill] sm:$0xff] %v4140_v39  ;;  %v844_v57 = vmul.f32 %v4138_v43, %v761_v37 }
 0x13b   : > { %v4144_v45 = vadd.f32 %v844_v57, %v4029_v35  ;;  %1138 = vperm.xlu1 %3412, %v3791_v15   ;;  %1166 = vperm.xlu0 %3413, %v3826_v24  }
 0x13c   : > { %v4148_v51 = vpop.permute.xlu1 %768  ;;  %v4150_v58 = vpop.permute.xlu0 %780 }
 0x13d   : > { %6129 = vst [vmem:[#allocation55_spill] sm:$0xff] %v4148_v51  ;;  %6130 = vst [vmem:[#allocation56_spill] sm:$0xff] %v4150_v58 }
 0x13f   : > { %1146 = vperm.xlu1 %3412, %v3799_v17   ;;  %1174 = vperm.xlu0 %3413, %v3834_v26  }
 0x140   : > { %v4154_v50 = vpop.permute.xlu1 %776  ;;  %v4156_v39 = vpop.permute.xlu0 %788 }
 0x141   : > { %6131 = vst [vmem:[#allocation57_spill] sm:$0xff] %v4154_v50  ;;  %6132 = vst [vmem:[#allocation58_spill] sm:$0xff] %v4156_v39 }
 0x143   : > { %1154 = vperm.xlu1 %3412, %v3807_v19   ;;  %1182 = vperm.xlu0 %3413, %v3842_v28  }
 0x144   : > { %v785_v35 = vpop.permute.xlu1 %784  ;;  %v4160_v37 = vpop.permute.xlu0 %796 }
 0x145   : > { %6133 = vst [vmem:[#allocation59_spill] sm:$0xff] %v4160_v37  ;;  %v850_v57 = vmul.f32 %v4138_v43, %v785_v35  ;;  %v3606_v37 = vmov 5  }
 0x147   : > { %v4164_v51 = vadd.f32 %v850_v57, %v4050_v53  ;;  %1162 = vperm.xlu1 %3412, %v3815_v21   ;;  %1190 = vperm.xlu0 %3413, %v3850_v30  }
 0x148   : > { %v4168_v58 = vpop.permute.xlu1 %792  ;;  %v805_v50 = vpop.permute.xlu0 %804 }
 0x149   : > { %6134 = vst [vmem:[#allocation60_spill] sm:$0xff] %v4168_v58  ;;  %v855_v60 = vmul.f32 %v4138_v43, %v805_v50 }
 0x14b   : > { %v4172_v41 = vadd.f32 %v855_v60, %v4072_v34  ;;  %1170 = vperm.xlu1 %3412, %v3823_v23   ;;  %3414 = vset.pattern.permute.xlu0 %v3606_v37 }
 0x14c   : > { %v4175_v35 = vpop.permute.xlu1 %800  ;;  %1263 = vperm.xlu0 %3414, %v3738_v2   ;;  %v4178_v53 = vpop.permute.xlu0 %812 }
 0x14d   : > { %6135 = vst [vmem:[#allocation61_spill] sm:$0xff] %v4175_v35  ;;  %6136 = vst [vmem:[#allocation62_spill] sm:$0xff] %v4178_v53 }
 0x14f   : > { %1178 = vperm.xlu1 %3412, %v3831_v25  }
 0x150   : > { %v809_v57 = vpop.permute.xlu1 %808  ;;  %1275 = vperm.xlu0 %3414, %v3743_v3   ;;  %v4182_v58 = vpop.permute.xlu0 %820 }
 0x151   : > { %6137 = vst [vmem:[#allocation63_spill] sm:$0xff] %v4182_v58  ;;  %v856_v34 = vmul.f32 %v4138_v43, %v809_v57 }
 0x153   : > { %v886_v50 = vadd.f32 %v856_v34, %v4074_v46  ;;  %1186 = vperm.xlu1 %3412, %v3839_v27  }
 0x154   : > { %v817_v60 = vpop.permute.xlu1 %816  ;;  %1283 = vperm.xlu0 %3414, %v3751_v5  }
 0x155   : > { %v858_v35 = vmul.f32 %v4138_v43, %v817_v60  ;;  %v4189_v39 = vpop.permute.xlu0 %893 }
 0x156   : > { %6138 = vst [vmem:[#allocation64_spill] sm:$0xff] %v4189_v39 }
 0x157   : > { %v4192_v53 = vadd.f32 %v858_v35, %v4083_v52  ;;  %1194 = vperm.xlu1 %3412, %v3847_v29  }
 0x158   : > { %v4195_v31 = vpop.permute.xlu1 %824  ;;  %1291 = vperm.xlu0 %3414, %v3759_v7  }
 0x159   : > { %6139 = vst [vmem:[#allocation65_spill] sm:$0xff] %v4195_v31  ;;  %v4198_v57 = vpop.permute.xlu0 %905 }
 0x15a   : > { %6140 = vst [vmem:[#allocation66_spill] sm:$0xff] %v4198_v57 }
 0x15b   : > { %3415 = vset.pattern.permute.xlu1 %v3606_v37 }
 0x15c   : > { %1267 = vperm.xlu1 %3415, %v3746_v4   ;;  %1299 = vperm.xlu0 %3414, %v3767_v9  }
 0x15d   : > { %v4202_v46 = vpop.permute.xlu1 %897  ;;  %v4204_v34 = vpop.permute.xlu0 %913 }
 0x15e   : > { %6141 = vst [vmem:[#allocation67_spill] sm:$0xff] %v4202_v46  ;;  %6142 = vst [vmem:[#allocation68_spill] sm:$0xff] %v4204_v34 }
 0x160   : > { %1271 = vperm.xlu1 %3415, %v3735_v1   ;;  %1307 = vperm.xlu0 %3414, %v3775_v11  }
 0x161   : > { %v4208_v52 = vpop.permute.xlu1 %901  ;;  %v4210_v35 = vpop.permute.xlu0 %921 }
 0x162   : > { %6143 = vst [vmem:[#allocation69_spill] sm:$0xff] %v4208_v52  ;;  %6144 = vst [vmem:[#allocation70_spill] sm:$0xff] %v4210_v35  ;;  %v4229_v52 = vld [vmem:[%s6033_s1 + $0x3] ss:$0 sm:$0xff] }
 0x164   : > { %1279 = vperm.xlu1 %3415, %v3754_v6   ;;  %1315 = vperm.xlu0 %3414, %v3783_v13  }
 0x165   : > { %v4214_v37 = vpop.permute.xlu1 %909  ;;  %v4216_v60 = vpop.permute.xlu0 %929 }
 0x166   : > { %6145 = vst [vmem:[#allocation71_spill] sm:$0xff] %v4214_v37  ;;  %6146 = vst [vmem:[#allocation72_spill] sm:$0xff] %v4216_v60 }
 0x168   : > { %1287 = vperm.xlu1 %3415, %v3762_v8   ;;  %1323 = vperm.xlu0 %3414, %v3791_v15  }
 0x169   : > { %v4220_v34 = vpop.permute.xlu1 %917  ;;  %v4222_v57 = vpop.permute.xlu0 %937 }
 0x16a   : > { %6147 = vst [vmem:[#allocation73_spill] sm:$0xff] %v4220_v34  ;;  %6148 = vst [vmem:[#allocation74_spill] sm:$0xff] %v4222_v57 }
 0x16c   : > { %1295 = vperm.xlu1 %3415, %v3770_v10   ;;  %1331 = vperm.xlu0 %3414, %v3799_v17  }
 0x16d   : > { %v4231_v35 = vpop.permute.xlu1 %925  ;;  %v946_v60 = vpop.permute.xlu0 %945 }
 0x16e   : > { %6149 = vst [vmem:[#allocation75_spill] sm:$0xff] %v4231_v35  ;;  %v1029_v39 = vmul.f32 %v4229_v52, %v946_v60 }
 0x170   : > { %v4235_v58 = vadd.f32 %v1029_v39, %v4144_v45  ;;  %1303 = vperm.xlu1 %3415, %v3778_v12   ;;  %1339 = vperm.xlu0 %3414, %v3807_v19  }
 0x171   : > { %v4239_v57 = vpop.permute.xlu1 %933  ;;  %v4241_v34 = vpop.permute.xlu0 %953 }
 0x172   : > { %6150 = vst [vmem:[#allocation76_spill] sm:$0xff] %v4239_v57  ;;  %6151 = vst [vmem:[#allocation77_spill] sm:$0xff] %v4241_v34 }
 0x174   : > { %1311 = vperm.xlu1 %3415, %v3786_v14   ;;  %1347 = vperm.xlu0 %3414, %v3815_v21  }
 0x175   : > { %v4245_v37 = vpop.permute.xlu1 %941  ;;  %v4247_v35 = vpop.permute.xlu0 %961 }
 0x176   : > { %6152 = vst [vmem:[#allocation78_spill] sm:$0xff] %v4245_v37  ;;  %6153 = vst [vmem:[#allocation79_spill] sm:$0xff] %v4247_v35 }
 0x178   : > { %1319 = vperm.xlu1 %3415, %v3794_v16   ;;  %1355 = vperm.xlu0 %3414, %v3823_v23  }
 0x179   : > { %v4251_v39 = vpop.permute.xlu1 %949  ;;  %v970_v45 = vpop.permute.xlu0 %969 }
 0x17a   : > { %6154 = vst [vmem:[#allocation80_spill] sm:$0xff] %v4251_v39  ;;  %v1035_v60 = vmul.f32 %v4229_v52, %v970_v45 }
 0x17c   : > { %v4255_v57 = vadd.f32 %v1035_v60, %v4164_v51  ;;  %1327 = vperm.xlu1 %3415, %v3802_v18   ;;  %1363 = vperm.xlu0 %3414, %v3831_v25  }
 0x17d   : > { %v4259_v34 = vpop.permute.xlu1 %957  ;;  %v4261_v37 = vpop.permute.xlu0 %977 }
 0x17e   : > { %6155 = vst [vmem:[#allocation81_spill] sm:$0xff] %v4259_v34  ;;  %6156 = vst [vmem:[#allocation82_spill] sm:$0xff] %v4261_v37  ;;  %v3607_v37 = vmov 6  }
 0x180   : > { %1335 = vperm.xlu1 %3415, %v3810_v20   ;;  %1371 = vperm.xlu0 %3414, %v3839_v27  }
 0x181   : > { %v4265_v35 = vpop.permute.xlu1 %965  ;;  %v4267_v39 = vpop.permute.xlu0 %985 }
 0x182   : > { %6157 = vst [vmem:[#allocation83_spill] sm:$0xff] %v4265_v35  ;;  %6158 = vst [vmem:[#allocation84_spill] sm:$0xff] %v4267_v39 }
 0x184   : > { %1343 = vperm.xlu1 %3415, %v3818_v22   ;;  %1379 = vperm.xlu0 %3414, %v3847_v29  }
 0x185   : > { %v4271_v51 = vpop.permute.xlu1 %973  ;;  %v994_v45 = vpop.permute.xlu0 %993 }
 0x186   : > { %6159 = vst [vmem:[#allocation85_spill] sm:$0xff] %v4271_v51  ;;  %v1041_v60 = vmul.f32 %v4229_v52, %v994_v45 }
 0x188   : > { %v4274_v34 = vadd.f32 %v1041_v60, %v886_v50  ;;  %1351 = vperm.xlu1 %3415, %v3826_v24   ;;  %3417 = vset.pattern.permute.xlu0 %v3607_v37 }
 0x189   : > { %v4277_v46 = vpop.permute.xlu1 %981  ;;  %1452 = vperm.xlu0 %3417, %v3746_v4   ;;  %v1002_v39 = vpop.permute.xlu0 %1001 }
 0x18a   : > { %6160 = vst [vmem:[#allocation86_spill] sm:$0xff] %v4277_v46  ;;  %v1043_v35 = vmul.f32 %v4229_v52, %v1002_v39 }
 0x18c   : > { %v4282_v31 = vadd.f32 %v1043_v35, %v4192_v53  ;;  %1359 = vperm.xlu1 %3415, %v3834_v26  }
 0x18d   : > { %v990_v51 = vpop.permute.xlu1 %989  ;;  %1464 = vperm.xlu0 %3417, %v3754_v6   ;;  %v4286_v50 = vpop.permute.xlu0 %1009 }
 0x18e   : > { %v1040_v45 = vmul.f32 %v4229_v52, %v990_v51 }
 0x190   : > { %v1070_v60 = vadd.f32 %v1040_v45, %v4172_v41  ;;  %1367 = vperm.xlu1 %3415, %v3842_v28  }
 0x191   : > { %v4291_v46 = vpop.permute.xlu1 %997  ;;  %1472 = vperm.xlu0 %3417, %v3762_v8  }
 0x192   : > { %6161 = vst [vmem:[#allocation87_spill] sm:$0xff] %v4291_v46  ;;  %v4294_v39 = vpop.permute.xlu0 %1082 }
 0x193   : > { %6162 = vst [vmem:[#allocation88_spill] sm:$0xff] %v4294_v39 }
 0x194   : > { %1375 = vperm.xlu1 %3415, %v3850_v30  }
 0x195   : > { %v4297_v53 = vpop.permute.xlu1 %1005  ;;  %1480 = vperm.xlu0 %3417, %v3770_v10  }
 0x196   : > { %6163 = vst [vmem:[#allocation89_spill] sm:$0xff] %v4297_v53  ;;  %v4300_v35 = vpop.permute.xlu0 %1094 }
 0x197   : > { %6164 = vst [vmem:[#allocation90_spill] sm:$0xff] %v4300_v35 }
 0x198   : > { %3416 = vset.pattern.permute.xlu1 %v3607_v37 }
 0x199   : > { %1448 = vperm.xlu1 %3416, %v3738_v2   ;;  %1488 = vperm.xlu0 %3417, %v3778_v12  }
 0x19a   : > { %v4304_v41 = vpop.permute.xlu1 %1078  ;;  %v4306_v51 = vpop.permute.xlu0 %1102 }
 0x19b   : > { %6165 = vst [vmem:[#allocation91_spill] sm:$0xff] %v4304_v41  ;;  %6166 = vst [vmem:[#allocation92_spill] sm:$0xff] %v4306_v51 }
 0x19d   : > { %1456 = vperm.xlu1 %3416, %v3735_v1   ;;  %1496 = vperm.xlu0 %3417, %v3786_v14  }
 0x19e   : > { %v4310_v45 = vpop.permute.xlu1 %1086  ;;  %v4312_v53 = vpop.permute.xlu0 %1110 }
 0x19f   : > { %6167 = vst [vmem:[#allocation93_spill] sm:$0xff] %v4310_v45  ;;  %6168 = vst [vmem:[#allocation94_spill] sm:$0xff] %v4312_v53 }
 0x1a1   : > { %1460 = vperm.xlu1 %3416, %v3743_v3   ;;  %1504 = vperm.xlu0 %3417, %v3794_v16  }
 0x1a2   : > { %v4316_v37 = vpop.permute.xlu1 %1090  ;;  %v4318_v46 = vpop.permute.xlu0 %1118 }
 0x1a3   : > { %6169 = vst [vmem:[#allocation95_spill] sm:$0xff] %v4316_v37  ;;  %6170 = vst [vmem:[#allocation96_spill] sm:$0xff] %v4318_v46 }
 0x1a5   : > { %1468 = vperm.xlu1 %3416, %v3751_v5   ;;  %1512 = vperm.xlu0 %3417, %v3802_v18  }
 0x1a6   : > { %v4322_v41 = vpop.permute.xlu1 %1098  ;;  %v4324_v51 = vpop.permute.xlu0 %1126 }
 0x1a7   : > { %6171 = vst [vmem:[#allocation97_spill] sm:$0xff] %v4322_v41  ;;  %6172 = vst [vmem:[#allocation98_spill] sm:$0xff] %v4324_v51 }
 0x1a9   : > { %1476 = vperm.xlu1 %3416, %v3759_v7   ;;  %1520 = vperm.xlu0 %3417, %v3810_v20  }
 0x1aa   : > { %v4328_v45 = vpop.permute.xlu1 %1106  ;;  %v4330_v53 = vpop.permute.xlu0 %1134 }
 0x1ab   : > { %6173 = vst [vmem:[#allocation99_spill] sm:$0xff] %v4328_v45  ;;  %6174 = vst [vmem:[#allocation100_spill] sm:$0xff] %v4330_v53 }
 0x1ad   : > { %1484 = vperm.xlu1 %3416, %v3767_v9   ;;  %1528 = vperm.xlu0 %3417, %v3818_v22  }
 0x1ae   : > { %v4334_v37 = vpop.permute.xlu1 %1114  ;;  %v4336_v46 = vpop.permute.xlu0 %1142 }
 0x1af   : > { %6175 = vst [vmem:[#allocation101_spill] sm:$0xff] %v4334_v37  ;;  %6176 = vst [vmem:[#allocation102_spill] sm:$0xff] %v4336_v46 }
 0x1b1   : > { %1492 = vperm.xlu1 %3416, %v3775_v11   ;;  %1536 = vperm.xlu0 %3417, %v3826_v24  }
 0x1b2   : > { %v4340_v41 = vpop.permute.xlu1 %1122  ;;  %v4342_v51 = vpop.permute.xlu0 %1150 }
 0x1b3   : > { %6177 = vst [vmem:[#allocation103_spill] sm:$0xff] %v4340_v41  ;;  %6178 = vst [vmem:[#allocation104_spill] sm:$0xff] %v4342_v51 }
 0x1b5   : > { %1500 = vperm.xlu1 %3416, %v3783_v13   ;;  %1544 = vperm.xlu0 %3417, %v3834_v26   ;;  %v4359_v13 = vld [vmem:[%s6033_s1 + $0x4] ss:$0 sm:$0xff] }
 0x1b6   : > { %v1131_v53 = vpop.permute.xlu1 %1130  ;;  %v4346_v45 = vpop.permute.xlu0 %1158 }
 0x1b7   : > { %6179 = vst [vmem:[#allocation105_spill] sm:$0xff] %v4346_v45 }
 0x1b9   : > { %1508 = vperm.xlu1 %3416, %v3791_v15   ;;  %1552 = vperm.xlu0 %3417, %v3842_v28  }
 0x1ba   : > { %v4350_v37 = vpop.permute.xlu1 %1138  ;;  %v4352_v46 = vpop.permute.xlu0 %1166 }
 0x1bb   : > { %6180 = vst [vmem:[#allocation106_spill] sm:$0xff] %v4350_v37  ;;  %6181 = vst [vmem:[#allocation107_spill] sm:$0xff] %v4352_v46  ;;  %v3608_v37 = vmov 7  }
 0x1bd   : > { %1516 = vperm.xlu1 %3416, %v3799_v17   ;;  %1560 = vperm.xlu0 %3417, %v3850_v30  }
 0x1be   : > { %v4361_v26 = vpop.permute.xlu1 %1146  ;;  %v1175_v41 = vpop.permute.xlu0 %1174 }
 0x1bf   : > { %6182 = vst [vmem:[#allocation108_spill] sm:$0xff] %v4361_v26  ;;  %v1225_v51 = vmul.f32 %v4359_v13, %v1175_v41 }
 0x1c1   : > { %v4364_v35 = vadd.f32 %v1225_v51, %v1070_v60  ;;  %1524 = vperm.xlu1 %3416, %v3807_v19   ;;  %3418 = vset.pattern.permute.xlu0 %v3608_v37 }
 0x1c2   : > { %v1155_v46 = vpop.permute.xlu1 %1154  ;;  %1633 = vperm.xlu0 %3418, %v3738_v2   ;;  %v4368_v39 = vpop.permute.xlu0 %1182 }
 0x1c5   : > { %1532 = vperm.xlu1 %3416, %v3815_v21  }
 0x1c6   : > { %v4371_v45 = vpop.permute.xlu1 %1162  ;;  %1645 = vperm.xlu0 %3418, %v3743_v3   ;;  %v4374_v26 = vpop.permute.xlu0 %1190 }
 0x1c7   : > { %6183 = vst [vmem:[#allocation109_spill] sm:$0xff] %v4371_v45 }
 0x1c9   : > { %1540 = vperm.xlu1 %3416, %v3823_v23  }
 0x1ca   : > { %v4377_v60 = vpop.permute.xlu1 %1170  ;;  %1653 = vperm.xlu0 %3418, %v3751_v5  }
 0x1cb   : > { %6184 = vst [vmem:[#allocation110_spill] sm:$0xff] %v4377_v60  ;;  %v4380_v19 = vpop.permute.xlu0 %1263 }
 0x1cd   : > { %1548 = vperm.xlu1 %3416, %v3831_v25  }
 0x1ce   : > { %v1179_v2 = vpop.permute.xlu1 %1178  ;;  %1661 = vperm.xlu0 %3418, %v3759_v7  }
 0x1cf   : > { %v1226_v41 = vmul.f32 %v4359_v13, %v1179_v2  ;;  %v4385_v51 = vpop.permute.xlu0 %1275 }
 0x1d1   : > { %v4388_v3 = vadd.f32 %v1226_v41, %v4274_v34  ;;  %1556 = vperm.xlu1 %3416, %v3839_v27  }
 0x1d2   : > { %v1187_v45 = vpop.permute.xlu1 %1186  ;;  %1669 = vperm.xlu0 %3418, %v3767_v9  }
 0x1d3   : > { %v1228_v5 = vmul.f32 %v4359_v13, %v1187_v45  ;;  %v4393_v60 = vpop.permute.xlu0 %1283 }
 0x1d5   : > { %v4396_v25 = vadd.f32 %v1228_v5, %v4282_v31  ;;  %1564 = vperm.xlu1 %3416, %v3847_v29  }
 0x1d6   : > { %v4399_v7 = vpop.permute.xlu1 %1194  ;;  %1677 = vperm.xlu0 %3418, %v3775_v11   ;;  %v1214_v11 = vmul.f32 %v4359_v13, %v1131_v53 }
 0x1d7   : > { %v4402_v34 = vpop.permute.xlu0 %1291 }
 0x1d9   : > { %3419 = vset.pattern.permute.xlu1 %v3608_v37 }
 0x1da   : > { %1637 = vperm.xlu1 %3419, %v3746_v4   ;;  %1689 = vperm.xlu0 %3418, %v3794_v16   ;;  %v4422_v4 = vld [vmem:[%s6033_s1 + $0x5] ss:$0 sm:$0xff] }
 0x1db   : > { %v4406_v9 = vpop.permute.xlu1 %1267  ;;  %v4408_v27 = vpop.permute.xlu0 %1299 }
 0x1de   : > { %1641 = vperm.xlu1 %3419, %v3735_v1   ;;  %1701 = vperm.xlu0 %3418, %v3799_v17   ;;  %v1244_v17 = vadd.f32 %v1214_v11, %v4235_v58  ;;  %v1220_v58 = vmul.f32 %v4359_v13, %v1155_v46 }
 0x1df   : > { %v4412_v31 = vpop.permute.xlu1 %1271  ;;  %v4414_v45 = vpop.permute.xlu0 %1307 }
 0x1e0   : > { %v1250_v5 = vadd.f32 %v1220_v58, %v4255_v57  ;;  %v497_v57 = vmul.f32 %v4017_v49, %v3908_v40  ;;  %v654_v40 = vmul.f32 %v4022_v32, %v4002_v48  ;;  %v6189_v48 = vld [vmem:[#allocation39_spill] sm:$0xff]  ;;  %v6190_v58 = vld [vmem:[#allocation58_spill] sm:$0xff] }
 0x1e2   : > { %1649 = vperm.xlu1 %3419, %v3754_v6   ;;  %1713 = vperm.xlu0 %3418, %v3818_v22  }
 0x1e3   : > { %v4424_v16 = vpop.permute.xlu1 %1279  ;;  %v1316_v1 = vpop.permute.xlu0 %1315 }
 0x1e4   : > { %v1399_v37 = vmul.f32 %v4422_v4, %v1316_v1  ;;  %v652_v1 = vmul.f32 %v4022_v32, %v3996_v55  ;;  %v517_v55 = vmul.f32 %v4017_v49, %v3968_v61 }
 0x1e6   : > { %v4428_v2 = vadd.f32 %v1399_v37, %v1244_v17  ;;  %1657 = vperm.xlu1 %3419, %v3762_v8   ;;  %1725 = vperm.xlu0 %3418, %v3823_v23   ;;  %v675_v37 = vmul.f32 %v4022_v32, %v6189_v48  ;;  %v6192_v48 = vld [vmem:[#allocation65_spill] sm:$0xff] }
 0x1e7   : > { %v4432_v6 = vpop.permute.xlu1 %1287  ;;  %v4434_v22 = vpop.permute.xlu0 %1323 }
 0x1e8   : > { %6185 = vst [vmem:[#allocation111_spill] sm:$0xff] %v4434_v22 }
 0x1ea   : > { %1665 = vperm.xlu1 %3419, %v3770_v10   ;;  %1737 = vperm.xlu0 %3418, %v3842_v28  }
 0x1eb   : > { %v4438_v53 = vpop.permute.xlu1 %1295  ;;  %v4440_v41 = vpop.permute.xlu0 %1331 }
 0x1ec   : > { %6186 = vst [vmem:[#allocation112_spill] sm:$0xff] %v4440_v41 }
 0x1ee   : > { %1673 = vperm.xlu1 %3419, %v3778_v12   ;;  %1749 = vperm.xlu0 %3418, %v3847_v29   ;;  %v492_v12 = vmul.f32 %v4017_v49, %v3896_v36  ;;  %v495_v29 = vmul.f32 %v4017_v49, %v3902_v38  ;;  %v511_v38 = vmul.f32 %v4017_v49, %v3950_v54 }
 0x1ef   : > { %v4445_v8 = vpop.permute.xlu1 %1303  ;;  %v1340_v23 = vpop.permute.xlu0 %1339  ;;  %v4495_v54 = vmul.f32 %v4017_v49, %v3974_v63  ;;  %v6191_v63 = vld [vmem:[#allocation35_spill] sm:$0xff] }
 0x1f0   : > { %v1405_v11 = vmul.f32 %v4422_v4, %v1340_v23 }
 0x1f2   : > { %v4449_v10 = vadd.f32 %v1405_v11, %v1250_v5  ;;  %1681 = vperm.xlu1 %3419, %v3786_v14   ;;  %1697 = vperm.xlu0 %3418, %v3802_v18   ;;  %v647_v14 = vmul.f32 %v4022_v32, %v3978_v0  ;;  %v650_v18 = vmul.f32 %v4022_v32, %v3990_v59 }
 0x1f3   : > { %v4453_v28 = vpop.permute.xlu1 %1311  ;;  %v4455_v46 = vpop.permute.xlu0 %1347  ;;  %v513_v0 = vmul.f32 %v4017_v49, %v3956_v56  ;;  %v656_v59 = vmul.f32 %v4022_v32, %v4008_v47  ;;  %v4501_v47 = vadd.f32 %v652_v1, %v497_v57  ;;  %v668_v11 = vmul.f32 %v4022_v32, %v6191_v63  ;;  %v6193_v57 = vld [vmem:[#allocation37_spill] sm:$0xff] }
 0x1f4   : > { %6187 = vst [vmem:[#allocation113_spill] sm:$0xff] %v4455_v46  ;;  %v677_v56 = vadd.f32 %v647_v14, %v492_v12  ;;  %v680_v61 = vadd.f32 %v650_v18, %v495_v29  ;;  %v672_v14 = vmul.f32 %v4022_v32, %v6193_v57  ;;  %v6194_v18 = vld [vmem:[#allocation85_spill] sm:$0xff]  ;;  %v1045_v63 = vmul.f32 %v4229_v52, %v4286_v50 }
 0x1f5   : > { %v1036_v1 = vmul.f32 %v4229_v52, %v6194_v18  ;;  %v698_v18 = vadd.f32 %v668_v11, %v513_v0  ;;  %v3420_v11 = vld [vmem:[%s3732_s10 + $0xc0] sm:$0xff] }
 0x1f6   : > { %1693 = vperm.xlu1 %3419, %v3791_v15   ;;  %1721 = vperm.xlu0 %3418, %v3826_v24   ;;  %v499_v15 = vmul.f32 %v4017_v49, %v3914_v42  ;;  %v501_v24 = vmul.f32 %v4017_v49, %v3920_v44  ;;  %v666_v42 = vmul.f32 %v4022_v32, %v4054_v33 }
 0x1f7   : > { %v4471_v36 = vpop.permute.xlu1 %1319  ;;  %v4473_v17 = vpop.permute.xlu0 %1355  ;;  %v520_v44 = vmul.f32 %v4017_v49, %v3971_v62  ;;  %v851_v33 = vmul.f32 %v4138_v43, %v6190_v58 }
 0x1f8   : > { %6188 = vst [vmem:[#allocation114_spill] sm:$0xff] %v4473_v17  ;;  %v4507_v5 = vadd.f32 %v654_v40, %v499_v15  ;;  %v4514_v12 = vadd.f32 %v656_v59, %v501_v24  ;;  %v696_v29 = vadd.f32 %v666_v42, %v511_v38  ;;  %v6195_v15 = vld [vmem:[#allocation41_spill] sm:$0xff]  ;;  %v6196_v24 = vld [vmem:[#allocation28_spill] sm:$0xff]  ;;  %v6197_v42 = vld [vmem:[#allocation59_spill] sm:$0xff] }
 0x1f9   : > { %v705_v58 = vadd.f32 %v675_v37, %v520_v44  ;;  %v832_v40 = vmul.f32 %v4138_v43, %v6195_v15  ;;  %v4530_v38 = vmul.f32 %v4022_v32, %v6196_v24  ;;  %v6198_v44 = vld [vmem:[#allocation105_spill] sm:$0xff]  ;;  %v702_v15 = vadd.f32 %v672_v14, %v517_v55  ;;  %v6199_v24 = vld [vmem:[#allocation38_spill] sm:$0xff]  ;;  %v6204_v14 = vld [vmem:[#allocation88_spill] sm:$0xff] }
 0x1fa   : > { %1705 = vperm.xlu1 %3419, %v3810_v20   ;;  %1745 = vperm.xlu0 %3418, %v3850_v30   ;;  %v860_v20 = vmul.f32 %v4138_v43, %v6192_v48  ;;  %v881_v59 = vadd.f32 %v851_v33, %v696_v29  ;;  %v1221_v37 = vmul.f32 %v4359_v13, %v6198_v44  ;;  %v6200_v29 = vld [vmem:[#allocation67_spill] sm:$0xff]  ;;  %v6201_v44 = vld [vmem:[#allocation86_spill] sm:$0xff] }
 0x1fb   : > { %v4505_v23 = vpop.permute.xlu1 %1327  ;;  %v1364_v62 = vpop.permute.xlu0 %1363  ;;  %v674_v33 = vmul.f32 %v4022_v32, %v6199_v24  ;;  %v862_v22 = vadd.f32 %v832_v40, %v677_v56  ;;  %v1038_v17 = vmul.f32 %v4229_v52, %v6201_v44  ;;  %v6205_v40 = vld [vmem:[#allocation107_spill] sm:$0xff] }
 0x1fc   : > { %v1411_v30 = vmul.f32 %v4422_v4, %v1364_v62  ;;  %v853_v62 = vmul.f32 %v4138_v43, %v6197_v42  ;;  %v1017_v42 = vmul.f32 %v4229_v52, %v6200_v29  ;;  %v1066_v46 = vadd.f32 %v1036_v1, %v881_v59 }
 0x1fd   : > { %v1223_v59 = vmul.f32 %v4359_v13, %v6205_v40  ;;  %v6212_v40 = vld [vmem:[#allocation73_spill] sm:$0xff] }
 0x1fe   : > { %v4525_v48 = vadd.f32 %v1411_v30, %v4388_v3  ;;  %1717 = vperm.xlu1 %3419, %v3815_v21   ;;  %v890_v3 = vadd.f32 %v860_v20, %v705_v58  ;;  %v1230_v21 = vmul.f32 %v4359_v13, %v4399_v7  ;;  %v6203_v7 = vld [vmem:[#allocation43_spill] sm:$0xff]  ;;  %v883_v20 = vadd.f32 %v853_v62, %v698_v18 }
 0x1ff   : > { %v4536_v57 = vpop.permute.xlu1 %1335  ;;  %v1372_v50 = vpop.permute.xlu0 %1371  ;;  %v835_v55 = vmul.f32 %v4138_v43, %v6203_v7  ;;  %v1202_v58 = vmul.f32 %v4359_v13, %v6204_v14  ;;  %v1047_v29 = vadd.f32 %v1017_v42, %v862_v22  ;;  %v6207_v62 = vld [vmem:[#allocation71_spill] sm:$0xff]  ;;  %v4575_v22 = vld [vmem:[%s6033_s1 + $0x6] ss:$0 sm:$0xff]  ;;  %v704_v42 = vadd.f32 %v674_v33, %v4495_v54 }
 0x200   : > { %v1413_v30 = vmul.f32 %v4422_v4, %v1372_v50  ;;  %v1075_v41 = vadd.f32 %v1045_v63, %v890_v3  ;;  %v1251_v50 = vadd.f32 %v1221_v37, %v1066_v46  ;;  %v1020_v18 = vmul.f32 %v4229_v52, %v6207_v62  ;;  %v6208_v37 = vld [vmem:[#allocation47_spill] sm:$0xff] }
 0x201   : > { %v1387_v46 = vmul.f32 %v4422_v4, %v4406_v9  ;;  %v839_v44 = vmul.f32 %v4138_v43, %v6208_v37  ;;  %v865_v14 = vadd.f32 %v835_v55, %v680_v61  ;;  %v6210_v9 = vld [vmem:[#allocation90_spill] sm:$0xff]  ;;  %v1390_v54 = vmul.f32 %v4422_v4, %v4424_v16 }
 0x202   : > { %v4548_v0 = vadd.f32 %v1413_v30, %v4396_v25  ;;  %1729 = vperm.xlu1 %3419, %v3420_v11   ;;  %v1260_v63 = vadd.f32 %v1230_v21, %v1075_v41  ;;  %v6206_v30 = vld [vmem:[#allocation45_spill] sm:$0xff]  ;;  %v1068_v11 = vadd.f32 %v1038_v17, %v883_v20  ;;  %v3421_v21 = vld [vmem:[%s3732_s10 + $0xd8] sm:$0xff]  ;;  %v6211_v20 = vld [vmem:[#allocation62_spill] sm:$0xff] }
 0x203   : > { %v1344_v1 = vpop.permute.xlu1 %1343  ;;  %v1380_v56 = vpop.permute.xlu0 %1379  ;;  %v837_v24 = vmul.f32 %v4138_v43, %v6206_v30  ;;  %v1050_v62 = vadd.f32 %v1020_v18, %v865_v14  ;;  %v869_v55 = vadd.f32 %v839_v44, %v4507_v5  ;;  %v6215_v14 = vld [vmem:[#allocation92_spill] sm:$0xff]  ;;  %v1227_v44 = vmul.f32 %v4359_v13, %v4368_v39 }
 0x204   : > { %6202 = vst [vmem:[#allocation39_spill] sm:$0xff] %v4548_v0  ;;  %v1406_v25 = vmul.f32 %v4422_v4, %v1344_v1  ;;  %v1415_v3 = vmul.f32 %v4422_v4, %v1380_v56  ;;  %v1232_v1 = vadd.f32 %v1202_v58, %v1047_v29  ;;  %v1205_v56 = vmul.f32 %v4359_v13, %v6210_v9  ;;  %v6213_v58 = vld [vmem:[#allocation87_spill] sm:$0xff] }
 0x205   : > { %v867_v33 = vadd.f32 %v837_v24, %v4501_v47  ;;  %v1042_v29 = vmul.f32 %v4229_v52, %v6213_v58  ;;  %v1207_v16 = vmul.f32 %v4359_v13, %v6215_v14  ;;  %v1229_v14 = vmul.f32 %v4359_v13, %v4374_v26  ;;  %v6222_v26 = vld [vmem:[#allocation51_spill] sm:$0xff] }
 0x206   : > { %v4567_v7 = vadd.f32 %v1406_v25, %v1251_v50  ;;  %v4569_v41 = vadd.f32 %v1415_v3, %v1260_v63  ;;  %1741 = vperm.xlu1 %3419, %v3421_v21   ;;  %v857_v50 = vmul.f32 %v4138_v43, %v6211_v20  ;;  %v1022_v63 = vmul.f32 %v4229_v52, %v6212_v40  ;;  %v6216_v20 = vld [vmem:[#allocation75_spill] sm:$0xff] }
 0x207   : > { %v1352_v17 = vpop.permute.xlu1 %1351  ;;  %v1253_v25 = vadd.f32 %v1223_v59, %v1068_v11  ;;  %v1417_v37 = vadd.f32 %v1387_v46, %v1232_v1  ;;  %v3422_v59 = vld [vmem:[%s3732_s10 + $0x68] sm:$0xff]  ;;  %v6214_v11 = vld [vmem:[#allocation63_spill] sm:$0xff]  ;;  %v1235_v46 = vadd.f32 %v1205_v56, %v1050_v62  ;;  %v1024_v40 = vmul.f32 %v4229_v52, %v6216_v20 }
 0x208   : > { %6209 = vst [vmem:[#allocation58_spill] sm:$0xff] %v4569_v41  ;;  %v1408_v3 = vmul.f32 %v4422_v4, %v1352_v17  ;;  %v1453_v30 = vpop.permute.xlu0 %1452  ;;  %v859_v18 = vmul.f32 %v4138_v43, %v6214_v11  ;;  %v887_v24 = vadd.f32 %v857_v50, %v702_v15  ;;  %v1052_v5 = vadd.f32 %v1022_v63, %v867_v33  ;;  %v6218_v50 = vld [vmem:[#allocation89_spill] sm:$0xff]  ;;  %v6220_v11 = vld [vmem:[#allocation76_spill] sm:$0xff] }
 0x209   : > { %v1572_v61 = vmul.f32 %v4575_v22, %v1453_v30  ;;  %v1392_v56 = vmul.f32 %v4422_v4, %v4432_v6  ;;  %v6217_v30 = vld [vmem:[#allocation49_spill] sm:$0xff]  ;;  %v1044_v63 = vmul.f32 %v4229_v52, %v6218_v50 }
 0x20a   : > { %v4592_v21 = vadd.f32 %v1408_v3, %v1253_v25  ;;  %1685 = vperm.xlu1 %3419, %v3422_v59   ;;  %v1420_v25 = vadd.f32 %v1390_v54, %v1235_v46  ;;  %v841_v62 = vmul.f32 %v4138_v43, %v6217_v30  ;;  %v1072_v15 = vadd.f32 %v1042_v29, %v887_v24  ;;  %v6219_v54 = vld [vmem:[#allocation94_spill] sm:$0xff] }
 0x20b   : > { %v4599_v1 = vadd.f32 %v1572_v61, %v1417_v37  ;;  %v1360_v47 = vpop.permute.xlu1 %1359  ;;  %v3423_v37 = vld [vmem:[%s3732_s10 + $0x98] sm:$0xff]  ;;  %v889_v61 = vadd.f32 %v859_v18, %v704_v42  ;;  %v1237_v33 = vadd.f32 %v1207_v16, %v1052_v5  ;;  %v1209_v58 = vmul.f32 %v4359_v13, %v6219_v54  ;;  %v6221_v5 = vld [vmem:[#allocation13_spill] sm:$0xff] }
 0x20c   : > { %v1410_v9 = vmul.f32 %v4422_v4, %v1360_v47  ;;  %v1465_v17 = vpop.permute.xlu0 %1464  ;;  %v1026_v29 = vmul.f32 %v4229_v52, %v6220_v11  ;;  %v1257_v46 = vadd.f32 %v1227_v44, %v1072_v15  ;;  %v1054_v24 = vadd.f32 %v1024_v40, %v869_v55 }
 0x20d   : > { %v1575_v3 = vmul.f32 %v4575_v22, %v1465_v17  ;;  %v1422_v42 = vadd.f32 %v1392_v56, %v1237_v33  ;;  %v1394_v18 = vmul.f32 %v4422_v4, %v4438_v53  ;;  %v871_v17 = vadd.f32 %v841_v62, %v4514_v12  ;;  %v6223_v56 = vld [vmem:[#allocation96_spill] sm:$0xff] }
 0x20e   : > { %v4614_v39 = vadd.f32 %v1410_v9, %v4364_v35  ;;  %1709 = vperm.xlu1 %3419, %v3423_v37   ;;  %v503_v9 = vmul.f32 %v4017_v49, %v6221_v5  ;;  %v1074_v20 = vadd.f32 %v1044_v63, %v889_v61  ;;  %v843_v55 = vmul.f32 %v4138_v43, %v6222_v26  ;;  %v6224_v37 = vld [vmem:[#allocation78_spill] sm:$0xff] }
 0x20f   : > { %v4619_v6 = vadd.f32 %v1575_v3, %v1420_v25  ;;  %v1368_v59 = vpop.permute.xlu1 %1367  ;;  %v3424_v25 = vld [vmem:[%s3732_s10 + $0xc8] sm:$0xff]  ;;  %v1239_v40 = vadd.f32 %v1209_v58, %v1054_v24  ;;  %v1211_v53 = vmul.f32 %v4359_v13, %v6223_v56  ;;  %v1056_v12 = vadd.f32 %v1026_v29, %v871_v17  ;;  %s6040_s10 = sand.u32 1, %s3575_s25  }
 0x210   : > { %v1412_v35 = vmul.f32 %v4422_v4, %v1368_v59  ;;  %v1473_v47 = vpop.permute.xlu0 %1472  ;;  %v688_v15 = vadd.f32 %v4530_v38, %v503_v9  ;;  %v1259_v62 = vadd.f32 %v1229_v14, %v1074_v20  ;;  %v1028_v61 = vmul.f32 %v4229_v52, %v6224_v37  ;;  %v6226_v38 = vld [vmem:[#allocation98_spill] sm:$0xff]  ;;  %s4657_s21 = sshll.u32 %s6040_s10, 7  ;;  %v6228_v9 = vld [vmem:[#allocation17_spill] sm:$0xff] }
 0x211   : > { %v1577_v16 = vmul.f32 %v4575_v22, %v1473_v47  ;;  %v1424_v33 = vadd.f32 %v1394_v18, %v1239_v40  ;;  %v1396_v54 = vmul.f32 %v4422_v4, %v4445_v8  ;;  %v1213_v29 = vmul.f32 %v4359_v13, %v6226_v38  ;;  %v6229_v20 = vld [vmem:[#allocation54_spill] sm:$0xff]  ;;  %s5073_s22 = scalar_lea.vmem [#allocation3], %s4657_s21 }
 0x212   : > { %v4632_v44 = vadd.f32 %v1412_v35, %v1257_v46  ;;  %1733 = vperm.xlu1 %3419, %v3424_v25   ;;  %v873_v11 = vadd.f32 %v843_v55, %v688_v15  ;;  %v1241_v46 = vadd.f32 %v1211_v53, %v1056_v12  ;;  %v6227_v35 = vld [vmem:[#allocation31_spill] sm:$0xff]  ;;  %v507_v17 = vmul.f32 %v4017_v49, %v6228_v9  ;;  %v6232_v12 = vld [vmem:[#allocation81_spill] sm:$0xff] }
 0x213   : > { %v4639_v3 = vadd.f32 %v1577_v16, %v1422_v42  ;;  %v1376_v30 = vpop.permute.xlu1 %1375  ;;  %v662_v47 = vmul.f32 %v4022_v32, %v6227_v35  ;;  %v1398_v16 = vmul.f32 %v4422_v4, %v4453_v28  ;;  %v847_v25 = vmul.f32 %v4138_v43, %v6229_v20 }
 0x214   : > { %v1414_v50 = vmul.f32 %v4422_v4, %v1376_v30  ;;  %v1481_v63 = vpop.permute.xlu0 %1480  ;;  %v1058_v42 = vadd.f32 %v1028_v61, %v873_v11  ;;  %v1426_v18 = vadd.f32 %v1396_v54, %v1241_v46  ;;  %v6231_v30 = vld [vmem:[#allocation33_spill] sm:$0xff]  ;;  %v1032_v28 = vmul.f32 %v4229_v52, %v6232_v12 }
 0x215   : > { %v1579_v58 = vmul.f32 %v4575_v22, %v1481_v63  ;;  %v692_v40 = vadd.f32 %v662_v47, %v507_v17  ;;  %v664_v15 = vmul.f32 %v4022_v32, %v6231_v30  ;;  %v6233_v63 = vld [vmem:[#allocation18_spill] sm:$0xff]  ;;  %v6237_v47 = vld [vmem:[#allocation83_spill] sm:$0xff] }
 0x216   : > { %v4648_v59 = vadd.f32 %v1414_v50, %v1259_v62  ;;  %v1243_v26 = vadd.f32 %v1213_v29, %v1058_v42  ;;  %v509_v37 = vmul.f32 %v4017_v49, %v6233_v63  ;;  %v1402_v49 = vmul.f32 %v4422_v4, %v4505_v23 }
 0x217   : > { %v4653_v14 = vadd.f32 %v1579_v58, %v1424_v33  ;;  %v877_v61 = vadd.f32 %v847_v25, %v692_v40  ;;  %v6234_v33 = vld [vmem:[#allocation56_spill] sm:$0xff]  ;;  %v6235_v58 = vld [vmem:[#allocation102_spill] sm:$0xff] }
 0x218   : > { %6225 = vst [vmem:[#allocation35_spill] sm:$0xff] %v4648_v59  ;;  %v4661_v24 = vpop.permute.xlu1 %1448  ;;  %v1489_v8 = vpop.permute.xlu0 %1488  ;;  %v1428_v62 = vadd.f32 %v1398_v16, %v1243_v26  ;;  %v849_v54 = vmul.f32 %v4138_v43, %v6234_v33  ;;  %v1217_v11 = vmul.f32 %v4359_v13, %v6235_v58  ;;  %v694_v29 = vadd.f32 %v664_v15, %v509_v37  ;;  %v6238_v16 = vld [vmem:[#allocation104_spill] sm:$0xff]  ;;  %v6242_v58 = vld [vmem:[#allocation21_spill] sm:$0xff]  ;;  %v6263_v59 = vld [vmem:[#allocation15_spill] sm:$0xff] }
 0x219   : > { %v1581_v5 = vmul.f32 %v4575_v22, %v1489_v8  ;;  %v1062_v35 = vadd.f32 %v1032_v28, %v877_v61  ;;  %v1034_v8 = vmul.f32 %v4229_v52, %v6237_v47  ;;  %v1404_v26 = vmul.f32 %v4422_v4, %v4536_v57 }
 0x21a   : > { %v879_v42 = vadd.f32 %v849_v54, %v694_v29  ;;  %v4722_v54 = vld [vmem:[%s6033_s1 + $0x1] ss:$0 sm:$0xff] }
 0x21b   : > { %v4670_v55 = vadd.f32 %v1581_v5, %v1426_v18  ;;  %v1247_v18 = vadd.f32 %v1217_v11, %v1062_v35  ;;  %v1219_v5 = vmul.f32 %v4359_v13, %v6238_v16  ;;  %v646_v11 = vmul.f32 %v4722_v54, %v6242_v58  ;;  %v6252_v58 = vld [vmem:[#allocation9_spill] sm:$0xff] }
 0x21c   : > { %v4672_v56 = vpop.permute.xlu1 %1456  ;;  %v1497_v53 = vpop.permute.xlu0 %1496  ;;  %v1064_v20 = vadd.f32 %v1034_v8, %v879_v42 }
 0x21d   : > { %6230 = vst [vmem:[#allocation65_spill] sm:$0xff] %v4670_v55  ;;  %v1583_v50 = vmul.f32 %v4575_v22, %v1497_v53  ;;  %v1432_v25 = vadd.f32 %v1402_v49, %v1247_v18  ;;  %v4731_v49 = vld [vmem:[%s6033_s1] ss:$0 sm:$0xff] }
 0x21e   : > { %v1249_v53 = vadd.f32 %v1219_v5, %v1064_v20  ;;  %v6244_v18 = vld [vmem:[#allocation40_spill] sm:$0xff] }
 0x21f   : > { %v4685_v46 = vadd.f32 %v1583_v50, %v1428_v62  ;;  %v831_v16 = vmul.f32 %v4138_v43, %v6244_v18  ;;  %v6256_v18 = vld [vmem:[#allocation91_spill] sm:$0xff] }
 0x220   : > { %v4687_v38 = vpop.permute.xlu1 %1460  ;;  %v4689_v32 = vpop.permute.xlu0 %1504  ;;  %v1434_v12 = vadd.f32 %v1404_v26, %v1249_v53 }
 0x221   : > { %6236 = vst [vmem:[#allocation37_spill] sm:$0xff] %v4685_v46 }
 0x224   : > { %v4697_v9 = vpop.permute.xlu1 %1468  ;;  %v1513_v17 = vpop.permute.xlu0 %1512 }
 0x225   : > { %v1587_v40 = vmul.f32 %v4575_v22, %v1513_v17 }
 0x227   : > { %v4702_v30 = vadd.f32 %v1587_v40, %v1432_v25  ;;  %v6247_v25 = vld [vmem:[#allocation23_spill] sm:$0xff]  ;;  %v6248_v40 = vld [vmem:[#allocation64_spill] sm:$0xff] }
 0x228   : > { %v4704_v15 = vpop.permute.xlu1 %1476  ;;  %v1521_v23 = vpop.permute.xlu0 %1520  ;;  %v649_v26 = vmul.f32 %v4722_v54, %v6247_v25  ;;  %v1016_v53 = vmul.f32 %v4229_v52, %v6248_v40  ;;  %v1201_v25 = vmul.f32 %v4359_v13, %v6256_v18  ;;  %v6257_v40 = vld [vmem:[#allocation12_spill] sm:$0xff]  ;;  %v1386_v18 = vmul.f32 %v4422_v4, %v4380_v19 }
 0x229   : > { %6239 = vst [vmem:[#allocation85_spill] sm:$0xff] %v4702_v30  ;;  %v1589_v28 = vmul.f32 %v4575_v22, %v1521_v23 }
 0x22b   : > { %v4707_v62 = vadd.f32 %v1589_v28, %v1434_v12  ;;  %v6250_v28 = vld [vmem:[#allocation6_spill] sm:$0xff] }
 0x22c   : > { %v4709_v50 = vpop.permute.xlu1 %1484  ;;  %v4711_v63 = vpop.permute.xlu0 %1528 }
 0x22d   : > { %6240 = vst [vmem:[#allocation41_spill] sm:$0xff] %v4707_v62 }
 0x230   : > { %v4713_v37 = vpop.permute.xlu1 %1492  ;;  %v1537_v57 = vpop.permute.xlu0 %1536 }
 0x231   : > { %v1593_v61 = vmul.f32 %v4575_v22, %v1537_v57  ;;  %v493_v57 = vmul.f32 %v4731_v49, %v6250_v28  ;;  %v502_v28 = vmul.f32 %v4731_v49, %v6257_v40 }
 0x233   : > { %v4717_v33 = vadd.f32 %v1593_v61, %v4592_v21  ;;  %v6243_v21 = vld [vmem:[#allocation7_spill] sm:$0xff]  ;;  %v6251_v61 = vld [vmem:[#allocation8_spill] sm:$0xff] }
 0x234   : > { %v1501_v29 = vpop.permute.xlu1 %1500  ;;  %v1545_v35 = vpop.permute.xlu0 %1544  ;;  %v491_v42 = vmul.f32 %v4731_v49, %v6243_v21  ;;  %v6255_v21 = vld [vmem:[#allocation44_spill] sm:$0xff] }
 0x235   : > { %6241 = vst [vmem:[#allocation28_spill] sm:$0xff] %v4717_v33  ;;  %v1584_v47 = vmul.f32 %v4575_v22, %v1501_v29  ;;  %v1595_v8 = vmul.f32 %v4575_v22, %v1545_v35  ;;  %v6254_v35 = vld [vmem:[#allocation11_spill] sm:$0xff] }
 0x236   : > { %v676_v20 = vadd.f32 %v646_v11, %v491_v42  ;;  %v6253_v11 = vld [vmem:[#allocation10_spill] sm:$0xff]  ;;  %v834_v42 = vmul.f32 %v4138_v43, %v6255_v21 }
 0x237   : > { %v4738_v5 = vadd.f32 %v1584_v47, %v4428_v2  ;;  %v4741_v17 = vadd.f32 %v1595_v8, %v4614_v39  ;;  %v494_v2 = vmul.f32 %v4731_v49, %v6251_v61  ;;  %v496_v39 = vmul.f32 %v4731_v49, %v6252_v58  ;;  %v6258_v61 = vld [vmem:[#allocation22_spill] sm:$0xff]  ;;  %v6259_v58 = vld [vmem:[#allocation24_spill] sm:$0xff] }
 0x238   : > { %v4747_v23 = vpop.permute.xlu1 %1508  ;;  %v4749_v12 = vpop.permute.xlu0 %1552  ;;  %v498_v29 = vmul.f32 %v4731_v49, %v6253_v11  ;;  %v500_v47 = vmul.f32 %v4731_v49, %v6254_v35  ;;  %v861_v8 = vadd.f32 %v831_v16, %v676_v20  ;;  %v651_v0 = vmul.f32 %v4722_v54, %v6259_v58  ;;  %v6260_v11 = vld [vmem:[#allocation25_spill] sm:$0xff]  ;;  %v6261_v20 = vld [vmem:[#allocation66_spill] sm:$0xff]  ;;  %v6264_v58 = vld [vmem:[#allocation16_spill] sm:$0xff] }
 0x239   : > { %6245 = vst [vmem:[#allocation59_spill] sm:$0xff] %v4738_v5  ;;  %6246 = vst [vmem:[#allocation105_spill] sm:$0xff] %v4741_v17  ;;  %v648_v5 = vmul.f32 %v4722_v54, %v6258_v61  ;;  %v653_v17 = vmul.f32 %v4722_v54, %v6260_v11  ;;  %v679_v35 = vadd.f32 %v649_v26, %v494_v2  ;;  %v6265_v26 = vld [vmem:[#allocation20_spill] sm:$0xff]  ;;  %v6266_v2 = vld [vmem:[#allocation46_spill] sm:$0xff] }
 0x23a   : > { %6249 = vst [vmem:[#allocation38_spill] sm:$0xff] %v4747_v23  ;;  %v1046_v16 = vadd.f32 %v1016_v53, %v861_v8  ;;  %v1019_v21 = vmul.f32 %v4229_v52, %v6261_v20  ;;  %v4783_v61 = vmul.f32 %v4731_v49, %v6263_v59  ;;  %v4787_v33 = vmul.f32 %v4731_v49, %v6264_v58  ;;  %v6267_v20 = vld [vmem:[#allocation95_spill] sm:$0xff]  ;;  %v6268_v23 = vld [vmem:[#allocation68_spill] sm:$0xff] }
 0x23b   : > { %v4791_v53 = vmul.f32 %v4731_v49, %v6265_v26  ;;  %v836_v8 = vmul.f32 %v4138_v43, %v6266_v2  ;;  %v864_v19 = vadd.f32 %v834_v42, %v679_v35  ;;  %v1571_v59 = vmul.f32 %v4575_v22, %v4661_v24  ;;  %v4806_v26 = vld [vmem:[%s6033_s1 + $0x7] ss:$0 sm:$0xff] }
 0x23c   : > { %v4777_v62 = vpop.permute.xlu1 %1516  ;;  %v4779_v40 = vpop.permute.xlu0 %1560  ;;  %v1231_v11 = vadd.f32 %v1201_v25, %v1046_v16  ;;  %v4799_v30 = vadd.f32 %v648_v5, %v493_v57  ;;  %v681_v46 = vadd.f32 %v651_v0, %v496_v39  ;;  %v683_v58 = vadd.f32 %v653_v17, %v498_v29  ;;  %v6269_v42 = vld [vmem:[#allocation48_spill] sm:$0xff]  ;;  %v6270_v57 = vld [vmem:[#allocation26_spill] sm:$0xff]  ;;  %v6271_v39 = vld [vmem:[#allocation97_spill] sm:$0xff] }
 0x23d   : > { %6262 = vst [vmem:[#allocation67_spill] sm:$0xff] %v4779_v40  ;;  %v1204_v40 = vmul.f32 %v4359_v13, %v6267_v20  ;;  %v1021_v55 = vmul.f32 %v4229_v52, %v6268_v23  ;;  %v838_v25 = vmul.f32 %v4138_v43, %v6269_v42  ;;  %v1049_v35 = vadd.f32 %v1019_v21, %v864_v19 }
 0x23e   : > { %v1416_v16 = vadd.f32 %v1386_v18, %v1231_v11  ;;  %v1389_v24 = vmul.f32 %v4422_v4, %v4385_v51  ;;  %v655_v0 = vmul.f32 %v4722_v54, %v6270_v57  ;;  %v866_v17 = vadd.f32 %v836_v8, %v681_v46  ;;  %v6272_v18 = vld [vmem:[#allocation27_spill] sm:$0xff]  ;;  %v6273_v11 = vld [vmem:[#allocation70_spill] sm:$0xff] }
 0x23f   : > { %v1206_v23 = vmul.f32 %v4359_v13, %v6271_v39  ;;  %v1234_v20 = vadd.f32 %v1204_v40, %v1049_v35  ;;  %v1574_v43 = vmul.f32 %v4575_v22, %v4687_v38  ;;  %v657_v51 = vmul.f32 %v4722_v54, %v6272_v18  ;;  %v4830_v40 = vld [vmem:[%s6034_s2] ss:$0 sm:$0xff] }
 0x240   : > { %v1525_v5 = vpop.permute.xlu1 %1524  ;;  %v1601_v41 = vadd.f32 %v1571_v59, %v1416_v16  ;;  %v1051_v19 = vadd.f32 %v1021_v55, %v866_v17  ;;  %v1023_v46 = vmul.f32 %v4229_v52, %v6273_v11  ;;  %v868_v59 = vadd.f32 %v838_v25, %v683_v58  ;;  %v4839_v55 = vld [vmem:[%s6033_s1 + $0x2] ss:$0 sm:$0xff]  ;;  %v6275_v17 = vld [vmem:[#allocation99_spill] sm:$0xff] }
 0x241   : > { %v1590_v29 = vmul.f32 %v4575_v22, %v1525_v5  ;;  %v1634_v2 = vpop.permute.xlu0 %1633  ;;  %v1419_v42 = vadd.f32 %v1389_v24, %v1234_v20  ;;  %v1391_v38 = vmul.f32 %v4422_v4, %v4393_v60  ;;  %v1208_v39 = vmul.f32 %v4359_v13, %v6275_v17  ;;  %v6277_v18 = vld [vmem:[#allocation72_spill] sm:$0xff]  ;;  %v6279_v17 = vld [vmem:[#allocation101_spill] sm:$0xff] }
 0x242   : > { %v1756_v21 = vmul.f32 %v4806_v26, %v1634_v2  ;;  %v1236_v57 = vadd.f32 %v1206_v23, %v1051_v19  ;;  %v1576_v60 = vmul.f32 %v4575_v22, %v4697_v9  ;;  %v6276_v2 = vld [vmem:[#allocation29_spill] sm:$0xff]  ;;  %v1025_v23 = vmul.f32 %v4229_v52, %v6277_v18 }
 0x243   : > { %v4825_v8 = vadd.f32 %v1590_v29, %v4449_v10  ;;  %v6274_v10 = vld [vmem:[#allocation50_spill] sm:$0xff]  ;;  %v1604_v25 = vadd.f32 %v1574_v43, %v1419_v42  ;;  %v685_v29 = vadd.f32 %v655_v0, %v500_v47  ;;  %v660_v20 = vmul.f32 %v4722_v54, %v6276_v2 }
 0x244   : > { %v1786_v35 = vadd.f32 %v1756_v21, %v1601_v41  ;;  %v4834_v16 = vpop.permute.xlu1 %1532  ;;  %v840_v5 = vmul.f32 %v4839_v55, %v6274_v10  ;;  %v1053_v21 = vadd.f32 %v1023_v46, %v868_v59  ;;  %v687_v19 = vadd.f32 %v657_v51, %v502_v28  ;;  %v6278_v10 = vld [vmem:[#allocation52_spill] sm:$0xff] }
 0x245   : > { %v1646_v58 = vpop.permute.xlu0 %1645  ;;  %v1421_v11 = vadd.f32 %v1391_v38, %v1236_v57  ;;  %v1393_v43 = vmul.f32 %v4422_v4, %v4402_v34  ;;  %v842_v47 = vmul.f32 %v4839_v55, %v6278_v10  ;;  %v1210_v46 = vmul.f32 %v4359_v13, %v6279_v17 }
 0x246   : > { %v1823_v41 = vadd.f32 %v4830_v40, %v1786_v35  ;;  %v1759_v24 = vmul.f32 %v4806_v26, %v1646_v58  ;;  %v870_v35 = vadd.f32 %v840_v5, %v685_v29  ;;  %v1238_v0 = vadd.f32 %v1208_v39, %v1053_v21  ;;  %v6280_v58 = vld [vmem:[#allocation32_spill] sm:$0xff]  ;;  %v6282_v29 = vld [vmem:[#allocation53_spill] sm:$0xff] }
 0x247   : > { %v3609_v59 = vmov 0.0   ;;  %v1606_v51 = vadd.f32 %v1576_v60, %v1421_v11  ;;  %v1578_v34 = vmul.f32 %v4575_v22, %v4704_v15  ;;  %v690_v5 = vadd.f32 %v660_v20, %v4783_v61  ;;  %v6283_v61 = vld [vmem:[#allocation103_spill] sm:$0xff] }
 0x248   : > { %1853 = vst [vmem:[#allocation2] sm:$0xff] %v1823_v41  ;;  %v1789_v42 = vadd.f32 %v1759_v24, %v1604_v25  ;;  %v4855_v9 = vpop.permute.xlu1 %1540  ;;  %v663_v39 = vmul.f32 %v4722_v54, %v6280_v58  ;;  %v1055_v25 = vadd.f32 %v1025_v23, %v870_v35  ;;  %v6281_v41 = vld [vmem:[#allocation74_spill] sm:$0xff]  ;;  %v845_v2 = vmul.f32 %v4839_v55, %v6282_v29 }
 0x249   : > { %1883 = vst [vmem:[#allocation2] sm:$0x1] %v3609_v59  ;;  %v1654_v28 = vpop.permute.xlu0 %1653  ;;  %v1027_v24 = vmul.f32 %v4229_v52, %v6281_v41  ;;  %v1423_v60 = vadd.f32 %v1393_v43, %v1238_v0  ;;  %v1395_v15 = vmul.f32 %v4422_v4, %v4408_v27  ;;  %v872_v11 = vadd.f32 %v842_v47, %v687_v19  ;;  %v6284_v47 = vld [vmem:[#allocation80_spill] sm:$0xff] }
 0x24a   : > { %v1826_v38 = vadd.f32 %v4830_v40, %v1789_v42  ;;  %v1761_v57 = vmul.f32 %v4806_v26, %v1654_v28  ;;  %v1240_v42 = vadd.f32 %v1210_v46, %v1055_v25  ;;  %v1212_v20 = vmul.f32 %v4359_v13, %v6283_v61  ;;  %v6287_v41 = vld [vmem:[#allocation100_spill] sm:$0xff] }
 0x24b   : > { %v1608_v10 = vadd.f32 %v1578_v34, %v1423_v60  ;;  %v1580_v43 = vmul.f32 %v4575_v22, %v4709_v50  ;;  %v693_v17 = vadd.f32 %v663_v39, %v4787_v33  ;;  %v1057_v19 = vadd.f32 %v1027_v24, %v872_v11  ;;  %v6286_v33 = vld [vmem:[#allocation57_spill] sm:$0xff] }
 0x24c   : > { %1856 = vst [vmem:[#allocation2 + $0x18] sm:$0xff] %v1826_v38  ;;  %v1791_v21 = vadd.f32 %v1761_v57, %v1606_v51  ;;  %v1549_v18 = vpop.permute.xlu1 %1548  ;;  %v1030_v46 = vmul.f32 %v4229_v52, %v6284_v47  ;;  %v6285_v51 = vld [vmem:[#allocation42_spill] sm:$0xff]  ;;  %v1425_v34 = vadd.f32 %v1395_v15, %v1240_v42  ;;  %v1397_v50 = vmul.f32 %v4422_v4, %v4414_v45  ;;  %v6290_v42 = vld [vmem:[#allocation79_spill] sm:$0xff] }
 0x24d   : > { %1884 = vst [vmem:[#allocation2 + $0x18] sm:$0x1] %v3609_v59  ;;  %v1596_v23 = vmul.f32 %v4575_v22, %v1549_v18  ;;  %v1662_v35 = vpop.permute.xlu0 %1661  ;;  %v833_v38 = vmul.f32 %v4839_v55, %v6285_v51  ;;  %v875_v25 = vadd.f32 %v845_v2, %v690_v5  ;;  %v848_v39 = vmul.f32 %v4839_v55, %v6286_v33  ;;  %v4909_v2 = vld [vmem:[%s6033_s1 + $0x3] ss:$0 sm:$0xff]  ;;  %v6289_v18 = vld [vmem:[#allocation69_spill] sm:$0xff] }
 0x24e   : > { %v1828_v0 = vadd.f32 %v4830_v40, %v1791_v21  ;;  %v1763_v27 = vmul.f32 %v4806_v26, %v1662_v35  ;;  %v1215_v52 = vmul.f32 %v4359_v13, %v6287_v41  ;;  %v1610_v29 = vadd.f32 %v1580_v43, %v1425_v34  ;;  %v6288_v21 = vld [vmem:[#allocation36_spill] sm:$0xff] }
 0x24f   : > { %v4887_v28 = vadd.f32 %v1596_v23, %v4525_v48  ;;  %v1242_v48 = vadd.f32 %v1212_v20, %v1057_v19  ;;  %v1582_v60 = vmul.f32 %v4575_v22, %v4713_v37  ;;  %v669_v5 = vmul.f32 %v4722_v54, %v6288_v21  ;;  %v6292_v51 = vld [vmem:[#allocation108_spill] sm:$0xff] }
 0x250   : > { %1858 = vst [vmem:[#allocation2 + $0x28] sm:$0xff] %v1828_v0  ;;  %v1793_v57 = vadd.f32 %v1763_v27, %v1608_v10  ;;  %v4893_v58 = vpop.permute.xlu1 %1556  ;;  %v1018_v11 = vmul.f32 %v4909_v2, %v6289_v18  ;;  %v1033_v61 = vmul.f32 %v4909_v2, %v6290_v42  ;;  %v1060_v20 = vadd.f32 %v1030_v46, %v875_v25  ;;  %v6291_v27 = vld [vmem:[#allocation93_spill] sm:$0xff]  ;;  %v6293_v33 = vld [vmem:[#allocation112_spill] sm:$0xff] }
 0x251   : > { %1894 = vst [vmem:[#allocation2 + $0x29] sm:$0x1] %v3609_v59  ;;  %v1670_v24 = vpop.permute.xlu0 %1669  ;;  %v863_v37 = vadd.f32 %v833_v38, %v4799_v30  ;;  %v1427_v23 = vadd.f32 %v1397_v50, %v1242_v48  ;;  %v1400_v35 = vmul.f32 %v4422_v4, %v4471_v36  ;;  %v878_v0 = vadd.f32 %v848_v39, %v693_v17  ;;  %v6295_v42 = vld [vmem:[#allocation84_spill] sm:$0xff] }
 0x252   : > { %v1830_v45 = vadd.f32 %v4830_v40, %v1793_v57  ;;  %v1765_v15 = vmul.f32 %v4806_v26, %v1670_v24  ;;  %v1203_v19 = vmul.f32 %v4359_v13, %v6291_v27  ;;  %v1245_v47 = vadd.f32 %v1215_v52, %v1060_v20  ;;  %v6294_v52 = vld [vmem:[#allocation61_spill] sm:$0xff] }
 0x253   : > { %v1218_v34 = vmul.f32 %v4359_v13, %v6292_v51  ;;  %v1585_v30 = vmul.f32 %v4575_v22, %v4689_v32  ;;  %v1612_v46 = vadd.f32 %v1582_v60, %v1427_v23  ;;  %v1048_v50 = vadd.f32 %v1018_v11, %v863_v37 }
 0x254   : > { %1860 = vst [vmem:[#allocation2 + $0x38] sm:$0xff] %v1830_v45  ;;  %v1795_v10 = vadd.f32 %v1765_v15, %v1610_v29  ;;  %v4918_v43 = vpop.permute.xlu1 %1564  ;;  %v1063_v25 = vadd.f32 %v1033_v61, %v878_v0  ;;  %v1388_v17 = vmul.f32 %v4422_v4, %v4412_v31  ;;  %v1403_v39 = vmul.f32 %v4422_v4, %v6293_v33 }
 0x255   : > { %v1678_v57 = vpop.permute.xlu0 %1677  ;;  %v699_v41 = vadd.f32 %v669_v5, %v4791_v53  ;;  %v854_v48 = vmul.f32 %v4839_v55, %v6294_v52  ;;  %v1430_v24 = vadd.f32 %v1400_v35, %v1245_v47  ;;  %v1233_v29 = vadd.f32 %v1203_v19, %v1048_v50  ;;  %v6296_v35 = vld [vmem:[#allocation110_spill] sm:$0xff] }
 0x256   : > { %v1832_v38 = vadd.f32 %v4830_v40, %v1795_v10  ;;  %v1767_v36 = vmul.f32 %v4806_v26, %v1678_v57  ;;  %v1248_v60 = vadd.f32 %v1218_v34, %v1063_v25  ;;  %v1573_v45 = vmul.f32 %v4575_v22, %v4672_v56 }
 0x257   : > { %v1588_v15 = vmul.f32 %v4575_v22, %v4777_v62  ;;  %v1615_v18 = vadd.f32 %v1585_v30, %v1430_v24  ;;  %v1039_v61 = vmul.f32 %v4909_v2, %v6295_v42  ;;  %v1418_v20 = vadd.f32 %v1388_v17, %v1233_v29  ;;  %v6299_v42 = vld [vmem:[#allocation14_spill] sm:$0xff] }
 0x258   : > { %1862 = vst [vmem:[#allocation2 + $0x48] sm:$0xff] %v1832_v38  ;;  %v1797_v32 = vadd.f32 %v1767_v36, %v1612_v46  ;;  %v1433_v37 = vadd.f32 %v1403_v39, %v1248_v60  ;;  %v884_v56 = vadd.f32 %v854_v48, %v699_v41  ;;  %v1224_v10 = vmul.f32 %v4359_v13, %v6296_v35  ;;  %v6297_v38 = vld [vmem:[#allocation114_spill] sm:$0xff] }
 0x259   : > { %1886 = vst [vmem:[#allocation2 + $0x48] sm:$0x1] %v3609_v59  ;;  %v1638_v31 = vpop.permute.xlu1 %1637  ;;  %v1690_v21 = vpop.permute.xlu0 %1689  ;;  %v1603_v0 = vadd.f32 %v1573_v45, %v1418_v20  ;;  %v1591_v27 = vmul.f32 %v4575_v22, %v4711_v63  ;;  %v1409_v13 = vmul.f32 %v4422_v4, %v6297_v38  ;;  %v1594_v17 = vmul.f32 %v4575_v22, %v4855_v9  ;;  %v6300_v20 = vld [vmem:[#allocation55_spill] sm:$0xff] }
 0x25a   : > { %v1834_v53 = vadd.f32 %v4830_v40, %v1797_v32  ;;  %v1757_v5 = vmul.f32 %v4806_v26, %v1638_v31  ;;  %v1770_v11 = vmul.f32 %v4806_v26, %v1690_v21  ;;  %v1618_v19 = vadd.f32 %v1588_v15, %v1433_v37 }
 0x25b   : > { %v1069_v46 = vadd.f32 %v1039_v61, %v884_v56  ;;  %v1621_v25 = vadd.f32 %v1591_v27, %v4567_v7  ;;  %v1597_v9 = vmul.f32 %v4575_v22, %v4749_v12  ;;  %v506_v61 = vmul.f32 %v4731_v49, %v6299_v42 }
 0x25c   : > { %1864 = vst [vmem:[#allocation2 + $0x58] sm:$0xff] %v1834_v53  ;;  %v1787_v62 = vadd.f32 %v1757_v5, %v4599_v1  ;;  %v1800_v23 = vadd.f32 %v1770_v11, %v1615_v18  ;;  %v846_v37 = vmul.f32 %v4839_v55, %v6300_v20 }
 0x25d   : > { %1896 = vst [vmem:[#allocation2 + $0x59] sm:$0x1] %v3609_v59  ;;  %v1642_v47 = vpop.permute.xlu1 %1641  ;;  %v1702_v51 = vpop.permute.xlu0 %1701  ;;  %v1254_v50 = vadd.f32 %v1224_v10, %v1069_v46  ;;  %v1627_v56 = vadd.f32 %v1597_v9, %v4632_v44  ;;  %v6303_v46 = vld [vmem:[#allocation58_spill] sm:$0xff]  ;;  %v6308_v9 = vld [vmem:[#allocation60_spill] sm:$0xff] }
 0x25e   : > { %v1824_v34 = vadd.f32 %v4830_v40, %v1787_v62  ;;  %v1837_v57 = vadd.f32 %v4830_v40, %v1800_v23  ;;  %v1758_v30 = vmul.f32 %v4806_v26, %v1642_v47  ;;  %v1773_v1 = vmul.f32 %v4806_v26, %v1702_v51  ;;  %v6301_v47 = vld [vmem:[#allocation77_spill] sm:$0xff] }
 0x25f   : > { %v1439_v32 = vadd.f32 %v1409_v13, %v1254_v50  ;;  %v1600_v62 = vmul.f32 %v4575_v22, %v4918_v43  ;;  %v1031_v51 = vmul.f32 %v4909_v2, %v6301_v47 }
 0x260   : > { %1854 = vst [vmem:[#allocation2 + $0x8] sm:$0xff] %v1824_v34  ;;  %1867 = vst [vmem:[#allocation2 + $0x70] sm:$0xff] %v1837_v57  ;;  %v1788_v63 = vadd.f32 %v1758_v30, %v1603_v0  ;;  %v1803_v36 = vadd.f32 %v1773_v1, %v1618_v19  ;;  %v3429_v57 = vld [vmem:[%s6033_s1 + $0x4] ss:$0 sm:$0xff]  ;;  %v6302_v30 = vld [vmem:[#allocation106_spill] sm:$0xff] }
 0x261   : > { %1897 = vst [vmem:[#allocation2 + $0x71] sm:$0x1] %v3609_v59  ;;  %v1650_v33 = vpop.permute.xlu1 %1649  ;;  %v1714_v39 = vpop.permute.xlu0 %1713  ;;  %v1624_v60 = vadd.f32 %v1594_v17, %v1439_v32  ;;  %v1216_v1 = vmul.f32 %v3429_v57, %v6302_v30  ;;  %v1630_v38 = vadd.f32 %v1600_v62, %v6303_v46  ;;  %v6304_v17 = vld [vmem:[#allocation34_spill] sm:$0xff]  ;;  %v6316_v30 = vld [vmem:[#allocation28_spill] sm:$0xff] }
 0x262   : > { %v1825_v41 = vadd.f32 %v4830_v40, %v1788_v63  ;;  %v1840_v52 = vadd.f32 %v4830_v40, %v1803_v36  ;;  %v1760_v48 = vmul.f32 %v4806_v26, %v1650_v33  ;;  %v1776_v24 = vmul.f32 %v4806_v26, %v1714_v39 }
 0x263   : > { %v667_v33 = vmul.f32 %v4722_v54, %v6304_v17 }
 0x264   : > { %1855 = vst [vmem:[#allocation2 + $0x10] sm:$0xff] %v1825_v41  ;;  %1870 = vst [vmem:[#allocation2 + $0x88] sm:$0xff] %v1840_v52  ;;  %v1790_v7 = vadd.f32 %v1760_v48, %v4619_v6  ;;  %v1806_v29 = vadd.f32 %v1776_v24, %v1621_v25  ;;  %v6298_v6 = vld [vmem:[#allocation30_spill] sm:$0xff]  ;;  %v6305_v41 = vld [vmem:[#allocation111_spill] sm:$0xff] }
 0x265   : > { %1893 = vst [vmem:[#allocation2 + $0x11] sm:$0x1] %v3609_v59  ;;  %1898 = vst [vmem:[#allocation2 + $0x89] sm:$0x1] %v3609_v59  ;;  %v1658_v45 = vpop.permute.xlu1 %1657  ;;  %v1726_v15 = vpop.permute.xlu0 %1725  ;;  %v661_v5 = vmul.f32 %v4722_v54, %v6298_v6  ;;  %v1401_v52 = vmul.f32 %v4422_v4, %v6305_v41  ;;  %v6306_v48 = vld [vmem:[#allocation65_spill] sm:$0xff] }
 0x266   : > { %v1827_v31 = vadd.f32 %v4830_v40, %v1790_v7  ;;  %v1843_v21 = vadd.f32 %v4830_v40, %v1806_v29  ;;  %v1762_v18 = vmul.f32 %v4806_v26, %v1658_v45  ;;  %v1779_v53 = vmul.f32 %v4806_v26, %v1726_v15  ;;  %v6307_v7 = vld [vmem:[#allocation19_spill] sm:$0xff]  ;;  %v6309_v15 = vld [vmem:[#allocation38_spill] sm:$0xff]  ;;  %v6318_v41 = vld [vmem:[#allocation41_spill] sm:$0xff] }
 0x267   : > { %v691_v19 = vadd.f32 %v661_v5, %v506_v61  ;;  %v512_v29 = vmul.f32 %v4731_v49, %v6307_v7  ;;  %v6312_v61 = vld [vmem:[#allocation85_spill] sm:$0xff] }
 0x268   : > { %1857 = vst [vmem:[#allocation2 + $0x20] sm:$0xff] %v1827_v31  ;;  %1873 = vst [vmem:[#allocation2 + $0xa0] sm:$0xff] %v1843_v21  ;;  %v1792_v12 = vadd.f32 %v1762_v18, %v4639_v3  ;;  %v1809_v11 = vadd.f32 %v1779_v53, %v1624_v60  ;;  %v852_v60 = vmul.f32 %v4839_v55, %v6308_v9  ;;  %v6310_v55 = vld [vmem:[#allocation82_spill] sm:$0xff] }
 0x269   : > { %1899 = vst [vmem:[#allocation2 + $0xa1] sm:$0x1] %v3609_v59  ;;  %v1666_v23 = vpop.permute.xlu1 %1665  ;;  %v1738_v35 = vpop.permute.xlu0 %1737  ;;  %v876_v34 = vadd.f32 %v846_v37, %v691_v19  ;;  %v1586_v31 = vmul.f32 %v4575_v22, %v6309_v15  ;;  %v697_v6 = vadd.f32 %v667_v33, %v512_v29  ;;  %v1037_v5 = vmul.f32 %v4909_v2, %v6310_v55 }
 0x26a   : > { %v1829_v10 = vadd.f32 %v4830_v40, %v1792_v12  ;;  %v1846_v3 = vadd.f32 %v4830_v40, %v1809_v11  ;;  %v1764_v0 = vmul.f32 %v4806_v26, %v1666_v23  ;;  %v1782_v27 = vmul.f32 %v4806_v26, %v1738_v35  ;;  %v6311_v11 = vld [vmem:[#allocation37_spill] sm:$0xff]  ;;  %v6314_v35 = vld [vmem:[#allocation67_spill] sm:$0xff] }
 0x26b   : > { %v1061_v39 = vadd.f32 %v1031_v51, %v876_v34  ;;  %v882_v37 = vadd.f32 %v852_v60, %v697_v6 }
 0x26c   : > { %1859 = vst [vmem:[#allocation2 + $0x30] sm:$0xff] %v1829_v10  ;;  %1876 = vst [vmem:[#allocation2 + $0xb8] sm:$0xff] %v1846_v3  ;;  %v1794_v44 = vadd.f32 %v1764_v0, %v4653_v14  ;;  %v1812_v43 = vadd.f32 %v1782_v27, %v1627_v56  ;;  %v6313_v56 = vld [vmem:[#allocation109_spill] sm:$0xff]  ;;  %v1599_v10 = vmul.f32 %v4575_v22, %v6314_v35 }
 0x26d   : > { %1885 = vst [vmem:[#allocation2 + $0x30] sm:$0x1] %v3609_v59  ;;  %1900 = vst [vmem:[#allocation2 + $0xb9] sm:$0x1] %v3609_v59  ;;  %v1674_v13 = vpop.permute.xlu1 %1673  ;;  %v1750_v63 = vpop.permute.xlu0 %1749  ;;  %v1246_v45 = vadd.f32 %v1216_v1, %v1061_v39  ;;  %v1222_v62 = vmul.f32 %v3429_v57, %v6313_v56  ;;  %v1067_v51 = vadd.f32 %v1037_v5, %v882_v37 }
 0x26e   : > { %v1831_v36 = vadd.f32 %v4830_v40, %v1794_v44  ;;  %v1849_v14 = vadd.f32 %v4830_v40, %v1812_v43  ;;  %v1766_v50 = vmul.f32 %v4806_v26, %v1674_v13  ;;  %v1785_v25 = vmul.f32 %v4806_v26, %v1750_v63  ;;  %v3430_v44 = vld [vmem:[%s6033_s1 + $0x5] ss:$0 sm:$0xff]  ;;  %v6315_v43 = vld [vmem:[#allocation113_spill] sm:$0xff] }
 0x26f   : > { %v1431_v12 = vadd.f32 %v1401_v52, %v1246_v45  ;;  %v1407_v34 = vmul.f32 %v3430_v44, %v6315_v43  ;;  %v1252_v46 = vadd.f32 %v1222_v62, %v1067_v51  ;;  %v1592_v63 = vmul.f32 %v4575_v22, %v4834_v16 }
 0x270   : > { %1861 = vst [vmem:[#allocation2 + $0x40] sm:$0xff] %v1831_v36  ;;  %1879 = vst [vmem:[#allocation2 + $0xd0] sm:$0xff] %v1849_v14  ;;  %v1796_v24 = vadd.f32 %v1766_v50, %v6306_v48  ;;  %v1815_v32 = vadd.f32 %v1785_v25, %v1630_v38  ;;  %v6317_v38 = vld [vmem:[#allocation35_spill] sm:$0xff]  ;;  %v1598_v45 = vmul.f32 %v4575_v22, %v4893_v58 }
 0x271   : > { %1895 = vst [vmem:[#allocation2 + $0x41] sm:$0x1] %v3609_v59  ;;  %1901 = vst [vmem:[#allocation2 + $0xd1] sm:$0x1] %v3609_v59  ;;  %v1682_v4 = vpop.permute.xlu1 %1681  ;;  %v1698_v54 = vpop.permute.xlu0 %1697  ;;  %v1616_v23 = vadd.f32 %v1586_v31, %v1431_v12  ;;  %v1629_v13 = vadd.f32 %v1599_v10, %v6317_v38  ;;  %v1437_v39 = vadd.f32 %v1407_v34, %v1252_v46  ;;  %v6321_v12 = vld [vmem:[#allocation59_spill] sm:$0xff] }
 0x272   : > { %v1833_v21 = vadd.f32 %v4830_v40, %v1796_v24  ;;  %v1852_v18 = vadd.f32 %v4830_v40, %v1815_v32  ;;  %v1768_v53 = vmul.f32 %v4806_v26, %v1682_v4  ;;  %v1772_v49 = vmul.f32 %v4806_v26, %v1698_v54  ;;  %v6319_v4 = vld [vmem:[#allocation105_spill] sm:$0xff] }
 0x273   : > { %v1622_v24 = vadd.f32 %v1592_v63, %v1437_v39 }
 0x274   : > { %1863 = vst [vmem:[#allocation2 + $0x50] sm:$0xff] %v1833_v21  ;;  %1882 = vst [vmem:[#allocation2 + $0xe8] sm:$0xff] %v1852_v18  ;;  %v1798_v42 = vadd.f32 %v1768_v53, %v6311_v11  ;;  %v1802_v20 = vadd.f32 %v1772_v49, %v6312_v61  ;;  %v6320_v18 = vld [vmem:[#allocation39_spill] sm:$0xff] }
 0x275   : > { %1902 = vst [vmem:[#allocation2 + $0xe9] sm:$0x1] %v3609_v59  ;;  %v1694_v3 = vpop.permute.xlu1 %1693  ;;  %v1722_v0 = vpop.permute.xlu0 %1721  ;;  %v1628_v53 = vadd.f32 %v1598_v45, %v6320_v18 }
 0x276   : > { %v1835_v2 = vadd.f32 %v4830_v40, %v1798_v42  ;;  %v1839_v27 = vadd.f32 %v4830_v40, %v1802_v20  ;;  %v1771_v19 = vmul.f32 %v4806_v26, %v1694_v3  ;;  %v1778_v47 = vmul.f32 %v4806_v26, %v1722_v0 }
 0x278   : > { %1865 = vst [vmem:[#allocation2 + $0x60] sm:$0xff] %v1835_v2  ;;  %1869 = vst [vmem:[#allocation2 + $0x80] sm:$0xff] %v1839_v27  ;;  %v1801_v57 = vadd.f32 %v1771_v19, %v1616_v23  ;;  %v1808_v1 = vadd.f32 %v1778_v47, %v6316_v30 }
 0x279   : > { %1887 = vst [vmem:[#allocation2 + $0x60] sm:$0x1] %v3609_v59  ;;  %v1706_v36 = vpop.permute.xlu1 %1705  ;;  %v1746_v14 = vpop.permute.xlu0 %1745 }
 0x27a   : > { %v1838_v50 = vadd.f32 %v4830_v40, %v1801_v57  ;;  %v1845_v25 = vadd.f32 %v4830_v40, %v1808_v1  ;;  %v1774_v17 = vmul.f32 %v4806_v26, %v1706_v36  ;;  %v1784_v33 = vmul.f32 %v4806_v26, %v1746_v14 }
 0x27c   : > { %1868 = vst [vmem:[#allocation2 + $0x78] sm:$0xff] %v1838_v50  ;;  %1875 = vst [vmem:[#allocation2 + $0xb0] sm:$0xff] %v1845_v25  ;;  %v1804_v52 = vadd.f32 %v1774_v17, %v6318_v41  ;;  %v1814_v48 = vadd.f32 %v1784_v33, %v1629_v13 }
 0x27d   : > { %1888 = vst [vmem:[#allocation2 + $0x78] sm:$0x1] %v3609_v59  ;;  %v1718_v16 = vpop.permute.xlu1 %1717 }
 0x27e   : > { %v1841_v32 = vadd.f32 %v4830_v40, %v1804_v52  ;;  %v1851_v7 = vadd.f32 %v4830_v40, %v1814_v48  ;;  %v1777_v29 = vmul.f32 %v4806_v26, %v1718_v16 }
 0x280   : > { %1871 = vst [vmem:[#allocation2 + $0x90] sm:$0xff] %v1841_v32  ;;  %1881 = vst [vmem:[#allocation2 + $0xe0] sm:$0xff] %v1851_v7  ;;  %v1807_v9 = vadd.f32 %v1777_v29, %v1622_v24 }
 0x281   : > { %1889 = vst [vmem:[#allocation2 + $0x90] sm:$0x1] %v3609_v59  ;;  %v1730_v60 = vpop.permute.xlu1 %1729 }
 0x282   : > { %v1844_v15 = vadd.f32 %v4830_v40, %v1807_v9  ;;  %v1780_v31 = vmul.f32 %v4806_v26, %v1730_v60 }
 0x284   : > { %1874 = vst [vmem:[#allocation2 + $0xa8] sm:$0xff] %v1844_v15  ;;  %v1810_v54 = vadd.f32 %v1780_v31, %v6319_v4 }
 0x285   : > { %1890 = vst [vmem:[#allocation2 + $0xa8] sm:$0x1] %v3609_v59  ;;  %v1742_v21 = vpop.permute.xlu1 %1741 }
 0x286   : > { %v1847_v49 = vadd.f32 %v4830_v40, %v1810_v54  ;;  %v1783_v6 = vmul.f32 %v4806_v26, %v1742_v21 }
 0x288   : > { %1877 = vst [vmem:[#allocation2 + $0xc0] sm:$0xff] %v1847_v49  ;;  %v1813_v55 = vadd.f32 %v1783_v6, %v1628_v53 }
 0x289   : > { %1891 = vst [vmem:[#allocation2 + $0xc0] sm:$0x1] %v3609_v59  ;;  %v1686_v22 = vpop.permute.xlu1 %1685 }
 0x28a   : > { %v1850_v58 = vadd.f32 %v4830_v40, %v1813_v55  ;;  %v1769_v5 = vmul.f32 %v4806_v26, %v1686_v22 }
 0x28c   : > { %1880 = vst [vmem:[#allocation2 + $0xd8] sm:$0xff] %v1850_v58  ;;  %v1799_v11 = vadd.f32 %v1769_v5, %v6321_v12 }
 0x28d   : > { %1892 = vst [vmem:[#allocation2 + $0xd8] sm:$0x1] %v3609_v59  ;;  %v1710_v42 = vpop.permute.xlu1 %1709  ;;  %v3610_v59 = vmov (!%p3163_p13), 0.0  }
 0x28e   : > { %v1836_v61 = vadd.f32 %v4830_v40, %v1799_v11  ;;  %v1775_v20 = vmul.f32 %v4806_v26, %v1710_v42  ;;  %1907 = vst [vmem:[#allocation2] sm:$0xff] (!%p3163_p13), %v3610_v59  ;;  %1908 = vst [vmem:[#allocation2 + $0x8] sm:$0xff] (!%p3163_p13), %v3610_v59 }
 0x28f   : > { %1909 = vst [vmem:[#allocation2 + $0x10] sm:$0xff] (!%p3163_p13), %v3610_v59 }
 0x290   : > { %1866 = vst [vmem:[#allocation2 + $0x68] sm:$0xff] %v1836_v61  ;;  %v1805_v37 = vadd.f32 %v1775_v20, %v4825_v8 }
 0x291   : > { %v1734_v56 = vpop.permute.xlu1 %1733 }
 0x292   : > { %v1842_v62 = vadd.f32 %v4830_v40, %v1805_v37  ;;  %v1781_v23 = vmul.f32 %v4806_v26, %v1734_v56  ;;  %1906 = sbr.rel (%p3163_p13) target bundleno = 665 (0x299), region = 52 }
 0x294   : > { %1872 = vst [vmem:[#allocation2 + $0x98] sm:$0xff] %v1842_v62  ;;  %v1811_v35 = vadd.f32 %v1781_v23, %v4887_v28 }
 0x296   : > { %v1848_v10 = vadd.f32 %v4830_v40, %v1811_v35 }
 0x298   : > { %1878 = vst [vmem:[#allocation2 + $0xc8] sm:$0xff] %v1848_v10 }
 0x299 PF: > { %p3164_p0 = scmp.ne.s32.totalorder %s3583_s27, 1 }
 0x29a   : > { %v3611_v26 = vmov (!%p3164_p0), 0.0  }
 0x29b   : > { %1913 = sbr.rel (%p3164_p0) target bundleno = 674 (0x2a2), region = 56  ;;  %1915 = vst [vmem:[#allocation2 + $0xd8] sm:$0xff] (!%p3164_p0), %v3611_v26  ;;  %1916 = vst [vmem:[#allocation2 + $0xe0] sm:$0xff] (!%p3164_p0), %v3611_v26 }
 0x29c   : > { %1917 = vst [vmem:[#allocation2 + $0xe8] sm:$0xff] (!%p3164_p0), %v3611_v26 }
 0x2a2 PF: > { %v2868_v8 = vld [vmem:[%s6037_s5] sm:$0xff]  ;;  %v2869_v40 = vld [vmem:[%s6037_s5 + $0x8] sm:$0xff]  ;;  %v2870_v28 = vld [vmem:[%s6037_s5 + $0x10] sm:$0xff]  ;;  %s3177_s16 = sshll.u32 %s3583_s27, 4  ;;  %s3178_s17 = sshll.u32 %s3587_s28, 5 }
 0x2a3   : > { %v3270_v3 = vpack.c.bf16 %v2869_v40, %v2868_v8  ;;  %v2871_v0 = vld [vmem:[%s6037_s5 + $0x18] sm:$0xff]  ;;  %v2872_v27 = vld [vmem:[%s6037_s5 + $0x20] sm:$0xff]  ;;  %v2873_v19 = vld [vmem:[%s6037_s5 + $0x28] sm:$0xff]  ;;  %s3065_s18 = sadd.s32 %s3178_s17, %s3177_s16  ;;  %s3068_s0 = sshll.u32 %s5073_s22, 4  ;;  %s5974_s0 = int_to_ptr.vmem [resolvable:$true] %s3068_s0 }
 0x2a4   : > { %v3274_v2 = vpack.c.bf16 %v2871_v0, %v2870_v28  ;;  %v2874_v47 = vld [vmem:[%s6037_s5 + $0x30] sm:$0xff]  ;;  %v2875_v51 = vld [vmem:[%s6037_s5 + $0x38] sm:$0xff]  ;;  %v2876_v44 = vld [vmem:[%s6037_s5 + $0x40] sm:$0xff]  ;;  %v3278_v30 = vpack.c.bf16 %v2873_v19, %v2872_v27  ;;  %s3179_s20 = sshll.u32 %s3065_s18, 7  ;;  %s6371_s27 = sand.u32 1, %s3575_s25  }
 0x2a5   : > { %3271 = vmatprep.subr.bf16.mxu0 %v3270_v3  ;;  %3302 = vmatprep.subr.bf16.mxu1 %v3270_v3  ;;  %v2877_v43 = vld [vmem:[%s6037_s5 + $0x48] sm:$0xff]  ;;  %v2878_v34 = vld [vmem:[%s6037_s5 + $0x50] sm:$0xff]  ;;  %v2879_v57 = vld [vmem:[%s6037_s5 + $0x58] sm:$0xff]  ;;  %v3282_v48 = vpack.c.bf16 %v2875_v51, %v2874_v47  ;;  %s5972_s9 = scalar_lea.hbm %s6039_s7, %s3179_s20  ;;  %s5980_s28 = scalar_lea.sflag [#allocation4], %s6371_s27 }
 0x2a6   : > { %3273 = vmatpush3.bf16.msra.mxu0 %v3270_v3  ;;  %3310 = vmatpush3.bf16.msra.mxu1 %v3270_v3  ;;  %v2880_v1 = vld [vmem:[%s6037_s5 + $0x60] sm:$0xff]  ;;  %v2881_v46 = vld [vmem:[%s6037_s5 + $0x68] sm:$0xff]  ;;  %v2882_v38 = vld [vmem:[%s6037_s5 + $0x70] sm:$0xff]  ;;  %v5147_v16 = vpack.c.bf16 %v2877_v43, %v2876_v44  ;;  %v5155_v9 = vpack.c.bf16 %v2879_v57, %v2878_v34  ;;  %s3505_s21 = scalar_lea.vmem %s5974_s0, 2048  ;;  %s3613_s13 = smov [#allocation3]  }
 0x2a7   : > { %3275 = vmatprep.subr.bf16.mxu0 %v3274_v2  ;;  %3303 = vmatprep.subr.bf16.mxu1 %v3274_v2  ;;  %v2883_v13 = vld [vmem:[%s6037_s5 + $0x78] sm:$0xff]  ;;  %v1918_v63 = vld [vmem:[#allocation2] sm:$0xff]  ;;  %v5163_v31 = vld [vmem:[#allocation2 + $0x30] sm:$0xff]  ;;  %v5170_v54 = vpack.c.bf16 %v2881_v46, %v2880_v1  ;;  %p3506_p1 = scmp.ne.s32.totalorder %s5974_s0, %s3505_s21  ;;  %s3509_s16 = sshll.u32 %s3613_s13, 4  ;;  %s3510_s16 = int_to_ptr.vmem [resolvable:$false] %s3509_s16 }
 0x2a8   : > { %v5128_v36 = vld [vmem:[%s6035_s3] ss:$0 sm:$0xff]  ;;  %v1955_v50 = vld [vmem:[#allocation2 + $0x1] sm:$0xff]  ;;  %v2062_v41 = vld [vmem:[#allocation2 + $0x18] sm:$0xff]  ;;  %v5172_v21 = vpack.c.bf16 %v2883_v13, %v2882_v38  ;;  %s3511_s17 = scalar_lea.vmem %s3510_s16, 4096  ;;  %p3512_p5 = scmp.lt.s32.totalorder %s5974_s0, %s3510_s16 }
 0x2a9   : > { %v1939_v14 = vmul.f32 %v5128_v36, %v1918_v63  ;;  %v5134_v25 = vld [vmem:[%s6035_s3 + $0x1] ss:$0 sm:$0xff]  ;;  %v2008_v17 = vld [vmem:[#allocation2 + $0x2] sm:$0xff]  ;;  %v2115_v32 = vld [vmem:[#allocation2 + $0x19] sm:$0xff]  ;;  %v1941_v18 = vmul.f32 %v5128_v36, %v2062_v41  ;;  %p3507_p2 = pnand %p3506_p1, %p3707_p3  ;;  %p3513_p6 = scmp.lt.s32.totalorder %s3511_s17, %s3505_s21 }
 0x2aa   : > { %v1976_v33 = vmul.f32 %v5134_v25, %v1955_v50  ;;  %v5140_v39 = vld [vmem:[%s6035_s3 + $0x2] ss:$0 sm:$0xff]  ;;  %v5145_v52 = vld [vmem:[%s6035_s3 + $0x3] ss:$0 sm:$0xff]  ;;  %3277 = vmatpush3.bf16.msra.mxu0 %v3274_v2  ;;  %3311 = vmatpush3.bf16.msra.mxu1 %v3274_v2  ;;  %v5153_v7 = vld [vmem:[%s6035_s3 + $0x4] ss:$0 sm:$0xff]  ;;  %v1978_v53 = vmul.f32 %v5134_v25, %v2115_v32 }
 0x2ab   : > { %v2029_v24 = vmul.f32 %v5140_v39, %v2008_v17  ;;  %v2168_v29 = vld [vmem:[#allocation2 + $0x1a] sm:$0xff]  ;;  %3279 = vmatprep.subr.bf16.mxu0 %v3278_v30  ;;  %3304 = vmatprep.subr.bf16.mxu1 %v3278_v30  ;;  %v2083_v45 = vmul.f32 %v5145_v52, %v2062_v41  ;;  %v5161_v15 = vld [vmem:[%s6035_s3 + $0x5] ss:$0 sm:$0xff]  ;;  %v5168_v4 = vld [vmem:[%s6035_s3 + $0x6] ss:$0 sm:$0xff]  ;;  %v2136_v6 = vmul.f32 %v5153_v7, %v2115_v32  ;;  %p3508_p4 = pneg %p3507_p2  ;;  %p3514_p7 = por %p3513_p6, %p3512_p5 }
 0x2ac   : > { %v1992_v60 = vadd.f32 %v1976_v33, %v1939_v14  ;;  %v2189_v55 = vmul.f32 %v5161_v15, %v2168_v29  ;;  %v2243_v22 = vmul.f32 %v5168_v4, %v5163_v31  ;;  %v5183_v58 = vld [vmem:[%s6035_s3 + $0x7] ss:$0 sm:$0xff]  ;;  %v5188_v5 = vld [vmem:[%s6035_s3 + $0x8] ss:$0 sm:$0xff]  ;;  %v5198_v20 = vld [vmem:[#allocation2 + $0x78] sm:$0xff]  ;;  %v5201_v37 = vmul.f32 %v5140_v39, %v2168_v29 }
 0x2ad   : > { %v5190_v12 = vld [vmem:[#allocation2 + $0x60] sm:$0xff]  ;;  %v5205_v56 = vmul.f32 %v5145_v52, %v5163_v31  ;;  %v5207_v23 = vld [vmem:[#allocation2 + $0x31] sm:$0xff]  ;;  %v1919_v40 = vld [vmem:[#allocation2 + $0x8] sm:$0xff]  ;;  %v5219_v28 = vadd.f32 %v1978_v53, %v1941_v18  ;;  %v2091_v27 = vmul.f32 %v5145_v52, %v5198_v20  ;;  %p3515_p9 = pnand %p3514_p7, %p3508_p4 }
 0x2ae   : > { %v2045_v49 = vadd.f32 %v2029_v24, %v1992_v60  ;;  %6322 = vst [vmem:[#allocation86_spill] sm:$0xff] %v5190_v12  ;;  %3281 = vmatpush3.bf16.msra.mxu0 %v3278_v30  ;;  %3312 = vmatpush3.bf16.msra.mxu1 %v3278_v30  ;;  %v1947_v11 = vmul.f32 %v5128_v36, %v5190_v12  ;;  %v5194_v42 = vld [vmem:[#allocation2 + $0x61] sm:$0xff]  ;;  %v5209_v35 = vld [vmem:[#allocation2 + $0x32] sm:$0xff]  ;;  %v1956_v19 = vld [vmem:[#allocation2 + $0x9] sm:$0xff] }
 0x2af   : > { %6323 = vst [vmem:[#allocation43_spill] sm:$0xff] %v5194_v42  ;;  %v5196_v61 = vld [vmem:[#allocation2 + $0x62] sm:$0xff]  ;;  %3283 = vmatprep.subr.bf16.mxu0 %v3282_v48  ;;  %3305 = vmatprep.subr.bf16.mxu1 %v3282_v48  ;;  %6325 = vst [vmem:[#allocation107_spill] sm:$0xff] %v5209_v35  ;;  %v1984_v10 = vmul.f32 %v5134_v25, %v5194_v42  ;;  %v2296_v26 = vmul.f32 %v5183_v58, %v5207_v23  ;;  %v2009_v47 = vld [vmem:[#allocation2 + $0xa] sm:$0xff] }
 0x2b0   : > { %6324 = vst [vmem:[#allocation88_spill] sm:$0xff] %v5196_v61  ;;  %v2099_v62 = vadd.f32 %v2083_v45, %v2045_v49  ;;  %v2037_v59 = vmul.f32 %v5140_v39, %v5196_v61  ;;  %v2349_v8 = vmul.f32 %v5188_v5, %v5209_v35  ;;  %v5223_v3 = vmul.f32 %v5153_v7, %v5207_v23  ;;  %v5227_v51 = vld [vmem:[#allocation2 + $0x20] sm:$0xff]  ;;  %v5244_v63 = vld [vmem:[#allocation2 + $0x90] sm:$0xff]  ;;  %v5248_v50 = vld [vmem:[#allocation2 + $0x68] sm:$0xff] }
 0x2b1   : > { %v2000_v2 = vadd.f32 %v1984_v10, %v1947_v11  ;;  %v5231_v44 = vmul.f32 %v5161_v15, %v5209_v35  ;;  %v5233_v43 = vld [vmem:[#allocation2 + $0x79] sm:$0xff]  ;;  %v1940_v57 = vmul.f32 %v5128_v36, %v1919_v40  ;;  %v1977_v30 = vmul.f32 %v5134_v25, %v1956_v19  ;;  %6326 = vst [vmem:[#allocation45_spill] sm:$0xff] %v5244_v63  ;;  %v5246_v14 = vld [vmem:[#allocation2 + $0x91] sm:$0xff]  ;;  %v5256_v24 = vld [vmem:[#allocation2 + $0x21] sm:$0xff] }
 0x2b2   : > { %v2152_v0 = vadd.f32 %v2136_v6, %v2099_v62  ;;  %3285 = vmatpush3.bf16.msra.mxu0 %v3282_v48  ;;  %3313 = vmatpush3.bf16.msra.mxu1 %v3282_v48  ;;  %v5235_v34 = vld [vmem:[#allocation2 + $0x7a] sm:$0xff]  ;;  %v2030_v1 = vmul.f32 %v5140_v39, %v2009_v47  ;;  %v2144_v13 = vmul.f32 %v5153_v7, %v5233_v43  ;;  %v5258_v32 = vld [vmem:[#allocation2 + $0x69] sm:$0xff]  ;;  %v5285_v40 = vld [vmem:[#allocation2 + $0x92] sm:$0xff] }
 0x2b3   : > { %3287 = vmatprep.subr.bf16.mxu0 %v5147_v16  ;;  %3306 = vmatprep.subr.bf16.mxu1 %v5147_v16  ;;  %v2053_v38 = vadd.f32 %v2037_v59, %v2000_v2  ;;  %6327 = vst [vmem:[#allocation71_spill] sm:$0xff] %v5246_v14  ;;  %6328 = vst [vmem:[#allocation47_spill] sm:$0xff] %v5248_v50  ;;  %v2197_v17 = vmul.f32 %v5161_v15, %v5235_v34  ;;  %v5260_v29 = vld [vmem:[#allocation2 + $0x6a] sm:$0xff]  ;;  %v5266_v49 = vld [vmem:[#allocation2 + $0x80] sm:$0xff] }
 0x2b4   : > { %v2205_v46 = vadd.f32 %v2189_v55, %v2152_v0  ;;  %v2251_v33 = vmul.f32 %v5168_v4, %v5244_v63  ;;  %v1993_v41 = vadd.f32 %v1977_v30, %v1940_v57  ;;  %v2084_v48 = vmul.f32 %v5145_v52, %v5227_v51  ;;  %6329 = vst [vmem:[#allocation90_spill] sm:$0xff] %v5258_v32  ;;  %v5276_v10 = vld [vmem:[#allocation2 + $0x22] sm:$0xff] }
 0x2b5   : > { %6330 = vst [vmem:[#allocation62_spill] sm:$0xff] %v5260_v29  ;;  %v2107_v45 = vadd.f32 %v2091_v27, %v2053_v38  ;;  %v2304_v18 = vmul.f32 %v5183_v58, %v5246_v14  ;;  %v2137_v53 = vmul.f32 %v5153_v7, %v5256_v24  ;;  %v1948_v55 = vmul.f32 %v5128_v36, %v5248_v50  ;;  %v5289_v27 = vld [vmem:[#allocation2 + $0x38] sm:$0xff] }
 0x2b6   : > { %v2259_v60 = vadd.f32 %v2243_v22, %v2205_v46  ;;  %3289 = vmatpush3.bf16.msra.mxu0 %v5147_v16  ;;  %3314 = vmatpush3.bf16.msra.mxu1 %v5147_v16  ;;  %v2046_v6 = vadd.f32 %v2030_v1, %v1993_v41  ;;  %v1985_v22 = vmul.f32 %v5134_v25, %v5258_v32  ;;  %v5283_v16 = vld [vmem:[%s6036_s4] ss:$0 sm:$0xff]  ;;  %v5297_v46 = vld [vmem:[#allocation2 + $0x81] sm:$0xff] }
 0x2b7   : > { %3291 = vmatprep.subr.bf16.mxu0 %v5155_v9  ;;  %3307 = vmatprep.subr.bf16.mxu1 %v5155_v9  ;;  %v2160_v62 = vadd.f32 %v2144_v13, %v2107_v45  ;;  %v2038_v59 = vmul.f32 %v5140_v39, %v5260_v29  ;;  %6331 = vst [vmem:[#allocation73_spill] sm:$0xff] %v5285_v40  ;;  %v5301_v13 = vld [vmem:[#allocation2 + $0x39] sm:$0xff]  ;;  %v5312_v45 = vld [vmem:[#allocation2 + $0x82] sm:$0xff] }
 0x2b8   : > { %v2312_v11 = vadd.f32 %v2296_v26, %v2259_v60  ;;  %v2100_v0 = vadd.f32 %v2084_v48, %v2046_v6  ;;  %v2190_v2 = vmul.f32 %v5161_v15, %v5276_v10  ;;  %v2001_v26 = vadd.f32 %v1985_v22, %v1948_v55  ;;  %v5318_v22 = vld [vmem:[#allocation2 + $0x98] sm:$0xff] }
 0x2b9   : > { %v2092_v19 = vmul.f32 %v5145_v52, %v5266_v49  ;;  %v2213_v57 = vadd.f32 %v2197_v17, %v2160_v62  ;;  %v2357_v30 = vmul.f32 %v5188_v5, %v5285_v40  ;;  %v2244_v1 = vmul.f32 %v5168_v4, %v5289_v27  ;;  %6333 = vst [vmem:[#allocation63_spill] sm:$0xff] %v5318_v22 }
 0x2ba   : > { %v2365_v47 = vadd.f32 %v2349_v8, %v2312_v11  ;;  %3293 = vmatpush3.bf16.msra.mxu0 %v5155_v9  ;;  %3315 = vmatpush3.bf16.msra.mxu1 %v5155_v9  ;;  %v2153_v38 = vadd.f32 %v2137_v53, %v2100_v0  ;;  %v2054_v41 = vadd.f32 %v2038_v59, %v2001_v26  ;;  %v5314_v53 = vld [vmem:[#allocation2 + $0x3a] sm:$0xff] }
 0x2bb   : > { %v2145_v8 = vmul.f32 %v5153_v7, %v5297_v46  ;;  %3295 = vmatprep.subr.bf16.mxu0 %v5170_v54  ;;  %3308 = vmatprep.subr.bf16.mxu1 %v5170_v54  ;;  %v2267_v48 = vadd.f32 %v2251_v33, %v2213_v57  ;;  %v2297_v60 = vmul.f32 %v5183_v58, %v5301_v13  ;;  %v5339_v57 = vld [vmem:[#allocation2 + $0x48] sm:$0xff] }
 0x2bc   : > { %v5308_v17 = vadd.f32 %v5283_v16, %v2365_v47  ;;  %v2206_v9 = vadd.f32 %v2190_v2, %v2153_v38  ;;  %6332 = vst [vmem:[#allocation87_spill] sm:$0xff] %v5314_v53  ;;  %v2108_v6 = vadd.f32 %v2092_v19, %v2054_v41  ;;  %v2198_v55 = vmul.f32 %v5161_v15, %v5312_v45  ;;  %v5331_v19 = vld [vmem:[#allocation2 + $0x99] sm:$0xff] }
 0x2bd   : > { %v2047_v11 = vadd.f32 %v5201_v37, %v5219_v28  ;;  %v2320_v33 = vadd.f32 %v2304_v18, %v2267_v48  ;;  %v2350_v59 = vmul.f32 %v5188_v5, %v5314_v53  ;;  %v2252_v0 = vmul.f32 %v5168_v4, %v5318_v22  ;;  %6334 = vst [vmem:[#allocation92_spill] sm:$0xff] %v5339_v57 }
 0x2be   : > { %v5323_v62 = vmul.f32 0.70710677, %v5308_v17  ;;  %3297 = vmatpush3.bf16.msra.mxu0 %v5170_v54  ;;  %3316 = vmatpush3.bf16.msra.mxu1 %v5170_v54  ;;  %v2260_v2 = vadd.f32 %v2244_v1, %v2206_v9  ;;  %v2161_v26 = vadd.f32 %v2145_v8, %v2108_v6  ;;  %v2305_v47 = vmul.f32 %v5183_v58, %v5331_v19  ;;  %v5341_v1 = vld [vmem:[#allocation2 + $0x9a] sm:$0xff] }
 0x2bf   : > { %v2101_v37 = vadd.f32 %v5205_v56, %v2047_v11  ;;  %3299 = vmatprep.subr.bf16.mxu0 %v5172_v21  ;;  %3309 = vmatprep.subr.bf16.mxu1 %v5172_v21  ;;  %v2373_v18 = vadd.f32 %v2357_v30, %v2320_v33  ;;  %v2245_v56 = vmul.f32 %v5168_v4, %v5339_v57 }
 0x2c0   : > { %v2468_v28 = vand.u32 2147483647, %v5323_v62  ;;  %v2313_v38 = vadd.f32 %v2297_v60, %v2260_v2  ;;  %v2214_v54 = vadd.f32 %v2198_v55, %v2161_v26  ;;  %v2358_v30 = vmul.f32 %v5188_v5, %v5341_v1  ;;  %v5352_v55 = vld [vmem:[#allocation2 + $0x49] sm:$0xff] }
 0x2c1   : > { %v2154_v41 = vadd.f32 %v5223_v3, %v2101_v37  ;;  %v2396_v48 = vadd.f32 %v5283_v16, %v2373_v18  ;;  %6335 = vst [vmem:[#allocation75_spill] sm:$0xff] %v5352_v55  ;;  %v2298_v33 = vmul.f32 %v5183_v58, %v5352_v55  ;;  %v5357_v18 = vld [vmem:[#allocation2 + $0x4a] sm:$0xff]  ;;  %vm2436_vm0 = vcmp.ge.f32.partialorder %v5323_v62, 0.0 }
 0x2c2   : > { %v2484_v8 = vmul.f32 0.3275911, %v2468_v28  ;;  %3301 = vmatpush3.bf16.msra.mxu0 %v5172_v21  ;;  %3317 = vmatpush3.bf16.msra.mxu1 %v5172_v21  ;;  %v2366_v9 = vadd.f32 %v2350_v59, %v2313_v38  ;;  %v2268_v60 = vadd.f32 %v2252_v0, %v2214_v54  ;;  %6336 = vst [vmem:[#allocation49_spill] sm:$0xff] %v5357_v18  ;;  %v2724_v29 = vsub.f32 0.0, %v2468_v28 }
 0x2c3   : > { %v2207_v6 = vadd.f32 %v5231_v44, %v2154_v41  ;;  %v2428_v11 = vmul.f32 0.70710677, %v2396_v48  ;;  %v2351_v59 = vmul.f32 %v5188_v5, %v5357_v18  ;;  %v1949_v38 = vmul.f32 %v5128_v36, %v5198_v20 }
 0x2c4   : > { %v2500_v3 = vadd.f32 1.0, %v2484_v8  ;;  %v2389_v2 = vadd.f32 %v5283_v16, %v2366_v9  ;;  %v2321_v26 = vadd.f32 %v2305_v47, %v2268_v60  ;;  %v1986_v47 = vmul.f32 %v5134_v25, %v5233_v43 }
 0x2c5   : > { %v2261_v37 = vadd.f32 %v2245_v56, %v2207_v6  ;;  %v2476_v21 = vand.u32 2147483647, %v2428_v11  ;;  %v2740_v60 = vmul.f32 %v2724_v29, %v2468_v28  ;;  %v6044_v62 = vmov -1.0  }
 0x2c6   : > { %3431 = vrcp.f32 %v2500_v3  ;;  %v2421_v44 = vmul.f32 0.70710677, %v2389_v2  ;;  %v2374_v0 = vadd.f32 %v2358_v30, %v2321_v26  ;;  %v5370_v30 = vmul.f32 0.5, %v5308_v17 }
 0x2c7   : > { %v2492_v54 = vmul.f32 0.3275911, %v2476_v21  ;;  %v2732_v41 = vsub.f32 0.0, %v2476_v21  ;;  %v2314_v8 = vadd.f32 %v2298_v33, %v2261_v37  ;;  %v2002_v33 = vadd.f32 %v1986_v47, %v1949_v38 }
 0x2c8   : > { %v2469_v56 = vand.u32 2147483647, %v2421_v44  ;;  %v5366_v9 = vadd.f32 %v5283_v16, %v2374_v0  ;;  %v2039_v37 = vmul.f32 %v5140_v39, %v5235_v34  ;;  %v5381_v29 = vsel %vm2436_vm0, 1.0, %v6044_v62 }
 0x2c9   : > { %v2508_v6 = vadd.f32 1.0, %v2492_v54  ;;  %v2367_v32 = vadd.f32 %v2351_v59, %v2314_v8  ;;  %v2748_v26 = vmul.f32 %v2732_v41, %v2476_v21  ;;  %v2756_v59 = vmul.f32 1.442695, %v2740_v60 }
 0x2ca   : > { %v2485_v20 = vmul.f32 0.3275911, %v2469_v56  ;;  %v5373_v50 = vmul.f32 0.70710677, %v5366_v9  ;;  %v2725_v17 = vsub.f32 0.0, %v2469_v56  ;;  %v5384_v0 = vmul.f32 0.5, %v2396_v48 }
 0x2cb   : > { %3433 = vrcp.f32 %v2508_v6  ;;  %v5376_v43 = vadd.f32 %v5283_v16, %v2367_v32  ;;  %vm2444_vm1 = vcmp.ge.f32.partialorder %v2428_v11, 0.0  ;;  %v2772_v32 = vmul.f32 1.442695, %v2748_v26 }
 0x2cc   : > { %v2501_v28 = vadd.f32 1.0, %v2485_v20  ;;  %v2477_v21 = vand.u32 2147483647, %v5373_v50  ;;  %vm2437_vm2 = vcmp.ge.f32.partialorder %v2421_v44, 0.0  ;;  %v2055_v47 = vadd.f32 %v2039_v37, %v2002_v33 }
 0x2cd   : > { %6337 = vst [vmem:[#allocation89_spill] sm:$0xff] %v5376_v43  ;;  %v5387_v54 = vmul.f32 0.70710677, %v5376_v43  ;;  %v2093_v20 = vmul.f32 %v5145_v52, %v5244_v63  ;;  %v6338_v60 = vmov -1.0   ;;  %v2741_v11 = vmul.f32 %v2725_v17, %v2469_v56 }
 0x2ce   : > { %3435 = vrcp.f32 %v2501_v28  ;;  %v2493_v38 = vmul.f32 0.3275911, %v2477_v21  ;;  %v2733_v41 = vsub.f32 0.0, %v2477_v21  ;;  %v5393_v48 = vsel %vm2444_vm1, 1.0, %v6338_v60 }
 0x2cf   : > { %v2470_v8 = vand.u32 2147483647, %v5387_v54  ;;  %3437 = vpow2.f32 %v2756_v59  ;;  %v5395_v42 = vmul.f32 0.5, %v2389_v2  ;;  %v2109_v12 = vadd.f32 %v2093_v20, %v2055_v47  ;;  %v5407_v2 = vld [vmem:[#allocation2 + $0xa8] sm:$0xff] }
 0x2d0   : > { %v3432_v34 = vpop.eup %3431  ;;  %v2509_v61 = vadd.f32 1.0, %v2493_v38  ;;  %v5399_v55 = vsel %vm2437_vm2, 1.0, %v6338_v60  ;;  %v2146_v33 = vmul.f32 %v5153_v7, %v5246_v14  ;;  %v2199_v56 = vmul.f32 %v5161_v15, %v5285_v40  ;;  %6339 = vst [vmem:[#allocation94_spill] sm:$0xff] %v5407_v2  ;;  %v5413_v38 = vld [vmem:[#allocation2 + $0xa9] sm:$0xff] }
 0x2d1   : > { %v2532_v62 = vmul.f32 %v3432_v34, %v2500_v3  ;;  %v2486_v26 = vmul.f32 0.3275911, %v2470_v8  ;;  %v2749_v3 = vmul.f32 %v2733_v41, %v2477_v21  ;;  %v2253_v44 = vmul.f32 %v5168_v4, %v5407_v2  ;;  %6340 = vst [vmem:[#allocation76_spill] sm:$0xff] %v5413_v38 }
 0x2d2   : > { %3439 = vrcp.f32 %v2509_v61  ;;  %v2162_v59 = vadd.f32 %v2146_v33, %v2109_v12  ;;  %v2726_v21 = vsub.f32 0.0, %v2470_v8  ;;  %v1942_v41 = vmul.f32 %v5128_v36, %v5227_v51  ;;  %v5421_v12 = vld [vmem:[#allocation2 + $0xaa] sm:$0xff] }
 0x2d3   : > { %v2548_v18 = vsub.f32 2.0, %v2532_v62  ;;  %3441 = vpow2.f32 %v2772_v32  ;;  %v5403_v37 = vadd.f32 1.0, %v2486_v26  ;;  %v2758_v62 = vmul.f32 1.442695, %v2741_v11  ;;  %6341 = vst [vmem:[#allocation13_spill] sm:$0xff] %v5421_v12 }
 0x2d4   : > { %v2306_v32 = vmul.f32 %v5183_v58, %v5413_v38  ;;  %v2215_v20 = vadd.f32 %v2199_v56, %v2162_v59  ;;  %v1979_v11 = vmul.f32 %v5134_v25, %v5256_v24  ;;  %v2774_v26 = vmul.f32 1.442695, %v2749_v3 }
 0x2d5   : > { %v5409_v17 = vmul.f32 %v3432_v34, %v2548_v18  ;;  %v3434_v47 = vpop.eup %3433  ;;  %3443 = vrcp.f32 %v5403_v37  ;;  %v2359_v33 = vmul.f32 %v5188_v5, %v5421_v12  ;;  %v2032_v2 = vmul.f32 %v5140_v39, %v5276_v10 }
 0x2d6   : > { %v2540_v34 = vmul.f32 %v3434_v47, %v2508_v6  ;;  %v2086_v38 = vmul.f32 %v5145_v52, %v5289_v27  ;;  %v2269_v6 = vadd.f32 %v2253_v44, %v2215_v20  ;;  %v1995_v56 = vadd.f32 %v1979_v11, %v1942_v41 }
 0x2d7   : > { %v2580_v18 = vmul.f32 1.0614054, %v5409_v17  ;;  %3445 = vpow2.f32 %v2758_v62  ;;  %v2742_v63 = vmul.f32 %v2726_v21, %v2470_v8  ;;  %v2139_v24 = vmul.f32 %v5153_v7, %v5301_v13 }
 0x2d8   : > { %v3436_v51 = vpop.eup %3435  ;;  %v2556_v14 = vsub.f32 2.0, %v2540_v34  ;;  %v2322_v57 = vadd.f32 %v2306_v32, %v2269_v6  ;;  %v2048_v10 = vadd.f32 %v2032_v2, %v1995_v56  ;;  %3447 = vpow2.f32 %v2774_v26 }
 0x2d9   : > { %v2596_v40 = vadd.f32 -1.4531521, %v2580_v18  ;;  %v2533_v59 = vmul.f32 %v3436_v51, %v2501_v28  ;;  %v3438_v43 = vpop.eup %3437  ;;  %v1950_v18 = vmul.f32 %v5128_v36, %v5266_v49  ;;  %v1987_v28 = vmul.f32 %v5134_v25, %v5297_v46 }
 0x2da   : > { %v5434_v12 = vmul.f32 %v3434_v47, %v2556_v14  ;;  %v2375_v21 = vadd.f32 %v2359_v33, %v2322_v57  ;;  %v2102_v41 = vadd.f32 %v2086_v38, %v2048_v10  ;;  %v2192_v32 = vmul.f32 %v5161_v15, %v5314_v53 }
 0x2db   : > { %v2612_v3 = vmul.f32 %v2596_v40, %v5409_v17  ;;  %v2549_v35 = vsub.f32 2.0, %v2533_v59  ;;  %v5441_v40 = vld [vmem:[#allocation2 + $0x50] sm:$0xff]  ;;  %v2040_v33 = vmul.f32 %v5140_v39, %v5312_v45  ;;  %vm2445_vm3 = vcmp.ge.f32.partialorder %v5373_v50, 0.0 }
 0x2dc   : > { %v3440_v62 = vpop.eup %3439  ;;  %v2588_v44 = vmul.f32 1.0614054, %v5434_v12  ;;  %6342 = vst [vmem:[#allocation51_spill] sm:$0xff] %v5441_v40  ;;  %v2246_v49 = vmul.f32 %v5168_v4, %v5441_v40  ;;  %v5453_v20 = vadd.f32 %v5283_v16, %v2375_v21  ;;  %v2155_v57 = vadd.f32 %v2139_v24, %v2102_v41 }
 0x2dd   : > { %v2628_v8 = vadd.f32 1.4214138, %v2612_v3  ;;  %v5443_v14 = vpop.eup %3441  ;;  %v5445_v2 = vmul.f32 %v3436_v51, %v2549_v35  ;;  %v2541_v47 = vmul.f32 %v3440_v62, %v2509_v61  ;;  %v5456_v35 = vld [vmem:[#allocation2 + $0x51] sm:$0xff]  ;;  %v2003_v61 = vadd.f32 %v1987_v28, %v1950_v18 }
 0x2de   : > { %v2604_v34 = vadd.f32 -1.4531521, %v2588_v44  ;;  %6343 = vst [vmem:[#allocation96_spill] sm:$0xff] %v5453_v20  ;;  %6344 = vst [vmem:[#allocation78_spill] sm:$0xff] %v5456_v35  ;;  %v2299_v59 = vmul.f32 %v5183_v58, %v5456_v35  ;;  %v5467_v10 = vmul.f32 0.70710677, %v5453_v20 }
 0x2df   : > { %v2644_v46 = vmul.f32 %v2628_v8, %v5409_v17  ;;  %v3444_v38 = vpop.eup %3443  ;;  %v2581_v11 = vmul.f32 1.0614054, %v5445_v2  ;;  %v2557_v26 = vsub.f32 2.0, %v2541_v47  ;;  %v2208_v8 = vadd.f32 %v2192_v32, %v2155_v57  ;;  %v5469_v44 = vld [vmem:[#allocation2 + $0x52] sm:$0xff] }
 0x2e0   : > { %v2620_v6 = vmul.f32 %v2604_v34, %v5434_v12  ;;  %v2534_v56 = vmul.f32 %v3444_v38, %v5403_v37  ;;  %6345 = vst [vmem:[#allocation98_spill] sm:$0xff] %v5469_v44  ;;  %v2352_v21 = vmul.f32 %v5188_v5, %v5469_v44  ;;  %vm2438_vm4 = vcmp.ge.f32.partialorder %v5387_v54, 0.0 }
 0x2e1   : > { %v2660_v51 = vadd.f32 -0.28449672, %v2644_v46  ;;  %v2597_v3 = vadd.f32 -1.4531521, %v2581_v11  ;;  %v5464_v24 = vmul.f32 %v3440_v62, %v2557_v26  ;;  %v3446_v37 = vpop.eup %3445  ;;  %v5477_v62 = vand.u32 2147483647, %v5467_v10 }
 0x2e2   : > { %v2636_v45 = vadd.f32 1.4214138, %v2620_v6  ;;  %v2550_v28 = vsub.f32 2.0, %v2534_v56  ;;  %v2056_v46 = vadd.f32 %v2040_v33, %v2003_v61  ;;  %v2094_v11 = vmul.f32 %v5145_v52, %v5318_v22  ;;  %v5484_v26 = vpop.eup %3447 }
 0x2e3   : > { %v2676_v18 = vmul.f32 %v2660_v51, %v5409_v17  ;;  %v2613_v41 = vmul.f32 %v2597_v3, %v5445_v2  ;;  %v2589_v47 = vmul.f32 1.0614054, %v5464_v24  ;;  %v2494_v56 = vmul.f32 0.3275911, %v5477_v62 }
 0x2e4   : > { %v2652_v32 = vmul.f32 %v2636_v45, %v5434_v12  ;;  %v5480_v57 = vmul.f32 %v3444_v38, %v2550_v28  ;;  %v2262_v3 = vadd.f32 %v2246_v49, %v2208_v8  ;;  %v2760_v33 = vmul.f32 1.442695, %v2742_v63 }
 0x2e5   : > { %v2692_v34 = vadd.f32 0.2548296, %v2676_v18  ;;  %v2629_v51 = vadd.f32 1.4214138, %v2613_v41  ;;  %v2605_v6 = vadd.f32 -1.4531521, %v2589_v47  ;;  %v2110_v47 = vadd.f32 %v2094_v11, %v2056_v46 }
 0x2e6   : > { %v2668_v35 = vadd.f32 -0.28449672, %v2652_v32  ;;  %v2582_v61 = vmul.f32 1.0614054, %v5480_v57  ;;  %v2510_v45 = vadd.f32 1.0, %v2494_v56  ;;  %v2315_v28 = vadd.f32 %v2299_v59, %v2262_v3  ;;  %v5516_v56 = vld [vmem:[#allocation2 + $0xb0] sm:$0xff] }
 0x2e7   : > { %v2708_v44 = vmul.f32 %v2692_v34, %v5409_v17  ;;  %v2645_v18 = vmul.f32 %v2629_v51, %v5445_v2  ;;  %v2621_v38 = vmul.f32 %v2605_v6, %v5464_v24  ;;  %v1980_v54 = vmul.f32 %v5134_v25, %v5207_v23 }
 0x2e8   : > { %v2684_v20 = vmul.f32 %v2668_v35, %v5434_v12  ;;  %v2598_v41 = vadd.f32 -1.4531521, %v2582_v61  ;;  %3449 = vrcp.f32 %v2510_v45  ;;  %v2368_v49 = vadd.f32 %v2352_v21, %v2315_v28 }
 0x2e9   : > { %v2788_v22 = vmul.f32 %v3438_v43, %v2708_v44  ;;  %v2661_v40 = vadd.f32 -0.28449672, %v2645_v18  ;;  %v2637_v53 = vadd.f32 1.4214138, %v2621_v38  ;;  %3451 = vpow2.f32 %v2760_v33 }
 0x2ea   : > { %v2700_v8 = vadd.f32 0.2548296, %v2684_v20  ;;  %v2614_v34 = vmul.f32 %v2598_v41, %v5480_v57  ;;  %v5496_v59 = vadd.f32 %v5283_v16, %v2368_v49  ;;  %v2147_v43 = vmul.f32 %v5153_v7, %v5331_v19  ;;  %v5525_v41 = vld [vmem:[#allocation2 + $0xb1] sm:$0xff] }
 0x2eb   : > { %v2804_v17 = vsub.f32 1.0, %v2788_v22  ;;  %v2677_v63 = vmul.f32 %v2661_v40, %v5445_v2  ;;  %v2653_v32 = vmul.f32 %v2637_v53, %v5464_v24  ;;  %v5504_v21 = vmul.f32 0.5, %v5366_v9 }
 0x2ec   : > { %v2716_v44 = vmul.f32 %v2700_v8, %v5434_v12  ;;  %v2630_v22 = vadd.f32 1.4214138, %v2614_v34  ;;  %v2163_v46 = vadd.f32 %v2147_v43, %v2110_v47  ;;  %v5509_v6 = vmul.f32 0.70710677, %v5496_v59 }
 0x2ed   : > { %v2820_v35 = vmul.f32 %v2804_v17, %v5381_v29  ;;  %v2693_v20 = vadd.f32 0.2548296, %v2677_v63  ;;  %v2669_v40 = vadd.f32 -0.28449672, %v2653_v32  ;;  %v2461_v12 = vsel %vm2445_vm3, 1.0, %v6338_v60 }
 0x2ee   : > { %v2796_v11 = vmul.f32 %v5443_v14, %v2716_v44  ;;  %v2646_v51 = vmul.f32 %v2630_v22, %v5480_v57  ;;  %v2200_v9 = vmul.f32 %v5161_v15, %v5341_v1  ;;  %v2254_v33 = vmul.f32 %v5168_v4, %v5516_v56 }
 0x2ef   : > { %v2836_v53 = vadd.f32 1.0, %v2820_v35  ;;  %v2709_v29 = vmul.f32 %v2693_v20, %v5445_v2  ;;  %v2685_v50 = vmul.f32 %v2669_v40, %v5464_v24  ;;  %v2734_v2 = vsub.f32 0.0, %v5477_v62 }
 0x2f0   : > { %v2812_v61 = vsub.f32 1.0, %v2796_v11  ;;  %v2662_v14 = vadd.f32 -0.28449672, %v2646_v51  ;;  %v5523_v28 = vand.u32 2147483647, %v5509_v6  ;;  %v2307_v17 = vmul.f32 %v5183_v58, %v5525_v41 }
 0x2f1   : > { %v2852_v3 = vmul.f32 %v2836_v53, %v5370_v30  ;;  %v2789_v18 = vmul.f32 %v3446_v37, %v2709_v29  ;;  %v2701_v38 = vadd.f32 0.2548296, %v2685_v50  ;;  %v2216_v30 = vadd.f32 %v2200_v9, %v2163_v46  ;;  %v5542_v9 = vld [vmem:[#allocation2 + $0xb2] sm:$0xff] }
 0x2f2   : > { %v2828_v47 = vmul.f32 %v2812_v61, %v5393_v48  ;;  %v2678_v49 = vmul.f32 %v2662_v14, %v5480_v57  ;;  %v3450_v8 = vpop.eup %3449  ;;  %v2487_v63 = vmul.f32 0.3275911, %v5523_v28  ;;  %v2750_v40 = vmul.f32 %v2734_v2, %v5477_v62 }
 0x2f3   : > { %3246 = vmatprep.mubr.f32.mxu0 %v2852_v3  ;;  %v2805_v34 = vsub.f32 1.0, %v2789_v18  ;;  %v2717_v37 = vmul.f32 %v2701_v38, %v5464_v24  ;;  %v3452_v32 = vpop.eup %3451  ;;  %v2542_v44 = vmul.f32 %v3450_v8, %v2510_v45  ;;  %v2270_v22 = vadd.f32 %v2254_v33, %v2216_v30  ;;  %v6346_v38 = vld [vmem:[#allocation107_spill] sm:$0xff] }
 0x2f4   : > { %v2844_v43 = vadd.f32 1.0, %v2828_v47  ;;  %v2694_v35 = vadd.f32 0.2548296, %v2678_v49  ;;  %v2503_v46 = vadd.f32 1.0, %v2487_v63  ;;  %v2454_v45 = vsel %vm2438_vm4, 1.0, %v6338_v60  ;;  %v6347_v49 = vld [vmem:[#allocation89_spill] sm:$0xff] }
 0x2f5   : > { %v2821_v48 = vmul.f32 %v2805_v34, %v5399_v55  ;;  %v2797_v20 = vmul.f32 %v5484_v26, %v2717_v37  ;;  %v2558_v11 = vsub.f32 2.0, %v2542_v44  ;;  %v2323_v51 = vadd.f32 %v2307_v17, %v2270_v22 }
 0x2f6   : > { %v2860_v53 = vmul.f32 %v2844_v43, %v5384_v0  ;;  %v2710_v24 = vmul.f32 %v2694_v35, %v5480_v57  ;;  %3453 = vrcp.f32 %v2503_v46  ;;  %v2360_v0 = vmul.f32 %v5188_v5, %v5542_v9 }
 0x2f7   : > { %v2837_v29 = vadd.f32 1.0, %v2821_v48  ;;  %v2813_v50 = vsub.f32 1.0, %v2797_v20  ;;  %v5544_v26 = vmul.f32 %v3450_v8, %v2558_v11  ;;  %v1943_v62 = vmul.f32 %v5128_v36, %v5163_v31  ;;  %v6348_v31 = vld [vmem:[#allocation92_spill] sm:$0xff]  ;;  %v6350_v20 = vld [vmem:[#allocation49_spill] sm:$0xff] }
 0x2f8   : > { %3258 = vmatprep.mubr.f32.mxu1 %v2860_v53  ;;  %v2790_v55 = vmul.f32 %v3452_v32, %v2710_v24  ;;  %v2776_v61 = vmul.f32 1.442695, %v2750_v40  ;;  %v2376_v18 = vadd.f32 %v2360_v0, %v2323_v51  ;;  %v2033_v2 = vmul.f32 %v5140_v39, %v6346_v38  ;;  %v6349_v32 = vld [vmem:[#allocation75_spill] sm:$0xff]  ;;  %v6351_v53 = vld [vmem:[#allocation45_spill] sm:$0xff] }
 0x2f9   : > { %v2853_v57 = vmul.f32 %v2837_v29, %v5395_v42  ;;  %v2829_v3 = vmul.f32 %v2813_v50, %v2461_v12  ;;  %v2590_v33 = vmul.f32 1.0614054, %v5544_v26  ;;  %v2406_v30 = vmul.f32 0.5, %v6347_v49  ;;  %v6355_v38 = vld [vmem:[#allocation43_spill] sm:$0xff]  ;;  %v6356_v49 = vld [vmem:[#allocation94_spill] sm:$0xff] }
 0x2fa   : > { %v2806_v14 = vsub.f32 1.0, %v2790_v55  ;;  %v1996_v17 = vadd.f32 %v1980_v54, %v1943_v62  ;;  %v2087_v42 = vmul.f32 %v5145_v52, %v6348_v31  ;;  %v2727_v34 = vsub.f32 0.0, %v5523_v28  ;;  %v6353_v62 = vld [vmem:[#allocation86_spill] sm:$0xff] }
 0x2fb   : > { %3247 = vmatmul.mubr.f32.vlgmr.msra.gmra.mrb[0].mxu0 %v2853_v57  ;;  %v2845_v47 = vadd.f32 1.0, %v2829_v3  ;;  %v2606_v8 = vadd.f32 -1.4531521, %v2590_v33  ;;  %v5561_v23 = vadd.f32 %v5283_v16, %v2376_v18  ;;  %v2140_v43 = vmul.f32 %v5153_v7, %v6349_v32 }
 0x2fc   : > { %v2822_v12 = vmul.f32 %v2806_v14, %v2454_v45  ;;  %v2049_v63 = vadd.f32 %v2033_v2, %v1996_v17  ;;  %3455 = vpow2.f32 %v2776_v61  ;;  %v2193_v40 = vmul.f32 %v5161_v15, %v6350_v20  ;;  %v6354_v61 = vld [vmem:[#allocation73_spill] sm:$0xff]  ;;  %v6357_v17 = vld [vmem:[#allocation76_spill] sm:$0xff] }
 0x2fd   : > { %v2861_v37 = vmul.f32 %v2845_v47, %v5504_v21  ;;  %v2622_v44 = vmul.f32 %v2606_v8, %v5544_v26  ;;  %v5568_v22 = vmul.f32 0.70710677, %v5561_v23  ;;  %v1951_v24 = vmul.f32 %v5128_v36, %v6351_v53  ;;  %v6352_v21 = vld [vmem:[#allocation71_spill] sm:$0xff]  ;;  %v5600_v53 = vld [vmem:[#allocation2 + $0xc0] sm:$0xff] }
 0x2fe   : > { %v2838_v35 = vadd.f32 1.0, %v2822_v12  ;;  %v2103_v48 = vadd.f32 %v2087_v42, %v2049_v63  ;;  %v1988_v11 = vmul.f32 %v5134_v25, %v6352_v21  ;;  %v2743_v50 = vmul.f32 %v2727_v34, %v5523_v28  ;;  %v6358_v63 = vld [vmem:[#allocation88_spill] sm:$0xff] }
 0x2ff   : > { %3259 = vmatmul.mubr.f32.vlgmr.msra.gmra.mrb[0].mxu1 %v2861_v37  ;;  %v2638_v29 = vadd.f32 1.4214138, %v2622_v44  ;;  %v5578_v45 = vand.u32 2147483647, %v5568_v22  ;;  %v2247_v57 = vmul.f32 %v5168_v4, %v6353_v62  ;;  %v2041_v54 = vmul.f32 %v5140_v39, %v6354_v61 }
 0x300   : > { %v2854_v51 = vmul.f32 %v2838_v35, %v2406_v30  ;;  %v3454_v55 = vpop.eup %3453  ;;  %v2156_v0 = vadd.f32 %v2140_v43, %v2103_v48  ;;  %v2004_v3 = vadd.f32 %v1988_v11, %v1951_v24  ;;  %v2300_v28 = vmul.f32 %v5183_v58, %v6355_v38  ;;  %v6359_v35 = vld [vmem:[#allocation13_spill] sm:$0xff] }
 0x301   : > { %v2654_v14 = vmul.f32 %v2638_v29, %v5544_v26  ;;  %v2535_v33 = vmul.f32 %v3454_v55, %v2503_v46  ;;  %v2495_v18 = vmul.f32 0.3275911, %v5578_v45  ;;  %v2095_v30 = vmul.f32 %v5145_v52, %v6356_v49  ;;  %v5604_v29 = vld [vmem:[#allocation2 + $0xc1] sm:$0xff] }
 0x302   : > { %3249 = vmatprep.mubr.f32.mxu0 %v2854_v51  ;;  %v2209_v2 = vadd.f32 %v2193_v40, %v2156_v0  ;;  %v2057_v47 = vadd.f32 %v2041_v54, %v2004_v3  ;;  %v2148_v42 = vmul.f32 %v5153_v7, %v6357_v17  ;;  %v2353_v46 = vmul.f32 %v5188_v5, %v6358_v63 }
 0x303   : > { %v2670_v12 = vadd.f32 -0.28449672, %v2654_v14  ;;  %v2551_v8 = vsub.f32 2.0, %v2535_v33  ;;  %v2511_v34 = vadd.f32 1.0, %v2495_v18  ;;  %v2201_v44 = vmul.f32 %v5161_v15, %v6359_v35  ;;  %v6360_v33 = vld [vmem:[#allocation87_spill] sm:$0xff] }
 0x304   : > { %v2263_v37 = vadd.f32 %v2247_v57, %v2209_v2  ;;  %v2111_v43 = vadd.f32 %v2095_v30, %v2057_v47  ;;  %vm2446_vm5 = vcmp.ge.f32.partialorder %v5467_v10, 0.0  ;;  %v2762_v24 = vmul.f32 1.442695, %v2743_v50  ;;  %v5611_v50 = vld [vmem:[#allocation2 + $0xc2] sm:$0xff] }
 0x305   : > { %v2686_v48 = vmul.f32 %v2670_v12, %v5544_v26  ;;  %v5598_v40 = vmul.f32 %v3454_v55, %v2551_v8  ;;  %3457 = vrcp.f32 %v2511_v34  ;;  %v2255_v51 = vmul.f32 %v5168_v4, %v5600_v53 }
 0x306   : > { %v2316_v21 = vadd.f32 %v2300_v28, %v2263_v37  ;;  %v2164_v11 = vadd.f32 %v2148_v42, %v2111_v43  ;;  %v3456_v0 = vpop.eup %3455  ;;  %v2308_v3 = vmul.f32 %v5183_v58, %v5604_v29  ;;  %v1944_v55 = vmul.f32 %v5128_v36, %v5289_v27  ;;  %v6361_v42 = vld [vmem:[#allocation51_spill] sm:$0xff] }
 0x307   : > { %v2702_v62 = vadd.f32 0.2548296, %v2686_v48  ;;  %v2583_v57 = vmul.f32 1.0614054, %v5598_v40  ;;  %v1981_v14 = vmul.f32 %v5134_v25, %v5301_v13  ;;  %v2034_v18 = vmul.f32 %v5140_v39, %v6360_v33 }
 0x308   : > { %v2369_v61 = vadd.f32 %v2353_v46, %v2316_v21  ;;  %v2217_v54 = vadd.f32 %v2201_v44, %v2164_v11  ;;  %v2361_v2 = vmul.f32 %v5188_v5, %v5611_v50  ;;  %v2088_v12 = vmul.f32 %v5145_v52, %v6361_v42  ;;  %v6362_v44 = vld [vmem:[#allocation96_spill] sm:$0xff]  ;;  %v6363_v52 = vld [vmem:[#allocation78_spill] sm:$0xff] }
 0x309   : > { %v2718_v38 = vmul.f32 %v2702_v62, %v5544_v26  ;;  %v2599_v28 = vadd.f32 -1.4531521, %v2583_v57  ;;  %v1997_v30 = vadd.f32 %v1981_v14, %v1944_v55  ;;  %v2462_v13 = vsel %vm2446_vm5, 1.0, %v6338_v60 }
 0x30a   : > { %v5621_v47 = vadd.f32 %v5283_v16, %v2369_v61  ;;  %v2271_v27 = vadd.f32 %v2255_v51, %v2217_v54  ;;  %3459 = vpow2.f32 %v2762_v24  ;;  %v2735_v26 = vsub.f32 0.0, %v5578_v45  ;;  %v6364_v24 = vld [vmem:[#allocation63_spill] sm:$0xff]  ;;  %v6365_v54 = vld [vmem:[#allocation98_spill] sm:$0xff] }
 0x30b   : > { %v2798_v8 = vmul.f32 %v3456_v0, %v2718_v38  ;;  %v2615_v37 = vmul.f32 %v2599_v28, %v5598_v40  ;;  %v2050_v43 = vadd.f32 %v2034_v18, %v1997_v30  ;;  %v2414_v48 = vmul.f32 0.5, %v6362_v44  ;;  %v6366_v30 = vld [vmem:[#allocation47_spill] sm:$0xff] }
 0x30c   : > { %v5631_v63 = vmul.f32 0.70710677, %v5621_v47  ;;  %v2324_v46 = vadd.f32 %v2308_v3, %v2271_v27  ;;  %v2141_v51 = vmul.f32 %v5153_v7, %v6363_v52  ;;  %v1952_v57 = vmul.f32 %v5128_v36, %v6364_v24 }
 0x30d   : > { %v2814_v21 = vsub.f32 1.0, %v2798_v8  ;;  %v2631_v11 = vadd.f32 1.4214138, %v2615_v37  ;;  %v2104_v62 = vadd.f32 %v2088_v12, %v2050_v43  ;;  %v2194_v14 = vmul.f32 %v5161_v15, %v6365_v54  ;;  %v6367_v15 = vld [vmem:[#allocation90_spill] sm:$0xff] }
 0x30e   : > { %v5637_v10 = vand.u32 2147483647, %v5631_v63  ;;  %v2377_v0 = vadd.f32 %v2361_v2, %v2324_v46  ;;  %v1989_v33 = vmul.f32 %v5134_v25, %v5331_v19  ;;  %v2751_v7 = vmul.f32 %v2735_v26, %v5578_v45 }
 0x30f   : > { %v3458_v55 = vpop.eup %3457  ;;  %v2830_v61 = vmul.f32 %v2814_v21, %v2462_v13  ;;  %v2647_v3 = vmul.f32 %v2631_v11, %v5598_v40  ;;  %v2157_v27 = vadd.f32 %v2141_v51, %v2104_v62  ;;  %v2248_v12 = vmul.f32 %v5168_v4, %v6366_v30  ;;  %v6368_v21 = vld [vmem:[#allocation62_spill] sm:$0xff] }
 0x310   : > { %v2543_v18 = vmul.f32 %v3458_v55, %v2511_v34  ;;  %v2488_v38 = vmul.f32 0.3275911, %v5637_v10  ;;  %v5649_v28 = vadd.f32 %v5283_v16, %v2377_v0  ;;  %v2301_v25 = vmul.f32 %v5183_v58, %v6367_v15 }
 0x311   : > { %v2846_v2 = vadd.f32 1.0, %v2830_v61  ;;  %v2663_v36 = vadd.f32 -0.28449672, %v2647_v3  ;;  %v2005_v19 = vadd.f32 %v1989_v33, %v1952_v57  ;;  %v2210_v26 = vadd.f32 %v2194_v14, %v2157_v27 }
 0x312   : > { %v2559_v13 = vsub.f32 2.0, %v2543_v18  ;;  %v5653_v8 = vadd.f32 1.0, %v2488_v38  ;;  %v5659_v37 = vmul.f32 0.70710677, %v5649_v28  ;;  %vm2439_vm6 = vcmp.ge.f32.partialorder %v5509_v6, 0.0 }
 0x313   : > { %v2862_v34 = vmul.f32 %v2846_v2, %v2414_v48  ;;  %v2679_v45 = vmul.f32 %v2663_v36, %v5598_v40  ;;  %v2042_v4 = vmul.f32 %v5140_v39, %v5341_v1  ;;  %v2264_v48 = vadd.f32 %v2248_v12, %v2210_v26  ;;  %v5702_v2 = vld [vmem:[%s6035_s3 + $0x5] ss:$0 sm:$0xff]  ;;  %v5711_v12 = vld [vmem:[#allocation2 + $0xc8] sm:$0xff] }
 0x314   : > { %v5662_v46 = vmul.f32 %v3458_v55, %v2559_v13  ;;  %3461 = vrcp.f32 %v5653_v8  ;;  %v3460_v43 = vpop.eup %3459  ;;  %v5668_v44 = vand.u32 2147483647, %v5659_v37  ;;  %v2354_v11 = vmul.f32 %v5188_v5, %v6368_v21  ;;  %v5682_v5 = vld [vmem:[%s6035_s3 + $0x3] ss:$0 sm:$0xff] }
 0x315   : > { %3261 = vmatprep.mubr.f32.mxu1 %v2862_v34  ;;  %v2695_v58 = vadd.f32 0.2548296, %v2679_v45  ;;  %v2778_v0 = vmul.f32 1.442695, %v2751_v7  ;;  %v2058_v62 = vadd.f32 %v2042_v4, %v2005_v19  ;;  %v2407_v24 = vmul.f32 0.5, %v5496_v59  ;;  %v5720_v34 = vld [vmem:[#allocation2 + $0xc9] sm:$0xff] }
 0x316   : > { %v2591_v51 = vmul.f32 1.0614054, %v5662_v46  ;;  %v2496_v39 = vmul.f32 0.3275911, %v5668_v44  ;;  %v2317_v1 = vadd.f32 %v2301_v25, %v2264_v48  ;;  %v2455_v55 = vsel %vm2439_vm6, 1.0, %v6338_v60 }
 0x317   : > { %v2711_v57 = vmul.f32 %v2695_v58, %v5598_v40  ;;  %v2096_v3 = vmul.f32 %v5682_v5, %v5516_v56  ;;  %v5689_v59 = vld [vmem:[%s6035_s3 + $0x4] ss:$0 sm:$0xff]  ;;  %v5694_v6 = vmul.f32 0.5, %v5561_v23  ;;  %3463 = vpow2.f32 %v2778_v0  ;;  %v5716_v25 = vld [vmem:[%s6035_s3 + $0x6] ss:$0 sm:$0xff] }
 0x318   : > { %v2607_v61 = vadd.f32 -1.4531521, %v2591_v51  ;;  %v2149_v40 = vmul.f32 %v5689_v59, %v5525_v41  ;;  %v5696_v33 = vadd.f32 1.0, %v2496_v39  ;;  %v2370_v18 = vadd.f32 %v2354_v11, %v2317_v1  ;;  %v5725_v45 = vld [vmem:[%s6035_s3] ss:$0 sm:$0xff] }
 0x319   : > { %v2791_v14 = vmul.f32 %v3460_v43, %v2711_v57  ;;  %v2112_v38 = vadd.f32 %v2096_v3, %v2058_v62  ;;  %v2202_v36 = vmul.f32 %v5702_v2, %v5542_v9  ;;  %v2728_v30 = vsub.f32 0.0, %v5637_v10  ;;  %v5736_v58 = vld [vmem:[%s6035_s3 + $0x7] ss:$0 sm:$0xff]  ;;  %v5751_v62 = vld [vmem:[%s6035_s3 + $0x2] ss:$0 sm:$0xff]  ;;  %v5760_v3 = vld [vmem:[#allocation2 + $0xca] sm:$0xff] }
 0x31a   : > { %v2623_v7 = vmul.f32 %v2607_v61, %v5662_v46  ;;  %3465 = vrcp.f32 %v5696_v33  ;;  %v5709_v23 = vadd.f32 %v5283_v16, %v2370_v18  ;;  %v2256_v19 = vmul.f32 %v5716_v25, %v5711_v12  ;;  %6369 = vst [vmem:[#allocation31_spill] sm:$0xff] %v5760_v3  ;;  %v5765_v18 = vld [vmem:[%s6035_s3 + $0x8] ss:$0 sm:$0xff] }
 0x31b   : > { %v2807_v27 = vsub.f32 1.0, %v2791_v14  ;;  %v2165_v15 = vadd.f32 %v2149_v40, %v2112_v38  ;;  %v1945_v26 = vmul.f32 %v5725_v45, %v6348_v31  ;;  %vm2447_vm7 = vcmp.ge.f32.partialorder %v5568_v22, 0.0  ;;  %v5744_v31 = vld [vmem:[%s6035_s3 + $0x1] ss:$0 sm:$0xff] }
 0x31c   : > { %v2639_v13 = vadd.f32 1.4214138, %v2623_v7  ;;  %v5731_v43 = vmul.f32 0.70710677, %v5709_v23  ;;  %v2309_v48 = vmul.f32 %v5736_v58, %v5720_v34  ;;  %v1982_v0 = vmul.f32 %v5744_v31, %v6349_v32  ;;  %v2068_v40 = vld [vmem:[#allocation2 + $0x60] sm:$0xff] }
 0x31d   : > { %v2823_v4 = vmul.f32 %v2807_v27, %v2455_v55  ;;  %v2218_v51 = vadd.f32 %v2202_v36, %v2165_v15  ;;  %v2035_v57 = vmul.f32 %v5751_v62, %v6350_v20  ;;  %v2744_v55 = vmul.f32 %v2728_v30, %v5637_v10 }
 0x31e   : > { %v3462_v21 = vpop.eup %3461  ;;  %v2655_v11 = vmul.f32 %v2639_v13, %v5662_v46  ;;  %v5758_v61 = vand.u32 2147483647, %v5731_v43  ;;  %v2362_v20 = vmul.f32 %v5765_v18, %v5760_v3  ;;  %v1998_v7 = vadd.f32 %v1982_v0, %v1945_v26 }
 0x31f   : > { %v2839_v39 = vadd.f32 1.0, %v2823_v4  ;;  %v2536_v1 = vmul.f32 %v3462_v21, %v5653_v8  ;;  %v2272_v14 = vadd.f32 %v2256_v19, %v2218_v51  ;;  %v2121_v8 = vld [vmem:[#allocation2 + $0x61] sm:$0xff]  ;;  %v2736_v36 = vsub.f32 0.0, %v5668_v44 }
 0x320   : > { %v2671_v32 = vadd.f32 -0.28449672, %v2655_v11  ;;  %v2489_v27 = vmul.f32 0.3275911, %v5758_v61  ;;  %v2051_v15 = vadd.f32 %v2035_v57, %v1998_v7  ;;  %v2089_v19 = vmul.f32 %v5682_v5, %v2068_v40  ;;  %v2174_v4 = vld [vmem:[#allocation2 + $0x62] sm:$0xff] }
 0x321   : > { %v2855_v38 = vmul.f32 %v2839_v39, %v2407_v24  ;;  %v2552_v10 = vsub.f32 2.0, %v2536_v1  ;;  %v2325_v13 = vadd.f32 %v2309_v48, %v2272_v14  ;;  %v2764_v51 = vmul.f32 1.442695, %v2744_v55  ;;  %v3464_v24 = vpop.eup %3463  ;;  %v2228_v48 = vld [vmem:[#allocation2 + $0x78] sm:$0xff] }
 0x322   : > { %v2687_v30 = vmul.f32 %v2671_v32, %v5662_v46  ;;  %v2505_v3 = vadd.f32 1.0, %v2489_v27  ;;  %v2142_v26 = vmul.f32 %v5689_v59, %v2121_v8  ;;  %v2463_v0 = vsel %vm2447_vm7, 1.0, %v6338_v60  ;;  %v2281_v55 = vld [vmem:[#allocation2 + $0x79] sm:$0xff] }
 0x323   : > { %3250 = vmatmul.mubr.f32.gmra.mrb[2].mxu0 %v2855_v38  ;;  %v5773_v11 = vmul.f32 %v3462_v21, %v2552_v10  ;;  %v2378_v1 = vadd.f32 %v2362_v20, %v2325_v13  ;;  %v2105_v32 = vadd.f32 %v2089_v19, %v2051_v15  ;;  %v2752_v14 = vmul.f32 %v2736_v36, %v5668_v44 }
 0x324   : > { %v2703_v39 = vadd.f32 0.2548296, %v2687_v30  ;;  %v3466_v57 = vpop.eup %3465  ;;  %3467 = vrcp.f32 %v2505_v3  ;;  %v2195_v21 = vmul.f32 %v5702_v2, %v2174_v4  ;;  %v2729_v10 = vsub.f32 0.0, %v5758_v61 }
 0x325   : > { %v2584_v40 = vmul.f32 1.0614054, %v5773_v11  ;;  %v2544_v8 = vmul.f32 %v3466_v57, %v5696_v33  ;;  %v5785_v22 = vadd.f32 %v5283_v16, %v2378_v1  ;;  %v2158_v38 = vadd.f32 %v2142_v26, %v2105_v32  ;;  %v2334_v33 = vld [vmem:[#allocation2 + $0x7a] sm:$0xff] }
 0x326   : > { %v2719_v7 = vmul.f32 %v2703_v39, %v5662_v46  ;;  %3469 = vpow2.f32 %v2764_v51  ;;  %v2249_v27 = vmul.f32 %v5716_v25, %v2228_v48  ;;  %vm2440_vm8 = vcmp.ge.f32.partialorder %v5631_v63, 0.0 }
 0x327   : > { %v2600_v20 = vadd.f32 -1.4531521, %v2584_v40  ;;  %v2560_v44 = vsub.f32 2.0, %v2544_v8  ;;  %v5791_v36 = vmul.f32 0.70710677, %v5785_v22  ;;  %v2302_v46 = vmul.f32 %v5736_v58, %v2281_v55 }
 0x328   : > { %v2799_v30 = vmul.f32 %v3464_v24, %v2719_v7  ;;  %v2211_v13 = vadd.f32 %v2195_v21, %v2158_v38  ;;  %v1953_v15 = vmul.f32 %v5725_v45, %v6356_v49  ;;  %v1990_v19 = vmul.f32 %v5744_v31, %v6357_v17 }
 0x329   : > { %v2616_v16 = vmul.f32 %v2600_v20, %v5773_v11  ;;  %v5799_v51 = vmul.f32 %v3466_v57, %v2560_v44  ;;  %v2780_v26 = vmul.f32 1.442695, %v2752_v14  ;;  %v5802_v24 = vand.u32 2147483647, %v5791_v36 }
 0x32a   : > { %v2815_v4 = vsub.f32 1.0, %v2799_v30  ;;  %v2265_v1 = vadd.f32 %v2249_v27, %v2211_v13  ;;  %v2355_v32 = vmul.f32 %v5765_v18, %v2334_v33  ;;  %v2006_v48 = vadd.f32 %v1990_v19, %v1953_v15  ;;  %v5821_v13 = vld [vmem:[%s6036_s4] ss:$0 sm:$0xff] }
 0x32b   : > { %v2632_v39 = vadd.f32 1.4214138, %v2616_v16  ;;  %v2592_v21 = vmul.f32 1.0614054, %v5799_v51  ;;  %v2745_v49 = vmul.f32 %v2729_v10, %v5758_v61  ;;  %v2497_v55 = vmul.f32 0.3275911, %v5802_v24 }
 0x32c   : > { %v2831_v40 = vmul.f32 %v2815_v4, %v2463_v0  ;;  %v2318_v57 = vadd.f32 %v2302_v46, %v2265_v1  ;;  %v2043_v14 = vmul.f32 %v5751_v62, %v6359_v35  ;;  %v2097_v7 = vmul.f32 %v5682_v5, %v5600_v53 }
 0x32d   : > { %v2648_v17 = vmul.f32 %v2632_v39, %v5773_v11  ;;  %v2608_v38 = vadd.f32 -1.4531521, %v2592_v21  ;;  %3471 = vpow2.f32 %v2780_v26  ;;  %v2513_v20 = vadd.f32 1.0, %v2497_v55  ;;  %v2289_v39 = vld [vmem:[#allocation2 + $0xd9] sm:$0xff] }
 0x32e   : > { %v2847_v8 = vadd.f32 1.0, %v2831_v40  ;;  %v3468_v0 = vpop.eup %3467  ;;  %v2371_v30 = vadd.f32 %v2355_v32, %v2318_v57  ;;  %v2059_v44 = vadd.f32 %v2043_v14, %v2006_v48  ;;  %v2150_v61 = vmul.f32 %v5689_v59, %v5604_v29  ;;  %v2236_v29 = vld [vmem:[#allocation2 + $0xd8] sm:$0xff] }
 0x32f   : > { %v2664_v27 = vadd.f32 -0.28449672, %v2648_v17  ;;  %v2624_v46 = vmul.f32 %v2608_v38, %v5799_v51  ;;  %v2537_v33 = vmul.f32 %v3468_v0, %v2505_v3  ;;  %3473 = vrcp.f32 %v2513_v20  ;;  %v2342_v55 = vld [vmem:[#allocation2 + $0xda] sm:$0xff] }
 0x330   : > { %v2863_v10 = vmul.f32 %v2847_v8, %v5694_v6  ;;  %v3470_v35 = vpop.eup %3469  ;;  %v2766_v16 = vmul.f32 1.442695, %v2745_v49  ;;  %v5824_v15 = vadd.f32 %v5821_v13, %v2371_v30  ;;  %v2113_v19 = vadd.f32 %v2097_v7, %v2059_v44 }
 0x331   : > { %v2680_v53 = vmul.f32 %v2664_v27, %v5773_v11  ;;  %v2408_v6 = vmul.f32 0.5, %v5621_v47  ;;  %v2640_v4 = vadd.f32 1.4214138, %v2624_v46  ;;  %v2553_v3 = vsub.f32 2.0, %v2537_v33 }
 0x332   : > { %3262 = vmatmul.mubr.f32.gmra.mrb[2].mxu1 %v2863_v10  ;;  %v2203_v26 = vmul.f32 %v5702_v2, %v5611_v50  ;;  %v2456_v1 = vsel %vm2440_vm8, 1.0, %v6338_v60  ;;  %vm2448_vm9 = vcmp.ge.f32.partialorder %v5659_v37, 0.0  ;;  %v5834_v48 = vmul.f32 0.70710677, %v5824_v15 }
 0x333   : > { %v2696_v32 = vadd.f32 0.2548296, %v2680_v53  ;;  %v2656_v40 = vmul.f32 %v2640_v4, %v5799_v51  ;;  %v5837_v21 = vmul.f32 %v3468_v0, %v2553_v3  ;;  %v2166_v47 = vadd.f32 %v2150_v61, %v2113_v19 }
 0x334   : > { %v2257_v49 = vmul.f32 %v5716_v25, %v2236_v29  ;;  %3475 = vpow2.f32 %v2766_v16  ;;  %v2737_v63 = vsub.f32 0.0, %v5802_v24  ;;  %v5843_v17 = vand.u32 2147483647, %v5834_v48 }
 0x335   : > { %v2712_v50 = vmul.f32 %v2696_v32, %v5773_v11  ;;  %v2672_v57 = vadd.f32 -0.28449672, %v2656_v40  ;;  %v2585_v14 = vmul.f32 1.0614054, %v5837_v21  ;;  %v2219_v7 = vadd.f32 %v2203_v26, %v2166_v47  ;;  %v2069_v26 = vld [vmem:[#allocation2 + $0x68] sm:$0xff] }
 0x336   : > { %v2310_v8 = vmul.f32 %v5736_v58, %v2289_v39  ;;  %v2490_v0 = vmul.f32 0.3275911, %v5843_v17  ;;  %v2363_v27 = vmul.f32 %v5765_v18, %v2342_v55  ;;  %v1946_v11 = vmul.f32 %v5725_v45, %v6361_v42  ;;  %v2122_v40 = vld [vmem:[#allocation2 + $0x69] sm:$0xff] }
 0x337   : > { %v2792_v38 = vmul.f32 %v3470_v35, %v2712_v50  ;;  %v3472_v30 = vpop.eup %3471  ;;  %v2688_v44 = vmul.f32 %v2672_v57, %v5799_v51  ;;  %v2601_v61 = vadd.f32 -1.4531521, %v2585_v14  ;;  %v2273_v10 = vadd.f32 %v2257_v49, %v2219_v7  ;;  %v2175_v55 = vld [vmem:[#allocation2 + $0x6a] sm:$0xff] }
 0x338   : > { %v1983_v46 = vmul.f32 %v5744_v31, %v6363_v52  ;;  %v2753_v53 = vmul.f32 %v2737_v63, %v5802_v24  ;;  %v2506_v16 = vadd.f32 1.0, %v2490_v0  ;;  %v2036_v35 = vmul.f32 %v5751_v62, %v6365_v54 }
 0x339   : > { %v2808_v33 = vsub.f32 1.0, %v2792_v38  ;;  %v3474_v19 = vpop.eup %3473  ;;  %v2704_v29 = vadd.f32 0.2548296, %v2688_v44  ;;  %v2617_v4 = vmul.f32 %v2601_v61, %v5837_v21  ;;  %v2326_v42 = vadd.f32 %v2310_v8, %v2273_v10  ;;  %v2229_v8 = vld [vmem:[#allocation2 + $0x80] sm:$0xff] }
 0x33a   : > { %v1999_v3 = vadd.f32 %v1983_v46, %v1946_v11  ;;  %v2464_v32 = vsel %vm2448_vm9, 1.0, %v6338_v60  ;;  %v2545_v52 = vmul.f32 %v3474_v19, %v2513_v20  ;;  %3477 = vrcp.f32 %v2506_v16  ;;  %v2282_v44 = vld [vmem:[#allocation2 + $0x81] sm:$0xff] }
 0x33b   : > { %v2824_v39 = vmul.f32 %v2808_v33, %v2456_v1  ;;  %v2720_v24 = vmul.f32 %v2704_v29, %v5799_v51  ;;  %v2633_v47 = vadd.f32 1.4214138, %v2617_v4  ;;  %v2379_v49 = vadd.f32 %v2363_v27, %v2326_v42 }
 0x33c   : > { %v2052_v54 = vadd.f32 %v2036_v35, %v1999_v3  ;;  %v2561_v63 = vsub.f32 2.0, %v2545_v52  ;;  %v2782_v57 = vmul.f32 1.442695, %v2753_v53  ;;  %v2090_v14 = vmul.f32 %v5682_v5, %v2069_v26  ;;  %v2335_v35 = vld [vmem:[#allocation2 + $0x82] sm:$0xff] }
 0x33d   : > { %v2840_v50 = vadd.f32 1.0, %v2824_v39  ;;  %v2800_v7 = vmul.f32 %v3472_v30, %v2720_v24  ;;  %v2649_v1 = vmul.f32 %v2633_v47, %v5837_v21  ;;  %v5865_v37 = vadd.f32 %v5821_v13, %v2379_v49 }
 0x33e   : > { %v2143_v20 = vmul.f32 %v5689_v59, %v2122_v40  ;;  %v3476_v38 = vpop.eup %3475  ;;  %v5868_v0 = vmul.f32 %v3474_v19, %v2561_v63  ;;  %v2106_v27 = vadd.f32 %v2090_v14, %v2052_v54  ;;  %v2196_v11 = vmul.f32 %v5702_v2, %v2175_v55 }
 0x33f   : > { %v2856_v51 = vmul.f32 %v2840_v50, %v2408_v6  ;;  %v2416_v61 = vmul.f32 0.5, %v5649_v28  ;;  %v2816_v10 = vsub.f32 1.0, %v2800_v7  ;;  %v2665_v30 = vadd.f32 -0.28449672, %v2649_v1 }
 0x340   : > { %v5873_v46 = vmul.f32 0.70710677, %v5865_v37  ;;  %vm2441_vm10 = vcmp.ge.f32.partialorder %v5731_v43, 0.0  ;;  %v2593_v33 = vmul.f32 1.0614054, %v5868_v0  ;;  %v2159_v53 = vadd.f32 %v2143_v20, %v2106_v27 }
 0x341   : > { %3252 = vmatprep.mubr.f32.mxu0 %v2856_v51  ;;  %v2250_v6 = vmul.f32 %v5716_v25, %v2229_v8  ;;  %v2832_v19 = vmul.f32 %v2816_v10, %v2464_v32  ;;  %v2681_v29 = vmul.f32 %v2665_v30, %v5837_v21  ;;  %3479 = vpow2.f32 %v2782_v57 }
 0x342   : > { %v5880_v28 = vand.u32 2147483647, %v5873_v46  ;;  %v2609_v4 = vadd.f32 -1.4531521, %v2593_v33  ;;  %v2730_v42 = vsub.f32 0.0, %v5843_v17  ;;  %v2212_v3 = vadd.f32 %v2196_v11, %v2159_v53 }
 0x343   : > { %v2303_v26 = vmul.f32 %v5736_v58, %v2282_v44  ;;  %v2848_v39 = vadd.f32 1.0, %v2832_v19  ;;  %v2697_v52 = vadd.f32 0.2548296, %v2681_v29  ;;  %v2356_v24 = vmul.f32 %v5765_v18, %v2335_v35 }
 0x344   : > { %v2498_v40 = vmul.f32 0.3275911, %v5880_v28  ;;  %v3478_v47 = vpop.eup %3477  ;;  %v2625_v32 = vmul.f32 %v2609_v4, %v5868_v0  ;;  %v2266_v49 = vadd.f32 %v2250_v6, %v2212_v3  ;;  %v1954_v54 = vmul.f32 %v5725_v45, %v5516_v56  ;;  %v2343_v3 = vld [vmem:[#allocation2 + $0xe2] sm:$0xff] }
 0x345   : > { %v1991_v55 = vmul.f32 %v5744_v31, %v5525_v41  ;;  %v2864_v50 = vmul.f32 %v2848_v39, %v2416_v61  ;;  %v2713_v63 = vmul.f32 %v2697_v52, %v5837_v21  ;;  %v2538_v57 = vmul.f32 %v3478_v47, %v2506_v16 }
 0x346   : > { %v2514_v14 = vadd.f32 1.0, %v2498_v40  ;;  %v2457_v7 = vsel %vm2441_vm10, 1.0, %v6338_v60  ;;  %v2641_v1 = vadd.f32 1.4214138, %v2625_v32  ;;  %v2319_v20 = vadd.f32 %v2303_v26, %v2266_v49 }
 0x347   : > { %v2007_v8 = vadd.f32 %v1991_v55, %v1954_v54  ;;  %3264 = vmatprep.mubr.f32.mxu1 %v2864_v50  ;;  %v2793_v51 = vmul.f32 %v3476_v38, %v2713_v63  ;;  %v2554_v27 = vsub.f32 2.0, %v2538_v57  ;;  %v2044_v56 = vmul.f32 %v5751_v62, %v5542_v9  ;;  %v2237_v62 = vld [vmem:[#allocation2 + $0xe0] sm:$0xff] }
 0x348   : > { %3481 = vrcp.f32 %v2514_v14  ;;  %v2657_v41 = vmul.f32 %v2641_v1, %v5868_v0  ;;  %v2746_v45 = vmul.f32 %v2730_v42, %v5843_v17  ;;  %v2372_v31 = vadd.f32 %v2356_v24, %v2319_v20 }
 0x349   : > { %v2098_v21 = vmul.f32 %v5682_v5, %v5711_v12  ;;  %v2809_v43 = vsub.f32 1.0, %v2793_v51  ;;  %v5901_v16 = vmul.f32 %v3478_v47, %v2554_v27  ;;  %v2060_v11 = vadd.f32 %v2044_v56, %v2007_v8  ;;  %v6370_v5 = vld [vmem:[#allocation31_spill] sm:$0xff] }
 0x34a   : > { %v2151_v38 = vmul.f32 %v5689_v59, %v5720_v34  ;;  %v2409_v44 = vmul.f32 0.5, %v5709_v23  ;;  %v2673_v61 = vadd.f32 -0.28449672, %v2657_v41  ;;  %v5907_v9 = vadd.f32 %v5821_v13, %v2372_v31  ;;  %v2290_v23 = vld [vmem:[#allocation2 + $0xe1] sm:$0xff] }
 0x34b   : > { %v3480_v10 = vpop.eup %3479  ;;  %v2825_v17 = vmul.f32 %v2809_v43, %v2457_v7  ;;  %v2586_v30 = vmul.f32 1.0614054, %v5901_v16  ;;  %v2114_v33 = vadd.f32 %v2098_v21, %v2060_v11  ;;  %v2204_v12 = vmul.f32 %v5702_v2, %v6370_v5 }
 0x34c   : > { %v2689_v53 = vmul.f32 %v2673_v61, %v5868_v0  ;;  %v2768_v6 = vmul.f32 1.442695, %v2746_v45  ;;  %v5914_v59 = vmul.f32 0.70710677, %v5907_v9  ;;  %v2258_v29 = vmul.f32 %v5716_v25, %v2237_v62 }
 0x34d   : > { %v2841_v34 = vadd.f32 1.0, %v2825_v17  ;;  %v2602_v35 = vadd.f32 -1.4531521, %v2586_v30  ;;  %v2167_v19 = vadd.f32 %v2151_v38, %v2114_v33  ;;  %v2311_v52 = vmul.f32 %v5736_v58, %v2290_v23 }
 0x34e   : > { %v2705_v4 = vadd.f32 0.2548296, %v2689_v53  ;;  %v2475_v42 = vand.u32 2147483647, %v5914_v59  ;;  %vm2449_vm11 = vcmp.ge.f32.partialorder %v5791_v36, 0.0  ;;  %3483 = vpow2.f32 %v2768_v6 }
 0x34f   : > { %v2857_v26 = vmul.f32 %v2841_v34, %v2409_v44  ;;  %v2618_v39 = vmul.f32 %v2602_v35, %v5901_v16  ;;  %v2220_v2 = vadd.f32 %v2204_v12, %v2167_v19  ;;  %v2738_v25 = vsub.f32 0.0, %v5880_v28 }
 0x350   : > { %v2721_v40 = vmul.f32 %v2705_v4, %v5868_v0  ;;  %v2491_v24 = vmul.f32 0.3275911, %v2475_v42  ;;  %v2364_v54 = vmul.f32 %v5765_v18, %v2343_v3  ;;  %v2465_v57 = vsel %vm2449_vm11, 1.0, %v6338_v60 }
 0x351   : > { %3253 = vmatmul.mubr.f32.gmra.mrb[4].mxu0 %v2857_v26  ;;  %v2634_v32 = vadd.f32 1.4214138, %v2618_v39  ;;  %v2274_v49 = vadd.f32 %v2258_v29, %v2220_v2  ;;  %v2754_v20 = vmul.f32 %v2738_v25, %v5880_v28  ;;  %v2417_v51 = vmul.f32 0.5, %v5785_v22 }
 0x352   : > { %v3482_v47 = vpop.eup %3481  ;;  %v2801_v55 = vmul.f32 %v3480_v10, %v2721_v40  ;;  %v2507_v63 = vadd.f32 1.0, %v2491_v24  ;;  %vm2442_vm12 = vcmp.ge.f32.partialorder %v5834_v48, 0.0  ;;  %v2731_v33 = vsub.f32 0.0, %v2475_v42 }
 0x353   : > { %v2546_v50 = vmul.f32 %v3482_v47, %v2514_v14  ;;  %v2650_v58 = vmul.f32 %v2634_v32, %v5901_v16  ;;  %v2327_v36 = vadd.f32 %v2311_v52, %v2274_v49  ;;  %v2784_v21 = vmul.f32 1.442695, %v2754_v20 }
 0x354   : > { %v2817_v7 = vsub.f32 1.0, %v2801_v55  ;;  %3485 = vrcp.f32 %v2507_v63  ;;  %v2458_v17 = vsel %vm2442_vm12, 1.0, %v6338_v60  ;;  %v2410_v48 = vmul.f32 0.5, %v5824_v15 }
 0x355   : > { %v2562_v0 = vsub.f32 2.0, %v2546_v50  ;;  %v2666_v1 = vadd.f32 -0.28449672, %v2650_v58  ;;  %v2380_v8 = vadd.f32 %v2364_v54, %v2327_v36  ;;  %3487 = vpow2.f32 %v2784_v21 }
 0x356   : > { %v2833_v27 = vmul.f32 %v2817_v7, %v2465_v57  ;;  %v2747_v35 = vmul.f32 %v2731_v33, %v2475_v42  ;;  %vm2450_vm13 = vcmp.ge.f32.partialorder %v5873_v46, 0.0  ;;  %vm2443_vm14 = vcmp.ge.f32.partialorder %v5914_v59, 0.0 }
 0x357   : > { %v2578_v56 = vmul.f32 %v3482_v47, %v2562_v0  ;;  %v2682_v18 = vmul.f32 %v2666_v1, %v5901_v16  ;;  %v5930_v14 = vadd.f32 %v5821_v13, %v2380_v8  ;;  %v2466_v25 = vsel %vm2450_vm13, 1.0, %v6338_v60 }
 0x358   : > { %v2849_v41 = vadd.f32 1.0, %v2833_v27  ;;  %v3484_v11 = vpop.eup %3483  ;;  %v2770_v2 = vmul.f32 1.442695, %v2747_v35 }
 0x359   : > { %v2594_v45 = vmul.f32 1.0614054, %v2578_v56  ;;  %v2698_v31 = vadd.f32 0.2548296, %v2682_v18  ;;  %v5933_v43 = vmul.f32 0.70710677, %v5930_v14 }
 0x35a   : > { %v2865_v38 = vmul.f32 %v2849_v41, %v2417_v51 }
 0x35b   : > { %v2610_v28 = vadd.f32 -1.4531521, %v2594_v45  ;;  %v2714_v22 = vmul.f32 %v2698_v31, %v5901_v16  ;;  %v2483_v44 = vand.u32 2147483647, %v5933_v43  ;;  %vm2451_vm15 = vcmp.ge.f32.partialorder %v5933_v43, 0.0 }
 0x35c   : > { %3265 = vmatmul.mubr.f32.gmra.mrb[4].mxu1 %v2865_v38  ;;  %v2467_v33 = vsel %vm2451_vm15, 1.0, %v6338_v60 }
 0x35d   : > { %v2626_v61 = vmul.f32 %v2610_v28, %v2578_v56  ;;  %v2794_v13 = vmul.f32 %v3484_v11, %v2714_v22  ;;  %v2499_v62 = vmul.f32 0.3275911, %v2483_v44  ;;  %v2739_v49 = vsub.f32 0.0, %v2483_v44 }
 0x35e   : > { %v3486_v10 = vpop.eup %3485  ;;  %v2411_v28 = vmul.f32 0.5, %v5907_v9 }
 0x35f   : > { %v2642_v30 = vadd.f32 1.4214138, %v2626_v61  ;;  %v2810_v5 = vsub.f32 1.0, %v2794_v13  ;;  %v2539_v12 = vmul.f32 %v3486_v10, %v2507_v63  ;;  %v2515_v53 = vadd.f32 1.0, %v2499_v62  ;;  %v3488_v52 = vpop.eup %3487 }
 0x360   : > { %v2418_v63 = vmul.f32 0.5, %v5865_v37  ;;  %v2755_v7 = vmul.f32 %v2739_v49, %v2483_v44  ;;  %v2459_v37 = vsel %vm2443_vm14, 1.0, %v6338_v60 }
 0x361   : > { %v2658_v6 = vmul.f32 %v2642_v30, %v2578_v56  ;;  %v2826_v23 = vmul.f32 %v2810_v5, %v2458_v17  ;;  %v2555_v16 = vsub.f32 2.0, %v2539_v12  ;;  %3489 = vrcp.f32 %v2515_v53 }
 0x362   : > { %3491 = vpow2.f32 %v2770_v2  ;;  %v2786_v27 = vmul.f32 1.442695, %v2755_v7  ;;  %v2419_v12 = vmul.f32 0.5, %v5930_v14 }
 0x363   : > { %v2674_v34 = vadd.f32 -0.28449672, %v2658_v6  ;;  %v2842_v19 = vadd.f32 1.0, %v2826_v23  ;;  %v2571_v29 = vmul.f32 %v3486_v10, %v2555_v16 }
 0x364   : > { %3493 = vpow2.f32 %v2786_v27 }
 0x365   : > { %v2690_v4 = vmul.f32 %v2674_v34, %v2578_v56  ;;  %v2858_v3 = vmul.f32 %v2842_v19, %v2410_v48  ;;  %v2587_v26 = vmul.f32 1.0614054, %v2571_v29  ;;  %v3175_v48 = vld [vmem:[%s6038_s6] ss:$0 sm:$0xff] }
 0x367   : > { %v2706_v39 = vadd.f32 0.2548296, %v2690_v4  ;;  %3255 = vmatprep.mubr.f32.mxu0 %v2858_v3  ;;  %v2603_v40 = vadd.f32 -1.4531521, %v2587_v26 }
 0x369   : > { %v2722_v24 = vmul.f32 %v2706_v39, %v2578_v56  ;;  %v2619_v47 = vmul.f32 %v2603_v40, %v2571_v29 }
 0x36b   : > { %v2802_v15 = vmul.f32 %v3488_v52, %v2722_v24  ;;  %v3490_v32 = vpop.eup %3489  ;;  %v2635_v42 = vadd.f32 1.4214138, %v2619_v47 }
 0x36c   : > { %v2547_v55 = vmul.f32 %v3490_v32, %v2515_v53  ;;  %v3492_v56 = vpop.eup %3491 }
 0x36d   : > { %v2818_v54 = vsub.f32 1.0, %v2802_v15  ;;  %v2651_v50 = vmul.f32 %v2635_v42, %v2571_v29 }
 0x36e   : > { %v2563_v58 = vsub.f32 2.0, %v2547_v55  ;;  %v3494_v17 = vpop.eup %3493 }
 0x36f   : > { %v2834_v57 = vmul.f32 %v2818_v54, %v2466_v25  ;;  %v2667_v36 = vadd.f32 -0.28449672, %v2651_v50 }
 0x370   : > { %v2579_v46 = vmul.f32 %v3490_v32, %v2563_v58 }
 0x371   : > { %v2850_v0 = vadd.f32 1.0, %v2834_v57  ;;  %v2683_v1 = vmul.f32 %v2667_v36, %v2571_v29 }
 0x372   : > { %v2595_v8 = vmul.f32 1.0614054, %v2579_v46 }
 0x373   : > { %v2866_v20 = vmul.f32 %v2850_v0, %v2418_v63  ;;  %v2699_v51 = vadd.f32 0.2548296, %v2683_v1 }
 0x374   : > { %v2611_v18 = vadd.f32 -1.4531521, %v2595_v8 }
 0x375   : > { %3267 = vmatprep.mubr.f32.mxu1 %v2866_v20  ;;  %v2715_v41 = vmul.f32 %v2699_v51, %v2571_v29 }
 0x376   : > { %v2627_v45 = vmul.f32 %v2611_v18, %v2579_v46 }
 0x377   : > { %v2795_v31 = vmul.f32 %v3492_v56, %v2715_v41 }
 0x378   : > { %v2643_v21 = vadd.f32 1.4214138, %v2627_v45 }
 0x379   : > { %v2811_v11 = vsub.f32 1.0, %v2795_v31 }
 0x37a   : > { %v2659_v38 = vmul.f32 %v2643_v21, %v2579_v46 }
 0x37b   : > { %v2827_v22 = vmul.f32 %v2811_v11, %v2459_v37 }
 0x37c   : > { %v2675_v44 = vadd.f32 -0.28449672, %v2659_v38 }
 0x37d   : > { %v2843_v61 = vadd.f32 1.0, %v2827_v22 }
 0x37e   : > { %v2691_v13 = vmul.f32 %v2675_v44, %v2579_v46 }
 0x37f   : > { %v2859_v62 = vmul.f32 %v2843_v61, %v2411_v28 }
 0x380   : > { %v2707_v10 = vadd.f32 0.2548296, %v2691_v13 }
 0x381   : > { %3256 = vmatmul.mubr.f32.gmra.mrb[6].mxu0 %v2859_v62 }
 0x382   : > { %v2723_v59 = vmul.f32 %v2707_v10, %v2579_v46 }
 0x384   : > { %v2803_v30 = vmul.f32 %v3494_v17, %v2723_v59 }
 0x386   : > { %v2819_v5 = vsub.f32 1.0, %v2803_v30 }
 0x388   : > { %v2835_v9 = vmul.f32 %v2819_v5, %v2467_v33 }
 0x38a   : > { %v2851_v53 = vadd.f32 1.0, %v2835_v9 }
 0x38c   : > { %v2867_v6 = vmul.f32 %v2851_v53, %v2419_v12 }
 0x38e   : > { %3268 = vmatmul.mubr.f32.gmra.mrb[6].mxu1 %v2867_v6 }
 0x3ce   : > { %v3248_v23 = vpop.f32.mrb[0].mxu0 }
 0x3cf   : > { %v2963_v43 = vadd.f32 %v3248_v23, %v3175_v48  ;;  %v2957_v16 = vpop.f32.mrb[1].mxu0 }
 0x3d0   : > { %v2958_v34 = vadd.f32 %v3175_v48, %v2957_v16 }
 0x3d1   : > { %3037 = vst [vmem:[%s5073_s22 + $0x8] sm:$0xff] %v2963_v43 }
 0x3d2   : > { %v3260_v60 = vpop.f32.mrb[0].mxu1  ;;  %3036 = vst [vmem:[%s5073_s22] sm:$0xff] %v2958_v34 }
 0x3d3   : > { %v3003_v14 = vadd.f32 %v3260_v60, %v3175_v48  ;;  %v2997_v35 = vpop.f32.mrb[1].mxu1 }
 0x3d4   : > { %v2998_v19 = vadd.f32 %v3175_v48, %v2997_v35 }
 0x3d5   : > { %3045 = vst [vmem:[%s5073_s22 + $0x48] sm:$0xff] %v3003_v14 }
 0x3d6   : > { %3044 = vst [vmem:[%s5073_s22 + $0x40] sm:$0xff] %v2998_v19 }
 0x3f6   : > { %v3251_v29 = vpop.f32.mrb[2].mxu0 }
 0x3f7   : > { %v2973_v4 = vadd.f32 %v3251_v29, %v3175_v48  ;;  %v2967_v3 = vpop.f32.mrb[3].mxu0 }
 0x3f8   : > { %v2968_v26 = vadd.f32 %v3175_v48, %v2967_v3 }
 0x3f9   : > { %3039 = vst [vmem:[%s5073_s22 + $0x18] sm:$0xff] %v2973_v4 }
 0x3fa   : > { %3038 = vst [vmem:[%s5073_s22 + $0x10] sm:$0xff] %v2968_v26 }
 0x405   : > { %v3263_v39 = vpop.f32.mrb[2].mxu1 }
 0x406   : > { %v3013_v2 = vadd.f32 %v3263_v39, %v3175_v48  ;;  %v3007_v52 = vpop.f32.mrb[3].mxu1 }
 0x407   : > { %v3008_v40 = vadd.f32 %v3175_v48, %v3007_v52 }
 0x408   : > { %3047 = vst [vmem:[%s5073_s22 + $0x58] sm:$0xff] %v3013_v2 }
 0x409   : > { %3046 = vst [vmem:[%s5073_s22 + $0x50] sm:$0xff] %v3008_v40 }
 0x424   : > { %v3254_v24 = vpop.f32.mrb[4].mxu0 }
 0x425   : > { %v2983_v47 = vadd.f32 %v3254_v24, %v3175_v48  ;;  %v2977_v15 = vpop.f32.mrb[5].mxu0 }
 0x426   : > { %v2978_v32 = vadd.f32 %v3175_v48, %v2977_v15 }
 0x427   : > { %3041 = vst [vmem:[%s5073_s22 + $0x28] sm:$0xff] %v2983_v47 }
 0x428   : > { %3040 = vst [vmem:[%s5073_s22 + $0x20] sm:$0xff] %v2978_v32 }
 0x42f   : > { %v3266_v25 = vpop.f32.mrb[4].mxu1 }
 0x430   : > { %v3023_v42 = vadd.f32 %v3266_v25, %v3175_v48  ;;  %v3017_v49 = vpop.f32.mrb[5].mxu1 }
 0x431   : > { %v3018_v54 = vadd.f32 %v3175_v48, %v3017_v49 }
 0x432   : > { %3049 = vst [vmem:[%s5073_s22 + $0x68] sm:$0xff] %v3023_v42 }
 0x433   : > { %3048 = vst [vmem:[%s5073_s22 + $0x60] sm:$0xff] %v3018_v54 }
 0x454   : > { %v3257_v55 = vpop.f32.mrb[6].mxu0 }
 0x455   : > { %v2993_v50 = vadd.f32 %v3257_v55, %v3175_v48  ;;  %v2987_v63 = vpop.f32.mrb[7].mxu0 }
 0x456   : > { %v2988_v57 = vadd.f32 %v3175_v48, %v2987_v63 }
 0x457   : > { %3043 = vst [vmem:[%s5073_s22 + $0x38] sm:$0xff] %v2993_v50 }
 0x458   : > { %3042 = vst [vmem:[%s5073_s22 + $0x30] sm:$0xff] %v2988_v57 }
 0x461   : > { %v3269_v58 = vpop.f32.mrb[6].mxu1 }
 0x462   : > { %v3033_v36 = vadd.f32 %v3269_v58, %v3175_v48  ;;  %v3027_v7 = vpop.f32.mrb[7].mxu1 }
 0x463   : > { %v3028_v0 = vadd.f32 %v3175_v48, %v3027_v7 }
 0x464   : > { %3051 = vst [vmem:[%s5073_s22 + $0x78] sm:$0xff] %v3033_v36 }
 0x465   : > { %3050 = vst [vmem:[%s5073_s22 + $0x70] sm:$0xff] %v3028_v0 }
 0x466   : > { %3518 = shalt.err (!%p3515_p9)
}
 0x467   : > { %s3519_s22 = scalar_lea.hbm %s5972_s9, 2048  ;;  %s3523_s10 = scalar_lea.hbm %s6039_s7, 8192 }
 0x468   : > { %p3520_p10 = scmp.ne.s32.totalorder %s5972_s9, %s3519_s22  ;;  %p3524_p13 = scmp.lt.u32.totalorder %s5972_s9, %s6039_s7 }
 0x469   : > { %p3525_p0 = scmp.lt.u32.totalorder %s3523_s10, %s3519_s22  ;;  %p3527_p2 = scmp.lt.u32.totalorder %s3519_s22, %s5972_s9 }
 0x46a   : > { %p3521_p11 = pnand %p3520_p10, %p3707_p3 }
 0x46b   : > { %p3526_p1 = por %p3525_p0, %p3524_p13 }
 0x46c   : > { %p3522_p12 = pneg %p3521_p11 }
 0x46d   : > { %p3528_p4 = por %p3527_p2, %p3526_p1 }
 0x46f   : > { %p3529_p5 = pnand %p3528_p4, %p3522_p12 }
 0x471   : > { %3532 = shalt.err (!%p3529_p5)
}
 0x472   : > { %s3614_s21 = smov 128   ;;  %s3615_s13 = smov 8  }
 0x473   : > { %3319 = dma.vmem_to_hbm [thread:$0]  (%p3707_p3), %s5974_s0, 2048, %s5972_s9, %s5980_s28, %s3614_s21, %s3614_s21, %s3615_s13  }
 0x474 PF: > { %p3325_p6 = scmp.ge.s32.totalorder %s3599_s8, 2  ;;  %s3083_s16 = sand.u32 1, %s3571_s24  }
 0x475   : > { %s3084_s17 = scalar_lea.sflag [#allocation4], %s3083_s16 }
 0x476   : > { %p3322_p7 = pnand %p3325_p6, %p3716_p8 }
 0x478   : > { %3566 = dma.done.wait (!%p3322_p7), %s3084_s17, 2048  }
 0x479   : > { %3568 = vsyncadd (!%p3322_p7), %s3084_s17, 4294965248  ;;  %s20_s8 = sadd.s32 1, %s3599_s8   ;;  %s6372_s24 = smov %s3575_s25 }
 0x47a   : > { %p17_p9 = scmp.ge.s32.totalorder %s20_s8, 6   ;;  %s6373_s25 = smov %s3579_s26 }
 0x47b   : > { %s6374_s26 = smov %s3725_s19  ;;  %s6375_s27 = smov %s3591_s29 }
 0x47c   : > { %s6376_s28 = smov %s3595_s30  ;;  %s6377_s29 = smov %s6380_s11 }
 0x47d   : > { %s6378_s30 = smov %s6384_s12  ;;  %19 = sbr.rel (!%p17_p9) target bundleno = 7 (0x7), region = 94 }
 0x484   :  { %3089 = vsyncpa [#allocation4], 1 }
 0x485   :  { %3091 = vsyncpa [#allocation4 + $0x1], 1 }

</bundles_post_ra>
